<compile_context>
chip_gen: v7x
topology: tpu7x:2x2x1
jax: 0.10.0
libtpu: 0.0.40
codegen_flags: <defaults>
</compile_context>

<pallas_src>
import jax
import jax.numpy as jnp
from jax.experimental import pallas as pl
from jax.experimental.pallas import tpu as pltpu

EMBED = 16
NUM_USER_FEATS = 4            # user_dims = 4*16 = 64, user_embedding_output_dims = 64
NUM_DAU_FEATS = 4             # DAU input dim = 4*16 = 64
NUM_ITEM_SLOTS = 11           # linear1 input is hard-coded to 11*16 in the module
BN_EPS = 1e-5                 # BatchNorm1d eps (eval mode, default-initialized stats)
NORM_EPS = 1e-12              # F.normalize eps
BN_SCALE = (1.0 + BN_EPS) ** -0.5   # BN eval w/ running_mean=0, running_var=1, gamma=1, beta=0
# TODO(synk): for trained checkpoints, fold the real BatchNorm running stats / affine
# params into the weights & biases (instead of the default-init BN_SCALE constant).

U16 = NUM_USER_FEATS * EMBED        # 64   (user_embedding_output_dims)
D16 = NUM_DAU_FEATS * EMBED         # 64   (DAU input width)
H1 = 512                            # mlp1 hidden width
W1OUT = U16 * 32                    # 2048 (mlp1 output width)
W2OUT = 32 * EMBED                  # 512  (mlp2 output width)
ITEM_IN = NUM_ITEM_SLOTS * EMBED    # 176  (linear1 input width)


def m2m_kernel(user_ref, dau_ref, pos_ref, neg_ref,
               wdau_ref, bdau_ref, w1b_ref, b1b_ref, wl_ref, bl_ref,
               rep_u_ref, sel32_ref, rep32_ref, sel16_ref,
               out_ref):
    f32, bf16 = jnp.float32, jnp.bfloat16

    def dense(x_bf, w_ref, b_ref):
        # torch_rechub MLP block: Linear -> BatchNorm1d(eval, folded host-side) -> ReLU
        # bf16 x bf16 MXU matmul, f32 accumulation; bias + ReLU epilogue in f32.
        y = jnp.dot(x_bf, w_ref[...], preferred_element_type=f32) + b_ref[...]
        return jnp.maximum(y, 0.0)

    def l2norm(x):
        # F.normalize: x / max(||x||, eps) == x * rsqrt(max(||x||^2, eps^2))  (EUP rsqrt)
        s = jnp.sum(x * x, axis=1, keepdims=True)
        return x * jax.lax.rsqrt(jnp.maximum(s, NORM_EPS * NORM_EPS))

    u = user_ref[...]                              # (TB, 64) f32
    u_bf = u.astype(bf16)
    dau_bf = dau_ref[...].astype(bf16)             # (TB, 64) bf16

    # ---------------- user tower ----------------
    # fused dau-fed denses: [w1a | w2] -> single (TB, 512+512) matmul, then lane slices
    y_cat = dense(dau_bf, wdau_ref, bdau_ref)      # (TB, 1024) f32
    h1_bf = y_cat[:, :H1].astype(bf16)             # (TB, 512)  mlp1 hidden
    w2a_bf = y_cat[:, H1:].astype(bf16)            # (TB, 512)  == reshape(TB, 32, 16)

    # mlp1 second layer; hold the 2048-wide intermediate in bf16 (VMEM / MXU savings)
    w1_bf = dense(h1_bf, w1b_ref, b1b_ref).astype(bf16)   # (TB, 2048) == reshape(TB, 64, 32)

    # per-sample (TB,1,64) @ (TB,64,32) via constant 0/1 repeat/select matrices (MXU)
    u_rep = jnp.dot(u_bf, rep_u_ref[...], preferred_element_type=f32)   # (TB, 2048)
    p1_bf = (u_rep * w1_bf).astype(bf16)
    ue32 = jnp.dot(p1_bf, sel32_ref[...], preferred_element_type=f32)   # (TB, 32)

    # per-sample (TB,1,32) @ (TB,32,16)
    ue32_rep = jnp.dot(ue32.astype(bf16), rep32_ref[...], preferred_element_type=f32)  # (TB, 512)
    p2_bf = (ue32_rep * w2a_bf).astype(bf16)
    ue16 = jnp.dot(p2_bf, sel16_ref[...], preferred_element_type=f32)   # (TB, 16)

    # + mean over the user-feature slots of input_user (static lane slices on the VPU)
    u_mean = u[:, 0:EMBED]
    for f in range(1, NUM_USER_FEATS):
        u_mean = u_mean + u[:, f * EMBED:(f + 1) * EMBED]
    u_mean = u_mean * (1.0 / NUM_USER_FEATS)

    ue = l2norm(ue16 + u_mean)                     # F.normalize(dim=2), (TB, 16)

    # ---------------- item tower ----------------
    # pos / neg as two small N=16 dots (no sublane-concat VMEM copy)
    pos_e = l2norm(dense(pos_ref[...].astype(bf16), wl_ref, bl_ref))    # (TB, 16)
    neg_e = l2norm(dense(neg_ref[...].astype(bf16), wl_ref, bl_ref))    # (TB, 16)

    # scores: elementwise mul + reduce over embedding dim; single lane-packed (TB, 2) store
    pos_s = jnp.sum(ue * pos_e, axis=1, keepdims=True)
    neg_s = jnp.sum(ue * neg_e, axis=1, keepdims=True)
    out_ref[...] = jnp.concatenate([pos_s, neg_s], axis=1)


def _prep_weights(params):
    """Fold BN (eval) into the weights/biases, fuse the dau-fed denses, build the 0/1
    repeat/select constants, and cast all weight matrices to bf16 (biases stay f32)."""
    f32, bf16 = jnp.float32, jnp.bfloat16
    s = jnp.asarray(BN_SCALE, f32)
    wdau = jnp.concatenate([params["w1a"], params["w2"]], axis=1) * s   # (64, 1024)
    bdau = jnp.concatenate([params["b1a"], params["b2"]], axis=1) * s   # (1, 1024)
    return dict(
        wdau=wdau.astype(bf16), bdau=bdau.astype(f32),
        w1b=(params["w1b"] * s).astype(bf16), b1b=(params["b1b"] * s).astype(f32),
        wl=(params["wl"] * s).astype(bf16), bl=(params["bl"] * s).astype(f32),
        # constant 0/1 repeat / select matrices (exact in bf16)
        rep_u=jnp.kron(jnp.eye(U16, dtype=f32), jnp.ones((1, 32), f32)).astype(bf16),   # (64, 2048)
        sel32=jnp.tile(jnp.eye(32, dtype=f32), (U16, 1)).astype(bf16),                  # (2048, 32)
        rep32=jnp.kron(jnp.eye(32, dtype=f32), jnp.ones((1, EMBED), f32)).astype(bf16), # (32, 512)
        sel16=jnp.tile(jnp.eye(EMBED, dtype=f32), (32, 1)).astype(bf16),                # (512, 16)
    )


def m2m_forward(input_user, dau, pos_flat, neg_flat, params, tb=512):
    f32 = jnp.float32
    B = input_user.shape[0]

    # Pad the batch only to the 8-row sublane quantum (not to a full tile); ragged tail
    # tiles are handled by Pallas boundary masking, avoiding a full-size jnp.pad copy.
    Bp = ((B + 7) // 8) * 8
    pad = Bp - B
    padb = (lambda x: jnp.pad(x, ((0, pad), (0, 0)))) if pad else (lambda x: x)
    user_p, dau_p, pos_p, neg_p = map(padb, (input_user, dau, pos_flat, neg_flat))

    # Batch tile: multiple of 8; prefer >= 2 tiles so both v7x TensorCores get work.
    tb_eff = min(tb, Bp)
    if pl.cdiv(Bp, tb_eff) == 1 and Bp >= 16:
        tb_eff = ((pl.cdiv(Bp, 2) + 7) // 8) * 8
    n_tiles = pl.cdiv(Bp, tb_eff)

    prep = _prep_weights(params)

    act_args = (user_p, dau_p, pos_p, neg_p)
    res_args = (prep["wdau"], prep["bdau"], prep["w1b"], prep["b1b"],
                prep["wl"], prep["bl"],
                prep["rep_u"], prep["sel32"], prep["rep32"], prep["sel16"])

    act_specs = [pl.BlockSpec((tb_eff, a.shape[1]), lambda i: (i, 0)) for a in act_args]
    # Residents: constant index_map -> DMA'd once, stay VMEM-resident across tiles.
    # TODO(synk): on v7x (64 MiB VMEM) single-buffer these residents (pipeline_mode /
    # one-shot copy into scratch) to reclaim the ~2.6 MiB of double-buffer headroom.
    res_specs = [pl.BlockSpec(w.shape, lambda i: (0, 0)) for w in res_args]
    out_spec = pl.BlockSpec((tb_eff, 2), lambda i: (i, 0))

    flops_per_row = 2 * (D16 * (H1 + W2OUT) + H1 * W1OUT + U16 * W1OUT + W1OUT * 32
                         + 32 * W2OUT + W2OUT * EMBED + 2 * ITEM_IN * EMBED)
    res_bytes = sum(int(a.size) * a.dtype.itemsize for a in res_args)
    act_bytes = 4 * (U16 + D16 + 2 * ITEM_IN + 2)
    cost = pl.CostEstimate(flops=flops_per_row * Bp,
                           transcendentals=3 * Bp,
                           bytes_accessed=act_bytes * Bp + res_bytes)

    scores = pl.pallas_call(
        m2m_kernel,
        out_shape=jax.ShapeDtypeStruct((Bp, 2), f32),
        grid_spec=pltpu.PrefetchScalarGridSpec(
            num_scalar_prefetch=0,
            grid=(n_tiles,),
            in_specs=act_specs + res_specs,
            out_specs=out_spec),
        compiler_params=pltpu.CompilerParams(
            dimension_semantics=("parallel",),
            vmem_limit_bytes=48 * 1024 * 1024),
        cost_estimate=cost,
    )(*act_args, *res_args)

    return scores[:B, 0], scores[:B, 1]


def ref_forward(input_user, dau, pos_flat, neg_flat, params):
    """Pure-JAX f32 reference mirroring the PyTorch module forward (eval mode)."""
    def dense(x, w, b):
        return jnp.maximum((x @ w + b) * BN_SCALE, 0.0)

    def l2norm(x, axis):
        n = jnp.linalg.norm(x, axis=axis, keepdims=True)
        return x / jnp.maximum(n, NORM_EPS)

    B = input_user.shape[0]
    h1 = dense(dau, params["w1a"], params["b1a"][0])
    w1 = dense(h1, params["w1b"], params["b1b"][0]).reshape(B, U16, 32)
    w2 = dense(dau, params["w2"], params["b2"][0]).reshape(B, 32, EMBED)
    iu = input_user.reshape(B, 1, U16)
    ue = jnp.matmul(iu, w1).reshape(B, 1, 32)
    ue = jnp.matmul(ue, w2).reshape(B, 1, EMBED)
    ue = ue + jnp.mean(input_user.reshape(B, NUM_USER_FEATS, EMBED), axis=1, keepdims=True)
    ue = l2norm(ue, axis=2)[:, 0, :]
    pos = l2norm(dense(pos_flat, params["wl"], params["bl"][0]).reshape(B, 1, EMBED), 2)[:, 0, :]
    neg = l2norm(dense(neg_flat, params["wl"], params["bl"][0]).reshape(B, 1, EMBED), 2)[:, 0, :]
    return jnp.sum(ue * pos, axis=1), jnp.sum(ue * neg, axis=1)


def ref_forward_quantized(input_user, dau, pos_flat, neg_flat, prep):
    """Pure-JAX mirror of the kernel's bf16/f32 mixed-precision schedule (tight check)."""
    f32, bf16 = jnp.float32, jnp.bfloat16

    def dense(x_bf, w, b):
        return jnp.maximum(jnp.dot(x_bf, w, preferred_element_type=f32) + b, 0.0)

    def l2norm(x):
        s = jnp.sum(x * x, axis=1, keepdims=True)
        return x * jax.lax.rsqrt(jnp.maximum(s, NORM_EPS * NORM_EPS))

    u = input_user
    u_bf = u.astype(bf16)
    dau_bf = dau.astype(bf16)
    y_cat = dense(dau_bf, prep["wdau"], prep["bdau"])
    h1_bf = y_cat[:, :H1].astype(bf16)
    w2a_bf = y_cat[:, H1:].astype(bf16)
    w1_bf = dense(h1_bf, prep["w1b"], prep["b1b"]).astype(bf16)
    u_rep = jnp.dot(u_bf, prep["rep_u"], preferred_element_type=f32)
    ue32 = jnp.dot((u_rep * w1_bf).astype(bf16), prep["sel32"], preferred_element_type=f32)
    ue32_rep = jnp.dot(ue32.astype(bf16), prep["rep32"], preferred_element_type=f32)
    ue16 = jnp.dot((ue32_rep * w2a_bf).astype(bf16), prep["sel16"], preferred_element_type=f32)
    u_mean = jnp.mean(u.reshape(-1, NUM_USER_FEATS, EMBED), axis=1)
    ue = l2norm(ue16 + u_mean)
    pos_e = l2norm(dense(pos_flat.astype(bf16), prep["wl"], prep["bl"]))
    neg_e = l2norm(dense(neg_flat.astype(bf16), prep["wl"], prep["bl"]))
    return jnp.sum(ue * pos_e, axis=1), jnp.sum(ue * neg_e, axis=1)


if __name__ == "__main__":
    key = jax.random.PRNGKey(0)
    keys = jax.random.split(key, 16)
    B = 2
    user_vocab, dau_vocab, item_vocab = 50, 20, 30

    # ----- EmbeddingLayer tables (deterministic parameters) -----
    user_tables = jax.random.normal(keys[0], (NUM_USER_FEATS, user_vocab, EMBED), jnp.float32) * 0.1
    dau_tables = jax.random.normal(keys[1], (NUM_DAU_FEATS, dau_vocab, EMBED), jnp.float32) * 0.1
    item_tables = jax.random.normal(keys[2], (NUM_ITEM_SLOTS, item_vocab, EMBED), jnp.float32) * 0.1

    # ----- raw categorical inputs x -----
    user_ids = jax.random.randint(keys[3], (B, NUM_USER_FEATS), 0, user_vocab)
    dau_ids = jax.random.randint(keys[4], (B, NUM_DAU_FEATS), 0, dau_vocab)
    pos_ids = jax.random.randint(keys[5], (B, NUM_ITEM_SLOTS), 0, item_vocab)
    neg_ids = jax.random.randint(keys[6], (B, NUM_ITEM_SLOTS), 0, item_vocab)

    # embedding lookup + concat (glue, plain JAX — corresponds to EmbeddingLayer)
    def lookup(tables, ids):
        return jnp.stack([tables[f][ids[:, f]] for f in range(tables.shape[0])], axis=1)

    input_user = lookup(user_tables, user_ids).reshape(B, -1)    # (B, 64)  squeeze_dim=True
    dau_in = lookup(dau_tables, dau_ids).reshape(B, -1)          # (B, 64)
    pos_flat = lookup(item_tables, pos_ids).reshape(B, -1)       # (B, 176)
    neg_flat = lookup(item_tables, neg_ids).reshape(B, -1)       # (B, 176)

    # ----- MLP parameters (deterministic; shapes from __init__) -----
    def init(k, shape, scale=0.05):
        return jax.random.normal(k, shape, jnp.float32) * scale

    params = dict(
        w1a=init(keys[7], (D16, H1)),            b1a=init(keys[8], (1, H1)),
        w1b=init(keys[9], (H1, W1OUT)),          b1b=init(keys[10], (1, W1OUT)),
        w2=init(keys[11], (D16, W2OUT)),         b2=init(keys[12], (1, W2OUT)),
        wl=init(keys[13], (ITEM_IN, EMBED)),     bl=init(keys[14], (1, EMBED)),
    )
    # NOTE: self.user_mlp is constructed in __init__ but never used in forward(); omitted.

    pos_s, neg_s = jax.block_until_ready(
        m2m_forward(input_user, dau_in, pos_flat, neg_flat, params))

    # tight check: mirror of the kernel's bf16/f32 mixed-precision schedule ...
    prep = _prep_weights(params)
    q_pos, q_neg = ref_forward_quantized(input_user, dau_in, pos_flat, neg_flat, prep)
    # ... and loose check against the pure-f32 module semantics (bounds bf16 rounding)
    ref_pos, ref_neg = ref_forward(input_user, dau_in, pos_flat, neg_flat, params)

    assert jnp.allclose(pos_s, q_pos, atol=2e-3, rtol=2e-3), (pos_s, q_pos)
    assert jnp.allclose(neg_s, q_neg, atol=2e-3, rtol=2e-3), (neg_s, q_neg)
    assert jnp.allclose(pos_s, ref_pos, atol=5e-2, rtol=5e-2), (pos_s, ref_pos)
    assert jnp.allclose(neg_s, ref_neg, atol=5e-2, rtol=5e-2), (neg_s, ref_neg)
    print("KERNEL_OK")
</pallas_src>

<mosaic_0001>
module attributes {stable_mosaic.version = 11 : i64} {
  func.func @m2m_kernel(%arg0: i32, %arg1: memref<8x64xf32, #tpu.memory_space<vmem>>, %arg2: memref<8x64xf32, #tpu.memory_space<vmem>>, %arg3: memref<8x176xf32, #tpu.memory_space<vmem>>, %arg4: memref<8x176xf32, #tpu.memory_space<vmem>>, %arg5: memref<64x1024xbf16, #tpu.memory_space<vmem>>, %arg6: memref<1x1024xf32, #tpu.memory_space<vmem>>, %arg7: memref<512x2048xbf16, #tpu.memory_space<vmem>>, %arg8: memref<1x2048xf32, #tpu.memory_space<vmem>>, %arg9: memref<176x16xbf16, #tpu.memory_space<vmem>>, %arg10: memref<1x16xf32, #tpu.memory_space<vmem>>, %arg11: memref<64x2048xbf16, #tpu.memory_space<vmem>>, %arg12: memref<2048x32xbf16, #tpu.memory_space<vmem>>, %arg13: memref<32x512xbf16, #tpu.memory_space<vmem>>, %arg14: memref<512x16xbf16, #tpu.memory_space<vmem>>, %arg15: memref<8x2xf32, #tpu.memory_space<vmem>>) attributes {dimension_semantics = [#tpu.dimension_semantics<parallel>], iteration_bounds = array<i64: 1>, scalar_prefetch = 0 : i64, scratch_operands = 0 : i64, tpu.core_type = #tpu.core_type<tc>, window_params = [{transform_indices = @transform_0, window_bounds = array<i64: 8, 64>}, {transform_indices = @transform_1, window_bounds = array<i64: 8, 64>}, {transform_indices = @transform_2, window_bounds = array<i64: 8, 176>}, {transform_indices = @transform_3, window_bounds = array<i64: 8, 176>}, {pipeline_mode = #tpu.pipeline_mode<synchronous>, transform_indices = @transform_4, window_bounds = array<i64: 64, 1024>}, {pipeline_mode = #tpu.pipeline_mode<synchronous>, transform_indices = @transform_5, window_bounds = array<i64: 1, 1024>}, {pipeline_mode = #tpu.pipeline_mode<synchronous>, transform_indices = @transform_6, window_bounds = array<i64: 512, 2048>}, {pipeline_mode = #tpu.pipeline_mode<synchronous>, transform_indices = @transform_7, window_bounds = array<i64: 1, 2048>}, {pipeline_mode = #tpu.pipeline_mode<synchronous>, transform_indices = @transform_8, window_bounds = array<i64: 176, 16>}, {pipeline_mode = #tpu.pipeline_mode<synchronous>, transform_indices = @transform_9, window_bounds = array<i64: 1, 16>}, {pipeline_mode = #tpu.pipeline_mode<synchronous>, transform_indices = @transform_10, window_bounds = array<i64: 64, 2048>}, {pipeline_mode = #tpu.pipeline_mode<synchronous>, transform_indices = @transform_11, window_bounds = array<i64: 2048, 32>}, {pipeline_mode = #tpu.pipeline_mode<synchronous>, transform_indices = @transform_12, window_bounds = array<i64: 32, 512>}, {pipeline_mode = #tpu.pipeline_mode<synchronous>, transform_indices = @transform_13, window_bounds = array<i64: 512, 16>}, {transform_indices = @transform_14, window_bounds = array<i64: 8, 2>}]} {
    %c0 = arith.constant 0 : index
    %c0_0 = arith.constant 0 : index
    %0 = vector.load %arg1[%c0, %c0_0] : memref<8x64xf32, #tpu.memory_space<vmem>>, vector<8x64xf32>
    %1 = arith.truncf %0 : vector<8x64xf32> to vector<8x64xbf16>
    %c0_1 = arith.constant 0 : index
    %c0_2 = arith.constant 0 : index
    %2 = vector.load %arg2[%c0_1, %c0_2] : memref<8x64xf32, #tpu.memory_space<vmem>>, vector<8x64xf32>
    %3 = arith.truncf %2 : vector<8x64xf32> to vector<8x64xbf16>
    %c0_3 = arith.constant 0 : index
    %c0_4 = arith.constant 0 : index
    %4 = vector.load %arg5[%c0_3, %c0_4] : memref<64x1024xbf16, #tpu.memory_space<vmem>>, vector<64x1024xbf16>
    %cst = arith.constant dense<0.000000e+00> : vector<8x1024xf32>
    %5 = tpu.matmul %3, %4, %cst {dimension_numbers = #tpu.dot_dimension_numbers<[1], [0], [0], [1], [0, 0, 1, 1], [], []>} : vector<8x64xbf16>, vector<64x1024xbf16>, vector<8x1024xf32> -> vector<8x1024xf32>
    %c0_5 = arith.constant 0 : index
    %c0_6 = arith.constant 0 : index
    %6 = vector.load %arg6[%c0_5, %c0_6] : memref<1x1024xf32, #tpu.memory_space<vmem>>, vector<1x1024xf32>
    %7 = vector.broadcast %6 : vector<1x1024xf32> to vector<8x1024xf32>
    %8 = arith.addf %5, %7 : vector<8x1024xf32>
    %cst_7 = arith.constant 0.000000e+00 : f32
    %9 = vector.broadcast %cst_7 : f32 to vector<8x1024xf32>
    %10 = arith.maximumf %8, %9 : vector<8x1024xf32>
    %11 = vector.extract_strided_slice %10 {offsets = [0, 0], sizes = [8, 512], strides = [1, 1]} : vector<8x1024xf32> to vector<8x512xf32>
    %12 = arith.truncf %11 : vector<8x512xf32> to vector<8x512xbf16>
    %13 = vector.extract_strided_slice %10 {offsets = [0, 512], sizes = [8, 512], strides = [1, 1]} : vector<8x1024xf32> to vector<8x512xf32>
    %14 = arith.truncf %13 : vector<8x512xf32> to vector<8x512xbf16>
    %c0_8 = arith.constant 0 : index
    %c0_9 = arith.constant 0 : index
    %15 = vector.load %arg7[%c0_8, %c0_9] : memref<512x2048xbf16, #tpu.memory_space<vmem>>, vector<512x2048xbf16>
    %cst_10 = arith.constant dense<0.000000e+00> : vector<8x2048xf32>
    %16 = tpu.matmul %12, %15, %cst_10 {dimension_numbers = #tpu.dot_dimension_numbers<[1], [0], [0], [1], [0, 0, 1, 1], [], []>} : vector<8x512xbf16>, vector<512x2048xbf16>, vector<8x2048xf32> -> vector<8x2048xf32>
    %c0_11 = arith.constant 0 : index
    %c0_12 = arith.constant 0 : index
    %17 = vector.load %arg8[%c0_11, %c0_12] : memref<1x2048xf32, #tpu.memory_space<vmem>>, vector<1x2048xf32>
    %18 = vector.broadcast %17 : vector<1x2048xf32> to vector<8x2048xf32>
    %19 = arith.addf %16, %18 : vector<8x2048xf32>
    %cst_13 = arith.constant 0.000000e+00 : f32
    %20 = vector.broadcast %cst_13 : f32 to vector<8x2048xf32>
    %21 = arith.maximumf %19, %20 : vector<8x2048xf32>
    %22 = arith.truncf %21 : vector<8x2048xf32> to vector<8x2048xbf16>
    %c0_14 = arith.constant 0 : index
    %c0_15 = arith.constant 0 : index
    %23 = vector.load %arg11[%c0_14, %c0_15] : memref<64x2048xbf16, #tpu.memory_space<vmem>>, vector<64x2048xbf16>
    %cst_16 = arith.constant dense<0.000000e+00> : vector<8x2048xf32>
    %24 = tpu.matmul %1, %23, %cst_16 {dimension_numbers = #tpu.dot_dimension_numbers<[1], [0], [0], [1], [0, 0, 1, 1], [], []>} : vector<8x64xbf16>, vector<64x2048xbf16>, vector<8x2048xf32> -> vector<8x2048xf32>
    %25 = arith.extf %22 : vector<8x2048xbf16> to vector<8x2048xf32>
    %26 = arith.mulf %24, %25 : vector<8x2048xf32>
    %27 = arith.truncf %26 : vector<8x2048xf32> to vector<8x2048xbf16>
    %c0_17 = arith.constant 0 : index
    %c0_18 = arith.constant 0 : index
    %28 = vector.load %arg12[%c0_17, %c0_18] : memref<2048x32xbf16, #tpu.memory_space<vmem>>, vector<2048x32xbf16>
    %cst_19 = arith.constant dense<0.000000e+00> : vector<8x32xf32>
    %29 = tpu.matmul %27, %28, %cst_19 {dimension_numbers = #tpu.dot_dimension_numbers<[1], [0], [0], [1], [0, 0, 1, 1], [], []>} : vector<8x2048xbf16>, vector<2048x32xbf16>, vector<8x32xf32> -> vector<8x32xf32>
    %30 = arith.truncf %29 : vector<8x32xf32> to vector<8x32xbf16>
    %c0_20 = arith.constant 0 : index
    %c0_21 = arith.constant 0 : index
    %31 = vector.load %arg13[%c0_20, %c0_21] : memref<32x512xbf16, #tpu.memory_space<vmem>>, vector<32x512xbf16>
    %cst_22 = arith.constant dense<0.000000e+00> : vector<8x512xf32>
    %32 = tpu.matmul %30, %31, %cst_22 {dimension_numbers = #tpu.dot_dimension_numbers<[1], [0], [0], [1], [0, 0, 1, 1], [], []>} : vector<8x32xbf16>, vector<32x512xbf16>, vector<8x512xf32> -> vector<8x512xf32>
    %33 = arith.extf %14 : vector<8x512xbf16> to vector<8x512xf32>
    %34 = arith.mulf %32, %33 : vector<8x512xf32>
    %35 = arith.truncf %34 : vector<8x512xf32> to vector<8x512xbf16>
    %c0_23 = arith.constant 0 : index
    %c0_24 = arith.constant 0 : index
    %36 = vector.load %arg14[%c0_23, %c0_24] : memref<512x16xbf16, #tpu.memory_space<vmem>>, vector<512x16xbf16>
    %cst_25 = arith.constant dense<0.000000e+00> : vector<8x16xf32>
    %37 = tpu.matmul %35, %36, %cst_25 {dimension_numbers = #tpu.dot_dimension_numbers<[1], [0], [0], [1], [0, 0, 1, 1], [], []>} : vector<8x512xbf16>, vector<512x16xbf16>, vector<8x16xf32> -> vector<8x16xf32>
    %38 = vector.extract_strided_slice %0 {offsets = [0, 0], sizes = [8, 16], strides = [1, 1]} : vector<8x64xf32> to vector<8x16xf32>
    %39 = vector.extract_strided_slice %0 {offsets = [0, 16], sizes = [8, 16], strides = [1, 1]} : vector<8x64xf32> to vector<8x16xf32>
    %40 = arith.addf %38, %39 : vector<8x16xf32>
    %41 = vector.extract_strided_slice %0 {offsets = [0, 32], sizes = [8, 16], strides = [1, 1]} : vector<8x64xf32> to vector<8x16xf32>
    %42 = arith.addf %40, %41 : vector<8x16xf32>
    %43 = vector.extract_strided_slice %0 {offsets = [0, 48], sizes = [8, 16], strides = [1, 1]} : vector<8x64xf32> to vector<8x16xf32>
    %44 = arith.addf %42, %43 : vector<8x16xf32>
    %cst_26 = arith.constant 2.500000e-01 : f32
    %45 = vector.broadcast %cst_26 : f32 to vector<8x16xf32>
    %46 = arith.mulf %44, %45 : vector<8x16xf32>
    %47 = arith.addf %37, %46 : vector<8x16xf32>
    %48 = arith.mulf %47, %47 : vector<8x16xf32>
    %cst_27 = arith.constant dense<0.000000e+00> : vector<8xf32>
    %49 = vector.multi_reduction <add>, %48, %cst_27 [1] : vector<8x16xf32> to vector<8xf32>
    %50 = vector.shape_cast %49 : vector<8xf32> to vector<8x1xf32>
    %cst_28 = arith.constant 1.000000e-24 : f32
    %51 = vector.broadcast %cst_28 : f32 to vector<8x1xf32>
    %52 = arith.maximumf %50, %51 : vector<8x1xf32>
    %53 = math.rsqrt %52 : vector<8x1xf32>
    %54 = vector.broadcast %53 : vector<8x1xf32> to vector<8x16xf32>
    %55 = arith.mulf %47, %54 : vector<8x16xf32>
    %c0_29 = arith.constant 0 : index
    %c0_30 = arith.constant 0 : index
    %56 = vector.load %arg3[%c0_29, %c0_30] : memref<8x176xf32, #tpu.memory_space<vmem>>, vector<8x176xf32>
    %57 = arith.truncf %56 : vector<8x176xf32> to vector<8x176xbf16>
    %c0_31 = arith.constant 0 : index
    %c0_32 = arith.constant 0 : index
    %58 = vector.load %arg9[%c0_31, %c0_32] : memref<176x16xbf16, #tpu.memory_space<vmem>>, vector<176x16xbf16>
    %cst_33 = arith.constant dense<0.000000e+00> : vector<8x16xf32>
    %59 = tpu.matmul %57, %58, %cst_33 {dimension_numbers = #tpu.dot_dimension_numbers<[1], [0], [0], [1], [0, 0, 1, 1], [], []>} : vector<8x176xbf16>, vector<176x16xbf16>, vector<8x16xf32> -> vector<8x16xf32>
    %c0_34 = arith.constant 0 : index
    %c0_35 = arith.constant 0 : index
    %60 = vector.load %arg10[%c0_34, %c0_35] : memref<1x16xf32, #tpu.memory_space<vmem>>, vector<1x16xf32>
    %61 = vector.broadcast %60 : vector<1x16xf32> to vector<8x16xf32>
    %62 = arith.addf %59, %61 : vector<8x16xf32>
    %cst_36 = arith.constant 0.000000e+00 : f32
    %63 = vector.broadcast %cst_36 : f32 to vector<8x16xf32>
    %64 = arith.maximumf %62, %63 : vector<8x16xf32>
    %65 = arith.mulf %64, %64 : vector<8x16xf32>
    %cst_37 = arith.constant dense<0.000000e+00> : vector<8xf32>
    %66 = vector.multi_reduction <add>, %65, %cst_37 [1] : vector<8x16xf32> to vector<8xf32>
    %67 = vector.shape_cast %66 : vector<8xf32> to vector<8x1xf32>
    %cst_38 = arith.constant 1.000000e-24 : f32
    %68 = vector.broadcast %cst_38 : f32 to vector<8x1xf32>
    %69 = arith.maximumf %67, %68 : vector<8x1xf32>
    %70 = math.rsqrt %69 : vector<8x1xf32>
    %71 = vector.broadcast %70 : vector<8x1xf32> to vector<8x16xf32>
    %72 = arith.mulf %64, %71 : vector<8x16xf32>
    %c0_39 = arith.constant 0 : index
    %c0_40 = arith.constant 0 : index
    %73 = vector.load %arg4[%c0_39, %c0_40] : memref<8x176xf32, #tpu.memory_space<vmem>>, vector<8x176xf32>
    %74 = arith.truncf %73 : vector<8x176xf32> to vector<8x176xbf16>
    %c0_41 = arith.constant 0 : index
    %c0_42 = arith.constant 0 : index
    %75 = vector.load %arg9[%c0_41, %c0_42] : memref<176x16xbf16, #tpu.memory_space<vmem>>, vector<176x16xbf16>
    %cst_43 = arith.constant dense<0.000000e+00> : vector<8x16xf32>
    %76 = tpu.matmul %74, %75, %cst_43 {dimension_numbers = #tpu.dot_dimension_numbers<[1], [0], [0], [1], [0, 0, 1, 1], [], []>} : vector<8x176xbf16>, vector<176x16xbf16>, vector<8x16xf32> -> vector<8x16xf32>
    %c0_44 = arith.constant 0 : index
    %c0_45 = arith.constant 0 : index
    %77 = vector.load %arg10[%c0_44, %c0_45] : memref<1x16xf32, #tpu.memory_space<vmem>>, vector<1x16xf32>
    %78 = vector.broadcast %77 : vector<1x16xf32> to vector<8x16xf32>
    %79 = arith.addf %76, %78 : vector<8x16xf32>
    %cst_46 = arith.constant 0.000000e+00 : f32
    %80 = vector.broadcast %cst_46 : f32 to vector<8x16xf32>
    %81 = arith.maximumf %79, %80 : vector<8x16xf32>
    %82 = arith.mulf %81, %81 : vector<8x16xf32>
    %cst_47 = arith.constant dense<0.000000e+00> : vector<8xf32>
    %83 = vector.multi_reduction <add>, %82, %cst_47 [1] : vector<8x16xf32> to vector<8xf32>
    %84 = vector.shape_cast %83 : vector<8xf32> to vector<8x1xf32>
    %cst_48 = arith.constant 1.000000e-24 : f32
    %85 = vector.broadcast %cst_48 : f32 to vector<8x1xf32>
    %86 = arith.maximumf %84, %85 : vector<8x1xf32>
    %87 = math.rsqrt %86 : vector<8x1xf32>
    %88 = vector.broadcast %87 : vector<8x1xf32> to vector<8x16xf32>
    %89 = arith.mulf %81, %88 : vector<8x16xf32>
    %90 = arith.mulf %55, %72 : vector<8x16xf32>
    %cst_49 = arith.constant dense<0.000000e+00> : vector<8xf32>
    %91 = vector.multi_reduction <add>, %90, %cst_49 [1] : vector<8x16xf32> to vector<8xf32>
    %92 = vector.shape_cast %91 : vector<8xf32> to vector<8x1xf32>
    %93 = arith.mulf %55, %89 : vector<8x16xf32>
    %cst_50 = arith.constant dense<0.000000e+00> : vector<8xf32>
    %94 = vector.multi_reduction <add>, %93, %cst_50 [1] : vector<8x16xf32> to vector<8xf32>
    %95 = vector.shape_cast %94 : vector<8xf32> to vector<8x1xf32>
    %96 = tpu.concatenate %92, %95 in 1 : vector<8x1xf32>, vector<8x1xf32> -> vector<8x2xf32>
    %c0_51 = arith.constant 0 : index
    %c0_52 = arith.constant 0 : index
    %97 = vector.load %arg15[%c0_51, %c0_52] : memref<8x2xf32, #tpu.memory_space<vmem>>, vector<8x2xf32>
    tpu.vector_store %arg15[%c0_51, %c0_52], %96 {strides = array<i32>} : memref<8x2xf32, #tpu.memory_space<vmem>>, vector<8x2xf32>,
    return
  }
  func.func @transform_0(%arg0: i32) -> (i32, i32) {
    %c0_i32 = arith.constant 0 : i32
    %c0_i32_0 = arith.constant 0 : i32
    return %arg0, %c0_i32 : i32, i32
  }
  func.func @transform_1(%arg0: i32) -> (i32, i32) {
    %c0_i32 = arith.constant 0 : i32
    %c0_i32_0 = arith.constant 0 : i32
    return %arg0, %c0_i32 : i32, i32
  }
  func.func @transform_2(%arg0: i32) -> (i32, i32) {
    %c0_i32 = arith.constant 0 : i32
    %c0_i32_0 = arith.constant 0 : i32
    return %arg0, %c0_i32 : i32, i32
  }
  func.func @transform_3(%arg0: i32) -> (i32, i32) {
    %c0_i32 = arith.constant 0 : i32
    %c0_i32_0 = arith.constant 0 : i32
    return %arg0, %c0_i32 : i32, i32
  }
  func.func @transform_4(%arg0: i32) -> (i32, i32) {
    %c0_i32 = arith.constant 0 : i32
    %c0_i32_0 = arith.constant 0 : i32
    %c0_i32_1 = arith.constant 0 : i32
    return %c0_i32, %c0_i32_0 : i32, i32
  }
  func.func @transform_5(%arg0: i32) -> (i32, i32) {
    %c0_i32 = arith.constant 0 : i32
    %c0_i32_0 = arith.constant 0 : i32
    %c0_i32_1 = arith.constant 0 : i32
    return %c0_i32, %c0_i32_0 : i32, i32
  }
  func.func @transform_6(%arg0: i32) -> (i32, i32) {
    %c0_i32 = arith.constant 0 : i32
    %c0_i32_0 = arith.constant 0 : i32
    %c0_i32_1 = arith.constant 0 : i32
    return %c0_i32, %c0_i32_0 : i32, i32
  }
  func.func @transform_7(%arg0: i32) -> (i32, i32) {
    %c0_i32 = arith.constant 0 : i32
    %c0_i32_0 = arith.constant 0 : i32
    %c0_i32_1 = arith.constant 0 : i32
    return %c0_i32, %c0_i32_0 : i32, i32
  }
  func.func @transform_8(%arg0: i32) -> (i32, i32) {
    %c0_i32 = arith.constant 0 : i32
    %c0_i32_0 = arith.constant 0 : i32
    %c0_i32_1 = arith.constant 0 : i32
    return %c0_i32, %c0_i32_0 : i32, i32
  }
  func.func @transform_9(%arg0: i32) -> (i32, i32) {
    %c0_i32 = arith.constant 0 : i32
    %c0_i32_0 = arith.constant 0 : i32
    %c0_i32_1 = arith.constant 0 : i32
    return %c0_i32, %c0_i32_0 : i32, i32
  }
  func.func @transform_10(%arg0: i32) -> (i32, i32) {
    %c0_i32 = arith.constant 0 : i32
    %c0_i32_0 = arith.constant 0 : i32
    %c0_i32_1 = arith.constant 0 : i32
    return %c0_i32, %c0_i32_0 : i32, i32
  }
  func.func @transform_11(%arg0: i32) -> (i32, i32) {
    %c0_i32 = arith.constant 0 : i32
    %c0_i32_0 = arith.constant 0 : i32
    %c0_i32_1 = arith.constant 0 : i32
    return %c0_i32, %c0_i32_0 : i32, i32
  }
  func.func @transform_12(%arg0: i32) -> (i32, i32) {
    %c0_i32 = arith.constant 0 : i32
    %c0_i32_0 = arith.constant 0 : i32
    %c0_i32_1 = arith.constant 0 : i32
    return %c0_i32, %c0_i32_0 : i32, i32
  }
  func.func @transform_13(%arg0: i32) -> (i32, i32) {
    %c0_i32 = arith.constant 0 : i32
    %c0_i32_0 = arith.constant 0 : i32
    %c0_i32_1 = arith.constant 0 : i32
    return %c0_i32, %c0_i32_0 : i32, i32
  }
  func.func @transform_14(%arg0: i32) -> (i32, i32) {
    %c0_i32 = arith.constant 0 : i32
    %c0_i32_0 = arith.constant 0 : i32
    return %arg0, %c0_i32 : i32, i32
  }
}

</mosaic_0001>

<bundles_post_ra>
// kernel: tpu_custom_call.1
= control target key start
LH: loop header
LB: loop body
LE: loop exit
PB: predicated region body
PF: predicated region fallthrough
CT: control target
= control target key end

     0   :  { %19 = vsyncpa [#allocation3], 0  ;;  %s9852_s0 = inlined_call_operand.hbm [shape: f32[8,64], index: 0, kind: input, shape index: {}]   ;;  %s9853_s1 = inlined_call_operand.hbm [shape: f32[8,64], index: 1, kind: input, shape index: {}]   ;;  %s9854_s2 = inlined_call_operand.hbm [shape: f32[8,176], index: 2, kind: input, shape index: {}]   ;;  %s9855_s3 = inlined_call_operand.hbm [shape: f32[8,176], index: 3, kind: input, shape index: {}]   ;;  %s9856_s4 = inlined_call_operand.hbm [shape: bf16[64,1024], index: 4, kind: input, shape index: {}]   ;;  %s9857_s5 = inlined_call_operand.hbm [shape: f32[1,1024], index: 5, kind: input, shape index: {}]   ;;  %s9858_s6 = inlined_call_operand.hbm [shape: bf16[512,2048], index: 6, kind: input, shape index: {}]   ;;  %s9859_s7 = inlined_call_operand.hbm [shape: f32[1,2048], index: 7, kind: input, shape index: {}]   ;;  %s9860_s8 = inlined_call_operand.vmem [shape: bf16[176,16], index: 8, kind: input, shape index: {}]   ;;  %s9861_s9 = inlined_call_operand.hbm [shape: f32[1,16], index: 9, kind: input, shape index: {}]   ;;  %s9862_s10 = inlined_call_operand.hbm [shape: bf16[64,2048], index: 10, kind: input, shape index: {}]   ;;  %s9863_s11 = inlined_call_operand.vmem [shape: bf16[2048,32], index: 11, kind: input, shape index: {}]   ;;  %s9864_s12 = inlined_call_operand.hbm [shape: bf16[32,512], index: 12, kind: input, shape index: {}]   ;;  %s9865_s13 = inlined_call_operand.vmem [shape: bf16[512,16], index: 13, kind: input, shape index: {}]   ;;  %s9866_s14 = inlined_call_operand.vmem [shape: f32[8,2], index: 14, kind: output, shape index: {}]  }
   0x1   :  { %20 = vsyncpa [#allocation5], 0 }
   0x2   :  { %21 = vsyncpa [#allocation8], 0 }
   0x3   :  { %22 = vsyncpa [#allocation11], 0 }
   0x4   :  { %23 = vsyncpa [#allocation14], 0 }
   0x5   :  { %24 = vsyncpa [#allocation17], 0  ;;  %s8827_s29 = smov [#allocation4]   ;;  %s8828_s15 = smov [#allocation7]  }
   0x6   :  { %s41_s30 = sshll.u32 %s8827_s29, 4  ;;  %s61_s16 = sshll.u32 %s8828_s15, 4  ;;  %s42_s30 = int_to_ptr.vmem [resolvable:$true] %s41_s30  ;;  %s62_s16 = int_to_ptr.vmem [resolvable:$true] %s61_s16 }
   0x7   :  { %s8573_s19 = scalar_lea.hbm %s9853_s1, 128 }
   0x8   :  { %p8574_p0 = scmp.ne.s32.totalorder %s9853_s1, %s8573_s19  ;;  %p8577_p1 = scmp.lt.u32.totalorder %s8573_s19, %s9853_s1 }
   0xa   :  { %p8579_p2 = pnand %p8577_p1, %p8574_p0 }
   0xc   :  { %8582 = shalt.err (!%p8579_p2)
}
   0xd   :  { %s8583_s24 = scalar_lea.vmem %s42_s30, 128  ;;  %p8588_p4 = scmp.lt.s32.totalorder %s42_s30, %s42_s30 }
   0xe   :  { %p8584_p3 = scmp.ne.s32.totalorder %s42_s30, %s8583_s24  ;;  %p8589_p5 = scmp.lt.s32.totalorder %s8583_s24, %s8583_s24 }
  0x10   :  { %p8590_p6 = por %p8589_p5, %p8588_p4 }
  0x12   :  { %p8591_p7 = pnand %p8590_p6, %p8584_p3 }
  0x14   :  { %8594 = shalt.err (!%p8591_p7)
}
  0x15   :  { %44 = dma.hbm_to_vmem [thread:$0]  %s9853_s1, 128, %s42_s30, [#allocation5]  }
  0x16   :  { %s8595_s29 = scalar_lea.hbm %s9855_s3, 256 }
  0x17   :  { %p8596_p8 = scmp.ne.s32.totalorder %s9855_s3, %s8595_s29  ;;  %p8599_p9 = scmp.lt.u32.totalorder %s8595_s29, %s9855_s3 }
  0x19   :  { %p8601_p10 = pnand %p8599_p9, %p8596_p8 }
  0x1b   :  { %8604 = shalt.err (!%p8601_p10)
}
  0x1c   :  { %s8605_s20 = scalar_lea.vmem %s62_s16, 256  ;;  %p8610_p12 = scmp.lt.s32.totalorder %s62_s16, %s62_s16 }
  0x1d   :  { %p8606_p11 = scmp.ne.s32.totalorder %s62_s16, %s8605_s20  ;;  %p8611_p13 = scmp.lt.s32.totalorder %s8605_s20, %s8605_s20 }
  0x1f   :  { %p8612_p0 = por %p8611_p13, %p8610_p12 }
  0x21   :  { %p8613_p1 = pnand %p8612_p0, %p8606_p11 }
  0x23   :  { %8616 = shalt.err (!%p8613_p1)
}
  0x24   :  { %64 = dma.hbm_to_vmem [thread:$0]  %s9855_s3, 256, %s62_s16, [#allocation8]  }
  0x25   :  { %s8829_s21 = smov [#allocation10]   ;;  %s8830_s23 = smov [#allocation13]  }
  0x26   :  { %s83_s22 = sshll.u32 %s8829_s21, 4  ;;  %s105_s24 = sshll.u32 %s8830_s23, 4  ;;  %s84_s22 = int_to_ptr.vmem [resolvable:$true] %s83_s22  ;;  %s106_s24 = int_to_ptr.vmem [resolvable:$true] %s105_s24 }
  0x27   :  { %s8617_s27 = scalar_lea.hbm %s9857_s5, 128 }
  0x28   :  { %p8618_p2 = scmp.ne.s32.totalorder %s9857_s5, %s8617_s27  ;;  %p8621_p3 = scmp.lt.u32.totalorder %s8617_s27, %s9857_s5 }
  0x2a   :  { %p8623_p4 = pnand %p8621_p3, %p8618_p2 }
  0x2c   :  { %8626 = shalt.err (!%p8623_p4)
}
  0x2d   :  { %s8627_s3 = scalar_lea.vmem %s84_s22, 128  ;;  %p8632_p6 = scmp.lt.s32.totalorder %s84_s22, %s84_s22 }
  0x2e   :  { %p8628_p5 = scmp.ne.s32.totalorder %s84_s22, %s8627_s3  ;;  %p8633_p7 = scmp.lt.s32.totalorder %s8627_s3, %s8627_s3 }
  0x30   :  { %p8634_p8 = por %p8633_p7, %p8632_p6 }
  0x32   :  { %p8635_p9 = pnand %p8634_p8, %p8628_p5 }
  0x34   :  { %8638 = shalt.err (!%p8635_p9)
}
  0x35   :  { %86 = dma.hbm_to_vmem [thread:$0]  %s9857_s5, 128, %s84_s22, [#allocation11]  }
  0x36   :  { %s8639_s1 = scalar_lea.hbm %s9859_s7, 256 }
  0x37   :  { %p8640_p10 = scmp.ne.s32.totalorder %s9859_s7, %s8639_s1  ;;  %p8643_p11 = scmp.lt.u32.totalorder %s8639_s1, %s9859_s7 }
  0x39   :  { %p8645_p12 = pnand %p8643_p11, %p8640_p10 }
  0x3b   :  { %8648 = shalt.err (!%p8645_p12)
}
  0x3c   :  { %s8649_s26 = scalar_lea.vmem %s106_s24, 256  ;;  %p8654_p0 = scmp.lt.s32.totalorder %s106_s24, %s106_s24 }
  0x3d   :  { %p8650_p13 = scmp.ne.s32.totalorder %s106_s24, %s8649_s26  ;;  %p8655_p1 = scmp.lt.s32.totalorder %s8649_s26, %s8649_s26 }
  0x3f   :  { %p8656_p2 = por %p8655_p1, %p8654_p0 }
  0x41   :  { %p8657_p3 = pnand %p8656_p2, %p8650_p13 }
  0x43   :  { %8660 = shalt.err (!%p8657_p3)
}
  0x44   :  { %108 = dma.hbm_to_vmem [thread:$0]  %s9859_s7, 256, %s106_s24, [#allocation14]  }
  0x45   :  { %s8831_s27 = smov [#allocation16]   ;;  %s8832_s29 = smov [#allocation2]  }
  0x46   :  { %s126_s28 = sshll.u32 %s8831_s27, 4  ;;  %s31_s15 = sshll.u32 %s8832_s29, 4  ;;  %s127_s28 = int_to_ptr.vmem [resolvable:$true] %s126_s28  ;;  %s32_s15 = int_to_ptr.vmem [resolvable:$true] %s31_s15 }
  0x47   :  { %s8661_s16 = scalar_lea.hbm %s9862_s10, 8192 }
  0x48   :  { %p8662_p4 = scmp.ne.s32.totalorder %s9862_s10, %s8661_s16  ;;  %p8665_p5 = scmp.lt.u32.totalorder %s8661_s16, %s9862_s10 }
  0x4a   :  { %p8667_p6 = pnand %p8665_p5, %p8662_p4 }
  0x4c   :  { %8670 = shalt.err (!%p8667_p6)
}
  0x4d   :  { %s8671_s7 = scalar_lea.vmem %s127_s28, 8192  ;;  %p8676_p8 = scmp.lt.s32.totalorder %s127_s28, %s127_s28 }
  0x4e   :  { %p8672_p7 = scmp.ne.s32.totalorder %s127_s28, %s8671_s7  ;;  %p8677_p9 = scmp.lt.s32.totalorder %s8671_s7, %s8671_s7 }
  0x50   :  { %p8678_p10 = por %p8677_p9, %p8676_p8 }
  0x52   :  { %p8679_p11 = pnand %p8678_p10, %p8672_p7 }
  0x54   :  { %8682 = shalt.err (!%p8679_p11)
}
  0x55   :  { %s8833_s24 = smov 1024   ;;  %s8834_s30 = smov 64  }
  0x56   :  { %132 = dma.hbm_to_vmem [thread:$0]  %s9862_s10, 8192, %s127_s28, [#allocation17], %s8833_s24, %s8833_s24, %s8834_s30  }
  0x57   :  { %s8683_s5 = scalar_lea.hbm %s9852_s0, 128 }
  0x58   :  { %p8684_p12 = scmp.ne.s32.totalorder %s9852_s0, %s8683_s5  ;;  %p8687_p13 = scmp.lt.u32.totalorder %s8683_s5, %s9852_s0 }
  0x5a   :  { %p8689_p0 = pnand %p8687_p13, %p8684_p12 }
  0x5c   :  { %8692 = shalt.err (!%p8689_p0)
}
  0x5d   :  { %s8693_s3 = scalar_lea.vmem %s32_s15, 128  ;;  %p8698_p2 = scmp.lt.s32.totalorder %s32_s15, %s32_s15 }
  0x5e   :  { %p8694_p1 = scmp.ne.s32.totalorder %s32_s15, %s8693_s3  ;;  %p8699_p3 = scmp.lt.s32.totalorder %s8693_s3, %s8693_s3 }
  0x60   :  { %p8700_p4 = por %p8699_p3, %p8698_p2 }
  0x62   :  { %p8701_p5 = pnand %p8700_p4, %p8694_p1 }
  0x64   :  { %8704 = shalt.err (!%p8701_p5)
}
  0x65   :  { %34 = dma.hbm_to_vmem [thread:$0]  %s9852_s0, 128, %s32_s15, [#allocation3]  }
  0x66   :  { %s8835_s16 = smov [#allocation6]   ;;  %s8836_s19 = smov [#allocation9]  }
  0x67   :  { %s51_s18 = sshll.u32 %s8835_s16, 4  ;;  %s70_s20 = sshll.u32 %s8836_s19, 4  ;;  %s52_s18 = int_to_ptr.vmem [resolvable:$true] %s51_s18  ;;  %s8998_s20 = int_to_ptr.vmem [resolvable:$true] %s70_s20 }
  0x68   :  { %s8705_s21 = scalar_lea.hbm %s9854_s2, 256 }
  0x69   :  { %p8706_p6 = scmp.ne.s32.totalorder %s9854_s2, %s8705_s21  ;;  %p8709_p7 = scmp.lt.u32.totalorder %s8705_s21, %s9854_s2 }
  0x6b   :  { %p8711_p8 = pnand %p8709_p7, %p8706_p6 }
  0x6d   :  { %8714 = shalt.err (!%p8711_p8)
}
  0x6e   :  { %s8715_s0 = scalar_lea.vmem %s52_s18, 256  ;;  %p8720_p10 = scmp.lt.s32.totalorder %s52_s18, %s52_s18 }
  0x6f   :  { %p8716_p9 = scmp.ne.s32.totalorder %s52_s18, %s8715_s0  ;;  %p8721_p11 = scmp.lt.s32.totalorder %s8715_s0, %s8715_s0 }
  0x71   :  { %p8722_p12 = por %p8721_p11, %p8720_p10 }
  0x73   :  { %p8723_p13 = pnand %p8722_p12, %p8716_p9 }
  0x75   :  { %8726 = shalt.err (!%p8723_p13)
}
  0x76   :  { %54 = dma.hbm_to_vmem [thread:$0]  %s9854_s2, 256, %s52_s18, [#allocation5]  }
  0x77   :  { %s8727_s17 = scalar_lea.hbm %s9856_s4, 4096 }
  0x78   :  { %p8728_p0 = scmp.ne.s32.totalorder %s9856_s4, %s8727_s17  ;;  %p8731_p1 = scmp.lt.u32.totalorder %s8727_s17, %s9856_s4 }
  0x7a   :  { %p8733_p2 = pnand %p8731_p1, %p8728_p0 }
  0x7c   :  { %8736 = shalt.err (!%p8733_p2)
}
  0x7d   :  { %s8737_s19 = scalar_lea.vmem %s8998_s20, 4096  ;;  %p8742_p4 = scmp.lt.s32.totalorder %s8998_s20, %s8998_s20 }
  0x7e   :  { %p8738_p3 = scmp.ne.s32.totalorder %s8998_s20, %s8737_s19  ;;  %p8743_p5 = scmp.lt.s32.totalorder %s8737_s19, %s8737_s19 }
  0x80   :  { %p8744_p6 = por %p8743_p5, %p8742_p4 }
  0x82   :  { %p8745_p7 = pnand %p8744_p6, %p8738_p3 }
  0x84   :  { %8748 = shalt.err (!%p8745_p7)
}
  0x85   :  { %s8837_s2 = smov 512   ;;  %s8838_s18 = smov 32  }
  0x86   :  { %76 = dma.hbm_to_vmem [thread:$0]  %s9856_s4, 4096, %s8998_s20, [#allocation8], %s8837_s2, %s8837_s2, %s8838_s18  }
  0x87   :  { %s8839_s21 = smov [#allocation12]   ;;  %s8840_s25 = smov [#allocation15]  }
  0x88   :  { %s92_s23 = sshll.u32 %s8839_s21, 4  ;;  %s117_s26 = sshll.u32 %s8840_s25, 4  ;;  %s93_s23 = int_to_ptr.vmem [resolvable:$true] %s92_s23  ;;  %s118_s26 = int_to_ptr.vmem [resolvable:$true] %s117_s26 }
  0x89   :  { %s8749_s15 = scalar_lea.hbm %s9858_s6, 65536 }
  0x8a   :  { %p8750_p8 = scmp.ne.s32.totalorder %s9858_s6, %s8749_s15  ;;  %p8753_p9 = scmp.lt.u32.totalorder %s8749_s15, %s9858_s6 }
  0x8c   :  { %p8755_p10 = pnand %p8753_p9, %p8750_p8 }
  0x8e   :  { %8758 = shalt.err (!%p8755_p10)
}
  0x8f   :  { %s8759_s4 = scalar_lea.vmem %s93_s23, 65536  ;;  %p8764_p12 = scmp.lt.s32.totalorder %s93_s23, %s93_s23 }
  0x90   :  { %p8760_p11 = scmp.ne.s32.totalorder %s93_s23, %s8759_s4  ;;  %p8765_p13 = scmp.lt.s32.totalorder %s8759_s4, %s8759_s4 }
  0x92   :  { %p8766_p0 = por %p8765_p13, %p8764_p12 }
  0x94   :  { %p8767_p1 = pnand %p8766_p0, %p8760_p11 }
  0x96   :  { %8770 = shalt.err (!%p8767_p1)
}
  0x97   :  { %98 = dma.hbm_to_vmem [thread:$0]  %s9858_s6, 65536, %s93_s23, [#allocation11], %s8833_s24, %s8833_s24, %s8834_s30  }
  0x98   :  { %s8771_s16 = scalar_lea.hbm %s9861_s9, 16 }
  0x99   :  { %p8772_p2 = scmp.ne.s32.totalorder %s9861_s9, %s8771_s16  ;;  %p8775_p3 = scmp.lt.u32.totalorder %s8771_s16, %s9861_s9 }
  0x9b   :  { %p8777_p4 = pnand %p8775_p3, %p8772_p2 }
  0x9d   :  { %8780 = shalt.err (!%p8777_p4)
}
  0x9e   :  { %s8781_s7 = scalar_lea.vmem %s118_s26, 16  ;;  %s8785_s21 = scalar_lea.vmem %s118_s26, 32 }
  0x9f   :  { %p8782_p5 = scmp.ne.s32.totalorder %s118_s26, %s8781_s7  ;;  %p8786_p6 = scmp.lt.s32.totalorder %s118_s26, %s118_s26 }
  0xa0   :  { %p8787_p7 = scmp.lt.s32.totalorder %s8785_s21, %s8781_s7 }
  0xa2   :  { %p8788_p8 = por %p8787_p7, %p8786_p6 }
  0xa4   :  { %p8789_p9 = pnand %p8788_p8, %p8782_p5 }
  0xa6   :  { %8792 = shalt.err (!%p8789_p9)
}
  0xa7   :  { %120 = dma.hbm_to_vmem [thread:$0]  %s9861_s9, 16, %s118_s26, [#allocation14]  }
  0xa8   :  { %s8841_s30 = smov [#allocation18]   ;;  %s8793_s0 = scalar_lea.hbm %s9864_s12, 1024 }
  0xa9   :  { %s140_s23 = sshll.u32 %s8841_s30, 4  ;;  %p8794_p10 = scmp.ne.s32.totalorder %s9864_s12, %s8793_s0  ;;  %s141_s23 = int_to_ptr.vmem [resolvable:$true] %s140_s23 }
  0xaa   :  { %p8797_p11 = scmp.lt.u32.totalorder %s8793_s0, %s9864_s12 }
  0xac   :  { %p8799_p12 = pnand %p8797_p11, %p8794_p10 }
  0xae   :  { %8802 = shalt.err (!%p8799_p12)
}
  0xaf   :  { %s8803_s17 = scalar_lea.vmem %s141_s23, 1024  ;;  %p8808_p0 = scmp.lt.s32.totalorder %s141_s23, %s141_s23 }
  0xb0   :  { %p8804_p13 = scmp.ne.s32.totalorder %s141_s23, %s8803_s17  ;;  %p8809_p1 = scmp.lt.s32.totalorder %s8803_s17, %s8803_s17 }
  0xb2   :  { %p8810_p2 = por %p8809_p1, %p8808_p0 }
  0xb4   :  { %p8811_p3 = pnand %p8810_p2, %p8804_p13 }
  0xb6   :  { %8814 = shalt.err (!%p8811_p3)
}
  0xb7   :  { %s8842_s9 = smov 256   ;;  %s8843_s26 = smov 16  }
  0xb8   :  { %146 = dma.hbm_to_vmem [thread:$0]  %s9864_s12, 1024, %s141_s23, [#allocation17], %s8842_s9, %s8842_s9, %s8843_s26  }
  0xb9   :  { %8815 = dma.done.wait [#allocation3], 128  }
  0xba   :  { %8816 = vsyncadd [#allocation3], 4294967168 }
  0xbb   :  { %8817 = dma.done.wait [#allocation5], 384  }
  0xbc   :  { %8818 = vsyncadd [#allocation5], 4294966912 }
  0xbd   :  { %8819 = dma.done.wait [#allocation8], 4352  }
  0xbe   :  { %8820 = vsyncadd [#allocation8], 4294962944 }
  0xbf   :  { %8821 = dma.done.wait [#allocation11], 65664  }
  0xc0   :  { %8822 = vsyncadd [#allocation11], 4294901632 }
  0xc1   :  { %8823 = dma.done.wait [#allocation14], 272  }
  0xc2   :  { %8824 = vsyncadd [#allocation14], 4294967024 }
  0xc3   :  { %8825 = dma.done.wait [#allocation17], 9216  }
  0xc4   :  { %8826 = vsyncadd [#allocation17], 4294958080  ;;  %v8844_v0 = vmov 0   ;;  %v187_v1 = vld [vmem:[#allocation9] sm:$0xff]  ;;  %v188_v10 = vld [vmem:[#allocation9 + $0x8] sm:$0xff]  ;;  %vm421_vm0 = vcmask 523264  }
  0xc5   :  { %457 = vmatprep.mubr.bf16.mxu0 %v8844_v0  ;;  %498 = vmatprep.mubr.bf16.mxu1 %v8844_v0  ;;  %v191_v2 = vld [vmem:[#allocation9 + $0x20] sm:$0xff]  ;;  %v192_v11 = vld [vmem:[#allocation9 + $0x28] sm:$0xff]  ;;  %v189_v29 = vld [vmem:[#allocation9 + $0x10] sm:$0xff]  ;;  %vm6605_vm1 = vcmask 261120   ;;  %s8845_s27 = smov 112   ;;  %s8846_s29 = smov 80  }
  0xc6   :  { %v195_v3 = vld [vmem:[#allocation9 + $0x40] sm:$0xff]  ;;  %v7290_v4 = vcombine.high %v187_v1, %v191_v2  ;;  %v7289_v5 = vcombine.low %v187_v1, %v191_v2  ;;  %v196_v12 = vld [vmem:[#allocation9 + $0x48] sm:$0xff]  ;;  %v7292_v14 = vcombine.high %v188_v10, %v192_v11  ;;  %v7291_v15 = vcombine.low %v188_v10, %v192_v11  ;;  %v193_v30 = vld [vmem:[#allocation9 + $0x30] sm:$0xff]  ;;  %s8847_s17 = smov 96  }
  0xc7   :  { %v199_v6 = vld [vmem:[#allocation9 + $0x60] sm:$0xff]  ;;  %v200_v16 = vld [vmem:[#allocation9 + $0x68] sm:$0xff]  ;;  %v185_v33 = vld [vmem:[#allocation4] sm:$0xff]  ;;  %v7294_v35 = vcombine.high %v189_v29, %v193_v30  ;;  %v7293_v42 = vcombine.low %v189_v29, %v193_v30  ;;  %vm7160_vm2 = vcmask 392192   ;;  %vm7054_vm3 = vcmask 130048  }
  0xc8   :  { %v7298_v7 = vcombine.high %v195_v3, %v199_v6  ;;  %v203_v8 = vld [vmem:[#allocation9 + $0x80] sm:$0xff]  ;;  %425 = vmatprep.subr.bf16.mxu0 %v7290_v4  ;;  %v7297_v13 = vcombine.low %v195_v3, %v199_v6  ;;  %v7300_v18 = vcombine.high %v196_v12, %v200_v16  ;;  %v204_v19 = vld [vmem:[#allocation9 + $0x88] sm:$0xff]  ;;  %466 = vmatprep.subr.bf16.mxu1 %v7292_v14  ;;  %v190_v36 = vld [vmem:[#allocation9 + $0x18] sm:$0xff]  ;;  %vm7275_vm4 = vcmask 7168  }
  0xc9   :  { %v207_v9 = vld [vmem:[#allocation9 + $0xa0] sm:$0xff]  ;;  %426 = vmatpush1.bf16.msra.mxu0 %v7289_v5  ;;  %v208_v20 = vld [vmem:[#allocation9 + $0xa8] sm:$0xff]  ;;  %467 = vmatpush1.bf16.msra.mxu1 %v7291_v15  ;;  %v7299_v23 = vcombine.low %v196_v12, %v200_v16  ;;  %v194_v37 = vld [vmem:[#allocation9 + $0x38] sm:$0xff]  ;;  %v9070_v40 = vpack.c.bf16 %v185_v33, %v185_v33  ;;  %vm7277_vm5 = vcmask 15360  }
  0xca   :  { %427 = vmatprep.subr.bf16.mxu0 %v7298_v7  ;;  %v7306_v17 = vcombine.high %v203_v8, %v207_v9  ;;  %v211_v21 = vld [vmem:[#allocation9 + $0xc0] sm:$0xff]  ;;  %v7305_v24 = vcombine.low %v203_v8, %v207_v9  ;;  %468 = vmatprep.subr.bf16.mxu1 %v7300_v18  ;;  %v7308_v25 = vcombine.high %v204_v19, %v208_v20  ;;  %v212_v27 = vld [vmem:[#allocation9 + $0xc8] sm:$0xff]  ;;  %v197_v38 = vld [vmem:[#allocation9 + $0x50] sm:$0xff] }
  0xcb   :  { %v215_v22 = vld [vmem:[#allocation9 + $0xe0] sm:$0xff]  ;;  %v216_v28 = vld [vmem:[#allocation9 + $0xe8] sm:$0xff]  ;;  %v7307_v31 = vcombine.low %v204_v19, %v208_v20  ;;  %v201_v39 = vld [vmem:[#allocation9 + $0x70] sm:$0xff]  ;;  %v7296_v43 = vcombine.high %v190_v36, %v194_v37  ;;  %v7295_v49 = vcombine.low %v190_v36, %v194_v37 }
  0xcc   :  { %v7314_v26 = vcombine.high %v211_v21, %v215_v22  ;;  %v7313_v32 = vcombine.low %v211_v21, %v215_v22  ;;  %v7316_v34 = vcombine.high %v212_v27, %v216_v28  ;;  %v7315_v41 = vcombine.low %v212_v27, %v216_v28  ;;  %v198_v45 = vld [vmem:[#allocation9 + $0x58] sm:$0xff]  ;;  %v205_v47 = vld [vmem:[#allocation9 + $0x90] sm:$0xff]  ;;  %v605_v63 = vld [vmem:[#allocation12] sm:$0xff] }
  0xcd   :  { %428 = vmatpush1.bf16.msra.mxu0 %v7297_v13  ;;  %469 = vmatpush1.bf16.msra.mxu1 %v7299_v23  ;;  %v7302_v44 = vcombine.high %v197_v38, %v201_v39  ;;  %v202_v46 = vld [vmem:[#allocation9 + $0x78] sm:$0xff]  ;;  %v209_v48 = vld [vmem:[#allocation9 + $0xb0] sm:$0xff]  ;;  %v7301_v50 = vcombine.low %v197_v38, %v201_v39  ;;  %v613_v1 = vld [vmem:[#allocation12 + $0x40] sm:$0xff] }
  0xce   :  { %429 = vmatprep.subr.bf16.mxu0 %v7306_v17  ;;  %470 = vmatprep.subr.bf16.mxu1 %v7308_v25  ;;  %v7304_v51 = vcombine.high %v198_v45, %v202_v46  ;;  %v7310_v52 = vcombine.high %v205_v47, %v209_v48  ;;  %v206_v53 = vld [vmem:[#allocation9 + $0x98] sm:$0xff]  ;;  %v213_v55 = vld [vmem:[#allocation9 + $0xd0] sm:$0xff]  ;;  %v7303_v57 = vcombine.low %v198_v45, %v202_v46  ;;  %v621_v8 = vld [vmem:[#allocation12 + $0x80] sm:$0xff] }
  0xcf   :  { %v210_v54 = vld [vmem:[#allocation9 + $0xb8] sm:$0xff]  ;;  %v217_v56 = vld [vmem:[#allocation9 + $0xf0] sm:$0xff]  ;;  %v7309_v58 = vcombine.low %v205_v47, %v209_v48  ;;  %v7326_v6 = vcombine.high %v605_v63, %v613_v1  ;;  %v629_v9 = vld [vmem:[#allocation12 + $0xc0] sm:$0xff]  ;;  %v7325_v13 = vcombine.low %v605_v63, %v613_v1 }
  0xd0   :  { %v7312_v59 = vcombine.high %v206_v53, %v210_v54  ;;  %v7318_v60 = vcombine.high %v213_v55, %v217_v56  ;;  %v214_v61 = vld [vmem:[#allocation9 + $0xd8] sm:$0xff]  ;;  %v7311_v2 = vcombine.low %v206_v53, %v210_v54  ;;  %v7317_v3 = vcombine.low %v213_v55, %v217_v56  ;;  %v606_v5 = vld [vmem:[#allocation12 + $0x8] sm:$0xff]  ;;  %v637_v15 = vld [vmem:[#allocation12 + $0x100] sm:$0xff] }
  0xd1   :  { %430 = vmatpush1.bf16.msra.mxu0 %v7305_v24  ;;  %471 = vmatpush1.bf16.msra.mxu1 %v7307_v31  ;;  %v218_v62 = vld [vmem:[#allocation9 + $0xf8] sm:$0xff]  ;;  %v614_v7 = vld [vmem:[#allocation12 + $0x48] sm:$0xff]  ;;  %v645_v16 = vld [vmem:[#allocation12 + $0x140] sm:$0xff]  ;;  %v7342_v17 = vcombine.high %v621_v8, %v629_v9  ;;  %v7341_v21 = vcombine.low %v621_v8, %v629_v9 }
  0xd2   :  { %431 = vmatprep.subr.bf16.mxu0 %v7314_v26  ;;  %472 = vmatprep.subr.bf16.mxu1 %v7316_v34  ;;  %v7320_v4 = vcombine.high %v214_v61, %v218_v62  ;;  %v7319_v10 = vcombine.low %v214_v61, %v218_v62  ;;  %v622_v11 = vld [vmem:[#allocation12 + $0x88] sm:$0xff]  ;;  %v7328_v14 = vcombine.high %v606_v5, %v614_v7  ;;  %v653_v23 = vld [vmem:[#allocation12 + $0x180] sm:$0xff] }
  0xd3   :  { %v630_v12 = vld [vmem:[#allocation12 + $0xc8] sm:$0xff]  ;;  %v7327_v18 = vcombine.low %v606_v5, %v614_v7  ;;  %v661_v24 = vld [vmem:[#allocation12 + $0x1c0] sm:$0xff]  ;;  %v7358_v25 = vcombine.high %v637_v15, %v645_v16  ;;  %v7357_v29 = vcombine.low %v637_v15, %v645_v16 }
  0xd4   :  { %v638_v19 = vld [vmem:[#allocation12 + $0x108] sm:$0xff]  ;;  %v7344_v22 = vcombine.high %v622_v11, %v630_v12  ;;  %v7343_v26 = vcombine.low %v622_v11, %v630_v12  ;;  %v669_v31 = vld [vmem:[#allocation12 + $0x200] sm:$0xff]  ;;  %v7374_v33 = vcombine.high %v653_v23, %v661_v24  ;;  %v7373_v37 = vcombine.low %v653_v23, %v661_v24 }
  0xd5   :  { %432 = vmatpush1.bf16.msra.mxu0 %v7313_v32  ;;  %473 = vmatpush1.bf16.msra.mxu1 %v7315_v41  ;;  %v646_v20 = vld [vmem:[#allocation12 + $0x148] sm:$0xff]  ;;  %v677_v32 = vld [vmem:[#allocation12 + $0x240] sm:$0xff] }
  0xd6   :  { %507 = vmatprep.subr.bf16.mxu0 %v7294_v35  ;;  %548 = vmatprep.subr.bf16.mxu1 %v7296_v43  ;;  %v654_v27 = vld [vmem:[#allocation12 + $0x188] sm:$0xff]  ;;  %v7360_v30 = vcombine.high %v638_v19, %v646_v20  ;;  %v7359_v34 = vcombine.low %v638_v19, %v646_v20  ;;  %v685_v39 = vld [vmem:[#allocation12 + $0x280] sm:$0xff]  ;;  %v7390_v41 = vcombine.high %v669_v31, %v677_v32 }
  0xd7   :  { %v662_v28 = vld [vmem:[#allocation12 + $0x1c8] sm:$0xff]  ;;  %v7389_v45 = vcombine.low %v669_v31, %v677_v32  ;;  %v701_v47 = vld [vmem:[#allocation12 + $0x300] sm:$0xff] }
  0xd8   :  { %7321 = vmatmul.mubr.msk.bf16.vlgmr.msra.gmra.mrb[0].mxu0 %vm421_vm0, %v9070_v40  ;;  %7322 = vmatmul.mubr.msk.bf16.vlgmr.msra.gmra.mrb[0].mxu1 %vm421_vm0, %v9070_v40  ;;  %v670_v35 = vld [vmem:[#allocation12 + $0x208] sm:$0xff]  ;;  %v7376_v38 = vcombine.high %v654_v27, %v662_v28  ;;  %v709_v48 = vld [vmem:[#allocation12 + $0x340] sm:$0xff] }
  0xd9   :  { %508 = vmatpush1.bf16.msra.mxu0 %v7293_v42  ;;  %539 = vmatprep.mubr.bf16.mxu0 %v8844_v0  ;;  %v678_v36 = vld [vmem:[#allocation12 + $0x248] sm:$0xff]  ;;  %v7375_v42 = vcombine.low %v654_v27, %v662_v28  ;;  %v717_v55 = vld [vmem:[#allocation12 + $0x380] sm:$0xff]  ;;  %v7421_v61 = vcombine.low %v701_v47, %v709_v48 }
  0xda   :  { %509 = vmatprep.subr.bf16.mxu0 %v7302_v44  ;;  %549 = vmatpush1.bf16.msra.mxu1 %v7295_v49  ;;  %v686_v43 = vld [vmem:[#allocation12 + $0x288] sm:$0xff]  ;;  %v7392_v46 = vcombine.high %v670_v35, %v678_v36  ;;  %v725_v56 = vld [vmem:[#allocation12 + $0x3c0] sm:$0xff] }
  0xdb   :  { %580 = vmatprep.mubr.bf16.mxu1 %v8844_v0  ;;  %550 = vmatprep.subr.bf16.mxu1 %v7304_v51  ;;  %v694_v44 = vld [vmem:[#allocation12 + $0x2c8] sm:$0xff]  ;;  %v733_v63 = vld [vmem:[#allocation12 + $0x400] sm:$0xff] }
  0xdc   :  { %v702_v51 = vld [vmem:[#allocation12 + $0x308] sm:$0xff]  ;;  %v7408_v54 = vcombine.high %v686_v43, %v694_v44  ;;  %v741_v1 = vld [vmem:[#allocation12 + $0x440] sm:$0xff] }
  0xdd   :  { %510 = vmatpush1.bf16.msra.mxu0 %v7301_v50  ;;  %v7391_v50 = vcombine.low %v670_v35, %v678_v36  ;;  %v742_v5 = vld [vmem:[#allocation12 + $0x448] sm:$0xff]  ;;  %v749_v8 = vld [vmem:[#allocation12 + $0x480] sm:$0xff] }
  0xde   :  { %511 = vmatprep.subr.bf16.mxu0 %v7310_v52  ;;  %551 = vmatpush1.bf16.msra.mxu1 %v7303_v57  ;;  %v710_v52 = vld [vmem:[#allocation12 + $0x348] sm:$0xff]  ;;  %v7422_v57 = vcombine.high %v701_v47, %v709_v48  ;;  %v757_v9 = vld [vmem:[#allocation12 + $0x4c0] sm:$0xff] }
  0xdf   :  { %552 = vmatprep.subr.bf16.mxu1 %v7312_v59  ;;  %v718_v59 = vld [vmem:[#allocation12 + $0x388] sm:$0xff]  ;;  %v7424_v62 = vcombine.high %v702_v51, %v710_v52  ;;  %v765_v16 = vld [vmem:[#allocation12 + $0x500] sm:$0xff] }
  0xe0   :  { %v750_v12 = vld [vmem:[#allocation12 + $0x488] sm:$0xff]  ;;  %v781_v24 = vld [vmem:[#allocation12 + $0x580] sm:$0xff] }
  0xe1   :  { %512 = vmatpush1.bf16.msra.mxu0 %v7309_v58  ;;  %v7407_v58 = vcombine.low %v686_v43, %v694_v44  ;;  %v766_v20 = vld [vmem:[#allocation12 + $0x508] sm:$0xff]  ;;  %v797_v32 = vld [vmem:[#allocation12 + $0x600] sm:$0xff] }
  0xe2   :  { %513 = vmatprep.subr.bf16.mxu0 %v7318_v60  ;;  %553 = vmatpush1.bf16.msra.mxu1 %v7311_v2  ;;  %v726_v60 = vld [vmem:[#allocation12 + $0x3c8] sm:$0xff]  ;;  %v7438_v2 = vcombine.high %v717_v55, %v725_v56 }
  0xe3   :  { %554 = vmatprep.subr.bf16.mxu1 %v7320_v4  ;;  %v734_v4 = vld [vmem:[#allocation12 + $0x408] sm:$0xff]  ;;  %v7440_v7 = vcombine.high %v718_v59, %v726_v60  ;;  %v7439_v11 = vcombine.low %v718_v59, %v726_v60 }
  0xe4   :  { %v7456_v15 = vcombine.high %v734_v4, %v742_v5  ;;  %v7455_v19 = vcombine.low %v734_v4, %v742_v5  ;;  %v782_v28 = vld [vmem:[#allocation12 + $0x588] sm:$0xff] }
  0xe5   :  { %514 = vmatpush1.bf16.msra.mxu0 %v7317_v3  ;;  %v7423_v3 = vcombine.low %v702_v51, %v710_v52  ;;  %v798_v36 = vld [vmem:[#allocation12 + $0x608] sm:$0xff] }
  0xe6   :  { %3761 = vmatprep.subr.bf16.mxu0 %v7326_v6  ;;  %555 = vmatpush1.bf16.msra.mxu1 %v7319_v10  ;;  %v7437_v6 = vcombine.low %v717_v55, %v725_v56  ;;  %v7454_v10 = vcombine.high %v733_v63, %v741_v1  ;;  %v814_v44 = vld [vmem:[#allocation12 + $0x688] sm:$0xff] }
  0xe7   :  { %3843 = vmatprep.subr.bf16.mxu1 %v7328_v14  ;;  %v7453_v14 = vcombine.low %v733_v63, %v741_v1  ;;  %v830_v55 = vld [vmem:[#allocation12 + $0x708] sm:$0xff] }
  0xe8   :  { %7323 = vmatmul.mubr.msk.bf16.vlgmr.msra.gmra.mrb[4].mxu0 %vm421_vm0, %v9070_v40  ;;  %v846_v63 = vld [vmem:[#allocation12 + $0x788] sm:$0xff] }
  0xe9   :  { %3762 = vmatpush1.bf16.msra.mxu0 %v7325_v13  ;;  %7324 = vmatmul.mubr.msk.bf16.vlgmr.msra.gmra.mrb[4].mxu1 %vm421_vm0, %v9070_v40  ;;  %v693_v40 = vld [vmem:[#allocation12 + $0x2c0] sm:$0xff]  ;;  %v758_v13 = vld [vmem:[#allocation12 + $0x4c8] sm:$0xff] }
  0xea   :  { %3763 = vmatprep.subr.bf16.mxu0 %v7342_v17  ;;  %3844 = vmatpush1.bf16.msra.mxu1 %v7327_v18  ;;  %v7406_v49 = vcombine.high %v685_v39, %v693_v40  ;;  %v7405_v53 = vcombine.low %v685_v39, %v693_v40  ;;  %v773_v17 = vld [vmem:[#allocation12 + $0x540] sm:$0xff]  ;;  %v7470_v18 = vcombine.high %v749_v8, %v757_v9 }
  0xeb   :  { %3845 = vmatprep.subr.bf16.mxu1 %v7344_v22  ;;  %v7469_v22 = vcombine.low %v749_v8, %v757_v9  ;;  %v7472_v23 = vcombine.high %v750_v12, %v758_v13  ;;  %v7471_v27 = vcombine.low %v750_v12, %v758_v13  ;;  %v813_v40 = vld [vmem:[#allocation12 + $0x680] sm:$0xff]  ;;  %v862_v8 = vld [vmem:[#allocation12 + $0x808] sm:$0xff] }
  0xed   :  { %3764 = vmatpush1.bf16.msra.mxu0 %v7341_v21  ;;  %v774_v21 = vld [vmem:[#allocation12 + $0x548] sm:$0xff] }
  0xee   :  { %3765 = vmatprep.subr.bf16.mxu0 %v7358_v25  ;;  %3846 = vmatpush1.bf16.msra.mxu1 %v7343_v26  ;;  %v789_v25 = vld [vmem:[#allocation12 + $0x5c0] sm:$0xff]  ;;  %v7486_v26 = vcombine.high %v765_v16, %v773_v17  ;;  %v7488_v31 = vcombine.high %v766_v20, %v774_v21  ;;  %v7487_v35 = vcombine.low %v766_v20, %v774_v21 }
  0xef   :  { %3847 = vmatprep.subr.bf16.mxu1 %v7360_v30  ;;  %v7485_v30 = vcombine.low %v765_v16, %v773_v17  ;;  %v9087_v17 = vld [vmem:[#allocation10] sm:$0xff] }
  0xf1   :  { %3766 = vmatpush1.bf16.msra.mxu0 %v7357_v29  ;;  %v790_v29 = vld [vmem:[#allocation12 + $0x5c8] sm:$0xff] }
  0xf2   :  { %3767 = vmatprep.subr.bf16.mxu0 %v7374_v33  ;;  %3848 = vmatpush1.bf16.msra.mxu1 %v7359_v34  ;;  %v805_v33 = vld [vmem:[#allocation12 + $0x640] sm:$0xff]  ;;  %v7502_v34 = vcombine.high %v781_v24, %v789_v25  ;;  %v7504_v39 = vcombine.high %v782_v28, %v790_v29  ;;  %v7503_v43 = vcombine.low %v782_v28, %v790_v29 }
  0xf3   :  { %3849 = vmatprep.subr.bf16.mxu1 %v7376_v38  ;;  %v7501_v38 = vcombine.low %v781_v24, %v789_v25 }
  0xf5   :  { %3768 = vmatpush1.bf16.msra.mxu0 %v7373_v37  ;;  %v806_v37 = vld [vmem:[#allocation12 + $0x648] sm:$0xff] }
  0xf6   :  { %3769 = vmatprep.subr.bf16.mxu0 %v7390_v41  ;;  %3850 = vmatpush1.bf16.msra.mxu1 %v7375_v42  ;;  %v821_v41 = vld [vmem:[#allocation12 + $0x6c0] sm:$0xff]  ;;  %v7518_v42 = vcombine.high %v797_v32, %v805_v33  ;;  %v7520_v47 = vcombine.high %v798_v36, %v806_v37 }
  0xf7   :  { %3851 = vmatprep.subr.bf16.mxu1 %v7392_v46  ;;  %v7517_v46 = vcombine.low %v797_v32, %v805_v33  ;;  %v7534_v48 = vcombine.high %v813_v40, %v821_v41  ;;  %v885_v33 = vld [vmem:[#allocation12 + $0x8c0] sm:$0xff] }
  0xf9   :  { %3770 = vmatpush1.bf16.msra.mxu0 %v7389_v45  ;;  %v822_v45 = vld [vmem:[#allocation12 + $0x6c8] sm:$0xff] }
  0xfa   :  { %3771 = vmatprep.subr.bf16.mxu0 %v7406_v49  ;;  %3852 = vmatpush1.bf16.msra.mxu1 %v7391_v50  ;;  %v7519_v49 = vcombine.low %v798_v36, %v806_v37  ;;  %v7533_v50 = vcombine.low %v813_v40, %v821_v41  ;;  %v7536_v51 = vcombine.high %v814_v44, %v822_v45 }
  0xfb   :  { %3853 = vmatprep.subr.bf16.mxu1 %v7408_v54  ;;  %v7535_v52 = vcombine.low %v814_v44, %v822_v45  ;;  %v837_v54 = vld [vmem:[#allocation12 + $0x740] sm:$0xff] }
  0xfc   :  { %v893_v44 = vld [vmem:[#allocation12 + $0x900] sm:$0xff] }
  0xfd   :  { %3772 = vmatpush1.bf16.msra.mxu0 %v7405_v53  ;;  %v829_v53 = vld [vmem:[#allocation12 + $0x700] sm:$0xff] }
  0xfe   :  { %3773 = vmatprep.subr.bf16.mxu0 %v7422_v57  ;;  %3854 = vmatpush1.bf16.msra.mxu1 %v7407_v58  ;;  %v7550_v56 = vcombine.high %v829_v53, %v837_v54  ;;  %v838_v57 = vld [vmem:[#allocation12 + $0x748] sm:$0xff]  ;;  %v7549_v58 = vcombine.low %v829_v53, %v837_v54  ;;  %v909_v54 = vld [vmem:[#allocation12 + $0x980] sm:$0xff] }
  0xff   :  { %3855 = vmatprep.subr.bf16.mxu1 %v7424_v62  ;;  %v7551_v59 = vcombine.low %v830_v55, %v838_v57  ;;  %v7552_v60 = vcombine.high %v830_v55, %v838_v57  ;;  %v853_v62 = vld [vmem:[#allocation12 + $0x7c0] sm:$0xff]  ;;  %v918_v57 = vld [vmem:[#allocation12 + $0x9c8] sm:$0xff] }
 0x100   :  { %v917_v55 = vld [vmem:[#allocation12 + $0x9c0] sm:$0xff] }
 0x101   :  { %3774 = vmatpush1.bf16.msra.mxu0 %v7421_v61  ;;  %v845_v61 = vld [vmem:[#allocation12 + $0x780] sm:$0xff] }
 0x102   :  { %3775 = vmatprep.subr.bf16.mxu0 %v7438_v2  ;;  %3856 = vmatpush1.bf16.msra.mxu1 %v7423_v3  ;;  %v7566_v1 = vcombine.high %v845_v61, %v853_v62  ;;  %v854_v2 = vld [vmem:[#allocation12 + $0x7c8] sm:$0xff]  ;;  %v7565_v3 = vcombine.low %v845_v61, %v853_v62  ;;  %v925_v62 = vld [vmem:[#allocation12 + $0xa00] sm:$0xff] }
 0x103   :  { %3857 = vmatprep.subr.bf16.mxu1 %v7440_v7  ;;  %v7567_v4 = vcombine.low %v846_v63, %v854_v2  ;;  %v7568_v5 = vcombine.high %v846_v63, %v854_v2  ;;  %v869_v7 = vld [vmem:[#allocation12 + $0x840] sm:$0xff]  ;;  %v934_v2 = vld [vmem:[#allocation12 + $0xa48] sm:$0xff] }
 0x104   :  { %v933_v63 = vld [vmem:[#allocation12 + $0xa40] sm:$0xff] }
 0x105   :  { %3776 = vmatpush1.bf16.msra.mxu0 %v7437_v6  ;;  %v861_v6 = vld [vmem:[#allocation12 + $0x800] sm:$0xff] }
 0x106   :  { %3777 = vmatprep.subr.bf16.mxu0 %v7454_v10  ;;  %3858 = vmatpush1.bf16.msra.mxu1 %v7439_v11  ;;  %v7582_v9 = vcombine.high %v861_v6, %v869_v7  ;;  %v870_v10 = vld [vmem:[#allocation12 + $0x848] sm:$0xff]  ;;  %v7581_v11 = vcombine.low %v861_v6, %v869_v7  ;;  %v941_v7 = vld [vmem:[#allocation12 + $0xa80] sm:$0xff] }
 0x107   :  { %3859 = vmatprep.subr.bf16.mxu1 %v7456_v15  ;;  %v7583_v12 = vcombine.low %v862_v8, %v870_v10  ;;  %v7584_v13 = vcombine.high %v862_v8, %v870_v10  ;;  %v949_v8 = vld [vmem:[#allocation12 + $0xac0] sm:$0xff]  ;;  %v950_v10 = vld [vmem:[#allocation12 + $0xac8] sm:$0xff] }
 0x109   :  { %3778 = vmatpush1.bf16.msra.mxu0 %v7453_v14  ;;  %v221_v14 = vlaneseq }
 0x10a   :  { %3779 = vmatprep.subr.bf16.mxu0 %v7470_v18  ;;  %3860 = vmatpush1.bf16.msra.mxu1 %v7455_v19 }
 0x10b   :  { %3861 = vmatprep.subr.bf16.mxu1 %v7472_v23  ;;  %v9082_v15 = vshrl.u32 %v221_v14, 7 }
 0x10d   :  { %3780 = vmatpush1.bf16.msra.mxu0 %v7469_v22  ;;  %v9085_v16 = vsub.s32 0, %v9082_v15  ;;  %v9090_v18 = vsub.s32 1, %v9082_v15  ;;  %v9095_v20 = vsub.s32 3, %v9082_v15 }
 0x10e   :  { %3781 = vmatprep.subr.bf16.mxu0 %v7486_v26  ;;  %3862 = vmatpush1.bf16.msra.mxu1 %v7471_v27 }
 0x10f   :  { %3863 = vmatprep.subr.bf16.mxu1 %v7488_v31  ;;  %v224_v19 = vrot.slane %v9087_v17, %v9085_v16  ;;  %v228_v21 = vrot.slane %v9087_v17, %v9090_v18  ;;  %v236_v25 = vrot.slane %v9087_v17, %v9095_v20 }
 0x111   :  { %3782 = vmatpush1.bf16.msra.mxu0 %v7485_v30  ;;  %v877_v30 = vld [vmem:[#allocation12 + $0x880] sm:$0xff] }
 0x112   :  { %3783 = vmatprep.subr.bf16.mxu0 %v7502_v34  ;;  %3864 = vmatpush1.bf16.msra.mxu1 %v7487_v35  ;;  %v878_v34 = vld [vmem:[#allocation12 + $0x888] sm:$0xff] }
 0x113   :  { %3865 = vmatprep.subr.bf16.mxu1 %v7504_v39  ;;  %v886_v35 = vld [vmem:[#allocation12 + $0x8c8] sm:$0xff] }
 0x115   :  { %3784 = vmatpush1.bf16.msra.mxu0 %v7501_v38 }
 0x116   :  { %3785 = vmatprep.subr.bf16.mxu0 %v7518_v42  ;;  %3866 = vmatpush1.bf16.msra.mxu1 %v7503_v43  ;;  %v7598_v42 = vcombine.high %v877_v30, %v885_v33  ;;  %v7600_v43 = vcombine.high %v878_v34, %v886_v35 }
 0x117   :  { %3867 = vmatprep.subr.bf16.mxu1 %v7520_v47  ;;  %v894_v47 = vld [vmem:[#allocation12 + $0x908] sm:$0xff] }
 0x119   :  { %3786 = vmatpush1.bf16.msra.mxu0 %v7517_v46  ;;  %v901_v46 = vld [vmem:[#allocation12 + $0x940] sm:$0xff] }
 0x11a   :  { %3787 = vmatprep.subr.bf16.mxu0 %v7534_v48  ;;  %3868 = vmatpush1.bf16.msra.mxu1 %v7519_v49  ;;  %v902_v48 = vld [vmem:[#allocation12 + $0x948] sm:$0xff] }
 0x11b   :  { %3869 = vmatprep.subr.bf16.mxu1 %v7536_v51  ;;  %v7599_v51 = vcombine.low %v878_v34, %v886_v35  ;;  %v7616_v53 = vcombine.high %v894_v47, %v902_v48  ;;  %v974_v34 = vld [vmem:[#allocation12 + $0xb88] sm:$0xff] }
 0x11c   :  { %v982_v35 = vld [vmem:[#allocation12 + $0xbc8] sm:$0xff] }
 0x11d   :  { %3788 = vmatpush1.bf16.msra.mxu0 %v7533_v50  ;;  %v7597_v50 = vcombine.low %v877_v30, %v885_v33  ;;  %v981_v33 = vld [vmem:[#allocation12 + $0xbc0] sm:$0xff] }
 0x11e   :  { %3870 = vmatpush1.bf16.msra.mxu1 %v7535_v52  ;;  %3789 = vmatprep.subr.bf16.mxu0 %v7550_v56  ;;  %v7614_v52 = vcombine.high %v893_v44, %v901_v46  ;;  %v910_v56 = vld [vmem:[#allocation12 + $0x988] sm:$0xff] }
 0x11f   :  { %3871 = vmatprep.subr.bf16.mxu1 %v7552_v60  ;;  %v7630_v60 = vcombine.high %v909_v54, %v917_v55  ;;  %v7632_v61 = vcombine.high %v910_v56, %v918_v57 }
 0x121   :  { %3790 = vmatpush1.bf16.msra.mxu0 %v7549_v58  ;;  %v7613_v58 = vcombine.low %v893_v44, %v901_v46  ;;  %v7696_v46 = vcombine.high %v974_v34, %v982_v35 }
 0x122   :  { %3872 = vmatpush1.bf16.msra.mxu1 %v7551_v59  ;;  %3791 = vmatprep.subr.bf16.mxu0 %v7566_v1  ;;  %v7615_v59 = vcombine.low %v894_v47, %v902_v48  ;;  %v926_v1 = vld [vmem:[#allocation12 + $0xa08] sm:$0xff]  ;;  %v989_v47 = vld [vmem:[#allocation12 + $0xc00] sm:$0xff] }
 0x123   :  { %3873 = vmatprep.subr.bf16.mxu1 %v7568_v5  ;;  %v7646_v5 = vcombine.high %v925_v62, %v933_v63  ;;  %v7648_v6 = vcombine.high %v926_v1, %v934_v2  ;;  %v997_v48 = vld [vmem:[#allocation12 + $0xc40] sm:$0xff] }
 0x125   :  { %3792 = vmatpush1.bf16.msra.mxu0 %v7565_v3  ;;  %v7629_v3 = vcombine.low %v909_v54, %v917_v55  ;;  %v7710_v54 = vcombine.high %v989_v47, %v997_v48 }
 0x126   :  { %3874 = vmatpush1.bf16.msra.mxu1 %v7567_v4  ;;  %3802 = vmatprep.subr.bf16.mxu0 %v7582_v9  ;;  %v7631_v4 = vcombine.low %v910_v56, %v918_v57  ;;  %v942_v9 = vld [vmem:[#allocation12 + $0xa88] sm:$0xff]  ;;  %v1005_v56 = vld [vmem:[#allocation12 + $0xc80] sm:$0xff] }
 0x127   :  { %3884 = vmatprep.subr.bf16.mxu1 %v7584_v13  ;;  %v7662_v13 = vcombine.high %v941_v7, %v949_v8  ;;  %v7664_v14 = vcombine.high %v942_v9, %v950_v10  ;;  %v1013_v57 = vld [vmem:[#allocation12 + $0xcc0] sm:$0xff] }
 0x1ab   :  { %v459_v22 = vpop.f32.mrb[0].mxu0  ;;  %v9101_v31 = vpop.f32.mrb[0].mxu1 }
 0x1ac   :  { %v460_v23 = vadd.f32 %v459_v22, %v224_v19  ;;  %v461_v24 = vpop.f32.mrb[1].mxu0  ;;  %v502_v36 = vpop.f32.mrb[1].mxu1  ;;  %v957_v19 = vld [vmem:[#allocation12 + $0xb00] sm:$0xff]  ;;  %v958_v22 = vld [vmem:[#allocation12 + $0xb08] sm:$0xff] }
 0x1ad   :  { %v462_v26 = vadd.f32 %v461_v24, %v228_v21  ;;  %v463_v27 = vpop.f32.mrb[2].mxu0  ;;  %v503_v37 = vadd.f32 %v502_v36, %v236_v25  ;;  %v504_v38 = vpop.f32.mrb[2].mxu1  ;;  %v965_v21 = vld [vmem:[#allocation12 + $0xb40] sm:$0xff]  ;;  %v7661_v25 = vcombine.low %v941_v7, %v949_v8 }
 0x1ae   :  { %v589_v28 = vmax.f32 %v460_v23, 0.0  ;;  %v464_v29 = vpop.f32.mrb[3].mxu0  ;;  %v505_v40 = vpop.f32.mrb[3].mxu1  ;;  %v966_v23 = vld [vmem:[#allocation12 + $0xb48] sm:$0xff]  ;;  %v7678_v27 = vcombine.high %v957_v19, %v965_v21 }
 0x1af   :  { %v590_v32 = vmax.f32 %v462_v26, 0.0  ;;  %v592_v45 = vmax.f32 %v503_v37, 0.0  ;;  %v7663_v26 = vcombine.low %v942_v9, %v950_v10  ;;  %v973_v29 = vld [vmem:[#allocation12 + $0xb80] sm:$0xff] }
 0x1b0   :  { %v9105_v41 = vpack.c.bf16 %v589_v28, %v589_v28  ;;  %v7680_v28 = vcombine.high %v958_v22, %v966_v23  ;;  %v1037_v9 = vld [vmem:[#allocation12 + $0xd80] sm:$0xff] }
 0x1b1   :  { %v9103_v39 = vpack.c.bf16 %v590_v32, %v590_v32  ;;  %v9111_v49 = vpack.c.bf16 %v592_v45, %v592_v45  ;;  %v7694_v45 = vcombine.high %v973_v29, %v981_v33  ;;  %v1045_v10 = vld [vmem:[#allocation12 + $0xdc0] sm:$0xff] }
 0x1b3   :  { %3793 = vmatprep.mubr.bf16.mxu0 %v9103_v39  ;;  %3875 = vmatprep.mubr.bf16.mxu1 %v9103_v39 }
 0x1b4   :  { %3794 = vmatmul.mubr.bf16.vlgmr.msra.gmra.mrb[8].mxu0 %v9105_v41  ;;  %3876 = vmatmul.mubr.bf16.vlgmr.msra.gmra.mrb[8].mxu1 %v9105_v41 }
 0x1b5   :  { %3803 = vmatpush1.bf16.msra.mxu0 %v7581_v11  ;;  %3885 = vmatpush1.bf16.msra.mxu1 %v7583_v12  ;;  %v7645_v11 = vcombine.low %v925_v62, %v933_v63  ;;  %v7647_v12 = vcombine.low %v926_v1, %v934_v2  ;;  %v7726_v62 = vcombine.high %v1005_v56, %v1013_v57  ;;  %v1021_v1 = vld [vmem:[#allocation12 + $0xd00] sm:$0xff] }
 0x1b6   :  { %3804 = vmatprep.subr.bf16.mxu0 %v7598_v42  ;;  %3886 = vmatprep.subr.bf16.mxu1 %v7600_v43  ;;  %v7677_v42 = vcombine.low %v957_v19, %v965_v21  ;;  %v7679_v43 = vcombine.low %v958_v22, %v966_v23  ;;  %v1029_v2 = vld [vmem:[#allocation12 + $0xd40] sm:$0xff]  ;;  %v7758_v19 = vcombine.high %v1037_v9, %v1045_v10 }
 0x1b7   :  { %3834 = vmatprep.mubr.bf16.mxu0 %v9111_v49  ;;  %3916 = vmatprep.mubr.bf16.mxu1 %v9111_v49  ;;  %v7742_v7 = vcombine.high %v1021_v1, %v1029_v2  ;;  %v1053_v22 = vld [vmem:[#allocation12 + $0xe00] sm:$0xff] }
 0x1b8   :  { %v1061_v23 = vld [vmem:[#allocation12 + $0xe40] sm:$0xff] }
 0x1b9   :  { %3805 = vmatpush1.bf16.msra.mxu0 %v7597_v50  ;;  %3887 = vmatpush1.bf16.msra.mxu1 %v7599_v51  ;;  %v990_v50 = vld [vmem:[#allocation12 + $0xc08] sm:$0xff] }
 0x1ba   :  { %3806 = vmatprep.subr.bf16.mxu0 %v7614_v52  ;;  %3888 = vmatprep.subr.bf16.mxu1 %v7616_v53  ;;  %v998_v51 = vld [vmem:[#allocation12 + $0xc48] sm:$0xff]  ;;  %v7693_v52 = vcombine.low %v973_v29, %v981_v33  ;;  %v7695_v53 = vcombine.low %v974_v34, %v982_v35  ;;  %v7774_v29 = vcombine.high %v1053_v22, %v1061_v23  ;;  %v1069_v34 = vld [vmem:[#allocation12 + $0xe80] sm:$0xff] }
 0x1bb   :  { %v9115_v24 = vpop.f32.mrb[4].mxu0  ;;  %v7712_v55 = vcombine.high %v990_v50, %v998_v51  ;;  %v1077_v35 = vld [vmem:[#allocation12 + $0xec0] sm:$0xff] }
 0x1bc   :  { %v9117_v30 = vpop.f32.mrb[5].mxu0  ;;  %v9119_v32 = vpop.f32.mrb[4].mxu1 }
 0x1bd   :  { %3807 = vmatpush1.bf16.msra.mxu0 %v7613_v58  ;;  %3889 = vmatpush1.bf16.msra.mxu1 %v7615_v59  ;;  %v545_v36 = vpop.f32.mrb[6].mxu0  ;;  %v9121_v37 = vpop.f32.mrb[5].mxu1  ;;  %v1006_v58 = vld [vmem:[#allocation12 + $0xc88] sm:$0xff] }
 0x1be   :  { %3808 = vmatprep.subr.bf16.mxu0 %v7630_v60  ;;  %3890 = vmatprep.subr.bf16.mxu1 %v7632_v61  ;;  %v546_v38 = vpop.f32.mrb[7].mxu0  ;;  %v586_v40 = vpop.f32.mrb[6].mxu1  ;;  %v1014_v59 = vld [vmem:[#allocation12 + $0xcc8] sm:$0xff]  ;;  %v7709_v60 = vcombine.low %v989_v47, %v997_v48  ;;  %v7711_v61 = vcombine.low %v990_v50, %v998_v51  ;;  %v1093_v47 = vld [vmem:[#allocation12 + $0xf40] sm:$0xff] }
 0x1bf   :  { %v587_v44 = vpop.f32.mrb[7].mxu1  ;;  %v7728_v63 = vcombine.high %v1006_v58, %v1014_v59  ;;  %v1070_v36 = vld [vmem:[#allocation12 + $0xe88] sm:$0xff]  ;;  %v9124_v40 = vsub.s32 2, %v9082_v15 }
 0x1c0   :  { %v1078_v38 = vld [vmem:[#allocation12 + $0xec8] sm:$0xff]  ;;  %v7790_v44 = vcombine.high %v1069_v34, %v1077_v35 }
 0x1c1   :  { %3809 = vmatpush1.bf16.msra.mxu0 %v7629_v3  ;;  %3891 = vmatpush1.bf16.msra.mxu1 %v7631_v4  ;;  %v1022_v3 = vld [vmem:[#allocation12 + $0xd08] sm:$0xff]  ;;  %v232_v51 = vrot.slane %v9087_v17, %v9124_v40 }
 0x1c2   :  { %3810 = vmatprep.subr.bf16.mxu0 %v7646_v5  ;;  %3892 = vmatprep.subr.bf16.mxu1 %v7648_v6  ;;  %v1030_v4 = vld [vmem:[#allocation12 + $0xd48] sm:$0xff]  ;;  %v7725_v5 = vcombine.low %v1005_v56, %v1013_v57  ;;  %v7727_v6 = vcombine.low %v1006_v58, %v1014_v59  ;;  %v1101_v56 = vld [vmem:[#allocation12 + $0xf80] sm:$0xff] }
 0x1c3   :  { %v7744_v8 = vcombine.high %v1022_v3, %v1030_v4  ;;  %v1086_v48 = vld [vmem:[#allocation12 + $0xf08] sm:$0xff]  ;;  %v1109_v57 = vld [vmem:[#allocation12 + $0xfc0] sm:$0xff] }
 0x1c4   :  { %v1094_v50 = vld [vmem:[#allocation12 + $0xf48] sm:$0xff]  ;;  %v7822_v17 = vcombine.high %v1101_v56, %v1109_v57 }
 0x1c5   :  { %3811 = vmatpush1.bf16.msra.mxu0 %v7645_v11  ;;  %3893 = vmatpush1.bf16.msra.mxu1 %v7647_v12  ;;  %v1038_v11 = vld [vmem:[#allocation12 + $0xd88] sm:$0xff] }
 0x1c6   :  { %3812 = vmatprep.subr.bf16.mxu0 %v7662_v13  ;;  %3894 = vmatprep.subr.bf16.mxu1 %v7664_v14  ;;  %v1046_v12 = vld [vmem:[#allocation12 + $0xdc8] sm:$0xff]  ;;  %v7741_v13 = vcombine.low %v1021_v1, %v1029_v2  ;;  %v7743_v14 = vcombine.low %v1022_v3, %v1030_v4  ;;  %v607_v1 = vld [vmem:[#allocation12 + $0x10] sm:$0xff]  ;;  %v608_v3 = vld [vmem:[#allocation12 + $0x18] sm:$0xff] }
 0x1c7   :  { %v7760_v21 = vcombine.high %v1038_v11, %v1046_v12  ;;  %v1102_v58 = vld [vmem:[#allocation12 + $0xf88] sm:$0xff]  ;;  %v615_v2 = vld [vmem:[#allocation12 + $0x50] sm:$0xff]  ;;  %v616_v4 = vld [vmem:[#allocation12 + $0x58] sm:$0xff] }
 0x1c8   :  { %v1110_v59 = vld [vmem:[#allocation12 + $0xfc8] sm:$0xff] }
 0x1c9   :  { %3813 = vmatpush1.bf16.msra.mxu0 %v7661_v25  ;;  %3895 = vmatpush1.bf16.msra.mxu1 %v7663_v26  ;;  %v1054_v25 = vld [vmem:[#allocation12 + $0xe08] sm:$0xff] }
 0x1ca   :  { %3814 = vmatprep.subr.bf16.mxu0 %v7678_v27  ;;  %3896 = vmatprep.subr.bf16.mxu1 %v7680_v28  ;;  %v1062_v26 = vld [vmem:[#allocation12 + $0xe48] sm:$0xff]  ;;  %v7757_v27 = vcombine.low %v1037_v9, %v1045_v10  ;;  %v7759_v28 = vcombine.low %v1038_v11, %v1046_v12  ;;  %v623_v9 = vld [vmem:[#allocation12 + $0x90] sm:$0xff]  ;;  %v624_v12 = vld [vmem:[#allocation12 + $0x98] sm:$0xff] }
 0x1cb   :  { %v7776_v33 = vcombine.high %v1054_v25, %v1062_v26  ;;  %v631_v11 = vld [vmem:[#allocation12 + $0xd0] sm:$0xff] }
 0x1cd   :  { %3815 = vmatpush1.bf16.msra.mxu0 %v7677_v42  ;;  %3897 = vmatpush1.bf16.msra.mxu1 %v7679_v43  ;;  %v7773_v42 = vcombine.low %v1053_v22, %v1061_v23  ;;  %v7775_v43 = vcombine.low %v1054_v25, %v1062_v26  ;;  %v639_v23 = vld [vmem:[#allocation12 + $0x110] sm:$0xff]  ;;  %v640_v26 = vld [vmem:[#allocation12 + $0x118] sm:$0xff] }
 0x1ce   :  { %3816 = vmatprep.subr.bf16.mxu0 %v7694_v45  ;;  %3898 = vmatprep.subr.bf16.mxu1 %v7696_v46  ;;  %v7792_v45 = vcombine.high %v1070_v36, %v1078_v38  ;;  %v1085_v46 = vld [vmem:[#allocation12 + $0xf00] sm:$0xff]  ;;  %v647_v25 = vld [vmem:[#allocation12 + $0x150] sm:$0xff] }
 0x1d1   :  { %3817 = vmatpush1.bf16.msra.mxu0 %v7693_v52  ;;  %3899 = vmatpush1.bf16.msra.mxu1 %v7695_v53  ;;  %v7789_v52 = vcombine.low %v1069_v34, %v1077_v35  ;;  %v7791_v53 = vcombine.low %v1070_v36, %v1078_v38  ;;  %v655_v35 = vld [vmem:[#allocation12 + $0x190] sm:$0xff]  ;;  %v656_v38 = vld [vmem:[#allocation12 + $0x198] sm:$0xff] }
 0x1d2   :  { %3818 = vmatprep.subr.bf16.mxu0 %v7710_v54  ;;  %3900 = vmatprep.subr.bf16.mxu1 %v7712_v55  ;;  %v7806_v54 = vcombine.high %v1085_v46, %v1093_v47  ;;  %v7808_v55 = vcombine.high %v1086_v48, %v1094_v50  ;;  %v663_v36 = vld [vmem:[#allocation12 + $0x1d0] sm:$0xff] }
 0x1d5   :  { %3819 = vmatpush1.bf16.msra.mxu0 %v7709_v60  ;;  %3901 = vmatpush1.bf16.msra.mxu1 %v7711_v61  ;;  %v501_v60 = vadd.f32 %v9101_v31, %v232_v51  ;;  %v7805_v61 = vcombine.low %v1085_v46, %v1093_v47  ;;  %v7330_v31 = vcombine.high %v607_v1, %v615_v2  ;;  %v671_v47 = vld [vmem:[#allocation12 + $0x210] sm:$0xff]  ;;  %v680_v51 = vld [vmem:[#allocation12 + $0x258] sm:$0xff] }
 0x1d6   :  { %3820 = vmatprep.subr.bf16.mxu0 %v7726_v62  ;;  %3902 = vmatprep.subr.bf16.mxu1 %v7728_v63  ;;  %v7807_v62 = vcombine.low %v1086_v48, %v1094_v50  ;;  %v7824_v63 = vcombine.high %v1102_v58, %v1110_v59  ;;  %v679_v48 = vld [vmem:[#allocation12 + $0x250] sm:$0xff]  ;;  %v672_v50 = vld [vmem:[#allocation12 + $0x218] sm:$0xff] }
 0x1d9   :  { %3821 = vmatpush1.bf16.msra.mxu0 %v7725_v5  ;;  %3903 = vmatpush1.bf16.msra.mxu1 %v7727_v6  ;;  %v591_v5 = vmax.f32 %v501_v60, 0.0  ;;  %v7821_v6 = vcombine.low %v1101_v56, %v1109_v57  ;;  %v687_v56 = vld [vmem:[#allocation12 + $0x290] sm:$0xff]  ;;  %v7393_v60 = vcombine.low %v671_v47, %v679_v48 }
 0x1da   :  { %3822 = vmatprep.subr.bf16.mxu0 %v7742_v7  ;;  %3904 = vmatprep.subr.bf16.mxu1 %v7744_v8  ;;  %v7823_v7 = vcombine.low %v1102_v58, %v1110_v59  ;;  %v7332_v8 = vcombine.high %v608_v3, %v616_v4  ;;  %v695_v57 = vld [vmem:[#allocation12 + $0x2d0] sm:$0xff]  ;;  %v688_v58 = vld [vmem:[#allocation12 + $0x298] sm:$0xff] }
 0x1db   :  { %v9129_v10 = vpack.c.bf16 %v591_v5, %v591_v5  ;;  %v696_v59 = vld [vmem:[#allocation12 + $0x2d8] sm:$0xff] }
 0x1dc   :  { %v7411_v5 = vcombine.low %v688_v58, %v696_v59 }
 0x1dd   :  { %3823 = vmatpush1.bf16.msra.mxu0 %v7741_v13  ;;  %3905 = vmatpush1.bf16.msra.mxu1 %v7743_v14  ;;  %v632_v13 = vld [vmem:[#allocation12 + $0xd8] sm:$0xff]  ;;  %v7329_v14 = vcombine.low %v607_v1, %v615_v2  ;;  %v711_v1 = vld [vmem:[#allocation12 + $0x350] sm:$0xff] }
 0x1de   :  { %3824 = vmatprep.subr.bf16.mxu0 %v7758_v19  ;;  %3906 = vmatprep.subr.bf16.mxu1 %v7760_v21  ;;  %v7331_v19 = vcombine.low %v608_v3, %v616_v4  ;;  %v7346_v21 = vcombine.high %v623_v9, %v631_v11  ;;  %v7348_v22 = vcombine.high %v624_v12, %v632_v13  ;;  %v704_v2 = vld [vmem:[#allocation12 + $0x318] sm:$0xff] }
 0x1df   :  { %v712_v3 = vld [vmem:[#allocation12 + $0x358] sm:$0xff]  ;;  %v7409_v4 = vcombine.low %v687_v56, %v695_v57 }
 0x1e1   :  { %3825 = vmatpush1.bf16.msra.mxu0 %v7757_v27  ;;  %3907 = vmatpush1.bf16.msra.mxu1 %v7759_v28  ;;  %v648_v27 = vld [vmem:[#allocation12 + $0x158] sm:$0xff]  ;;  %v7345_v28 = vcombine.low %v623_v9, %v631_v11 }
 0x1e2   :  { %3826 = vmatprep.subr.bf16.mxu0 %v7774_v29  ;;  %3908 = vmatprep.subr.bf16.mxu1 %v7776_v33  ;;  %v7347_v29 = vcombine.low %v624_v12, %v632_v13  ;;  %v7362_v33 = vcombine.high %v639_v23, %v647_v25  ;;  %v7364_v34 = vcombine.high %v640_v26, %v648_v27  ;;  %v720_v9 = vld [vmem:[#allocation12 + $0x398] sm:$0xff] }
 0x1e3   :  { %v728_v11 = vld [vmem:[#allocation12 + $0x3d8] sm:$0xff]  ;;  %v7427_v13 = vcombine.low %v704_v2, %v712_v3 }
 0x1e5   :  { %3827 = vmatpush1.bf16.msra.mxu0 %v7773_v42  ;;  %3909 = vmatpush1.bf16.msra.mxu1 %v7775_v43  ;;  %v664_v42 = vld [vmem:[#allocation12 + $0x1d8] sm:$0xff]  ;;  %v7361_v43 = vcombine.low %v639_v23, %v647_v25 }
 0x1e6   :  { %3828 = vmatprep.subr.bf16.mxu0 %v7790_v44  ;;  %3910 = vmatprep.subr.bf16.mxu1 %v7792_v45  ;;  %v7363_v44 = vcombine.low %v640_v26, %v648_v27  ;;  %v7378_v45 = vcombine.high %v655_v35, %v663_v36  ;;  %v7380_v46 = vcombine.high %v656_v38, %v664_v42  ;;  %v736_v23 = vld [vmem:[#allocation12 + $0x418] sm:$0xff] }
 0x1e7   :  { %v744_v25 = vld [vmem:[#allocation12 + $0x458] sm:$0xff]  ;;  %v7443_v27 = vcombine.low %v720_v9, %v728_v11 }
 0x1e9   :  { %3829 = vmatpush1.bf16.msra.mxu0 %v7789_v52  ;;  %3911 = vmatpush1.bf16.msra.mxu1 %v7791_v53  ;;  %v7377_v52 = vcombine.low %v655_v35, %v663_v36  ;;  %v7379_v53 = vcombine.low %v656_v38, %v664_v42  ;;  %v752_v35 = vld [vmem:[#allocation12 + $0x498] sm:$0xff]  ;;  %v7459_v42 = vcombine.low %v736_v23, %v744_v25 }
 0x1ea   :  { %3830 = vmatprep.subr.bf16.mxu0 %v7806_v54  ;;  %3912 = vmatprep.subr.bf16.mxu1 %v7808_v55  ;;  %v7394_v54 = vcombine.high %v671_v47, %v679_v48  ;;  %v7396_v55 = vcombine.high %v672_v50, %v680_v51  ;;  %v760_v36 = vld [vmem:[#allocation12 + $0x4d8] sm:$0xff] }
 0x1eb   :  { %v768_v47 = vld [vmem:[#allocation12 + $0x518] sm:$0xff] }
 0x1ec   :  { %v776_v48 = vld [vmem:[#allocation12 + $0x558] sm:$0xff] }
 0x1ed   :  { %3831 = vmatpush1.bf16.msra.mxu0 %v7805_v61  ;;  %3913 = vmatpush1.bf16.msra.mxu1 %v7807_v62  ;;  %v7395_v61 = vcombine.low %v672_v50, %v680_v51  ;;  %v7410_v62 = vcombine.high %v687_v56, %v695_v57  ;;  %v7475_v51 = vcombine.low %v752_v35, %v760_v36  ;;  %v784_v56 = vld [vmem:[#allocation12 + $0x598] sm:$0xff] }
 0x1ee   :  { %3832 = vmatprep.subr.bf16.mxu0 %v7822_v17  ;;  %3914 = vmatprep.subr.bf16.mxu1 %v7824_v63  ;;  %v7412_v17 = vcombine.high %v688_v58, %v696_v59  ;;  %v703_v63 = vld [vmem:[#allocation12 + $0x310] sm:$0xff]  ;;  %v792_v57 = vld [vmem:[#allocation12 + $0x5d8] sm:$0xff]  ;;  %v7491_v59 = vcombine.low %v768_v47, %v776_v48 }
 0x1ef   :  { %v7425_v12 = vcombine.low %v703_v63, %v711_v1 }
 0x1f1   :  { %3833 = vmatpush1.bf16.msra.mxu0 %v7821_v6  ;;  %3915 = vmatpush1.bf16.msra.mxu1 %v7823_v7  ;;  %v7426_v6 = vcombine.high %v703_v63, %v711_v1  ;;  %v7428_v7 = vcombine.high %v704_v2, %v712_v3  ;;  %v800_v63 = vld [vmem:[#allocation12 + $0x618] sm:$0xff]  ;;  %v7507_v3 = vcombine.low %v784_v56, %v792_v57 }
 0x1f2   :  { %3925 = vmatprep.subr.bf16.mxu0 %v7330_v31  ;;  %4007 = vmatprep.subr.bf16.mxu1 %v7332_v8  ;;  %v719_v31 = vld [vmem:[#allocation12 + $0x390] sm:$0xff]  ;;  %v808_v1 = vld [vmem:[#allocation12 + $0x658] sm:$0xff] }
 0x1f3   :  { %v727_v8 = vld [vmem:[#allocation12 + $0x3d0] sm:$0xff] }
 0x1f4   :  { %3835 = vmatmul.mubr.bf16.vlgmr.msra.gmra.mrb[8].mxu0 %v9129_v10  ;;  %3917 = vmatmul.mubr.bf16.vlgmr.msra.gmra.mrb[8].mxu1 %v9129_v10  ;;  %v7441_v26 = vcombine.low %v719_v31, %v727_v8 }
 0x1f5   :  { %3926 = vmatpush1.bf16.msra.mxu0 %v7329_v14  ;;  %3957 = vmatprep.mubr.bf16.mxu0 %v9103_v39  ;;  %v7442_v14 = vcombine.high %v719_v31, %v727_v8  ;;  %v816_v31 = vld [vmem:[#allocation12 + $0x698] sm:$0xff] }
 0x1f6   :  { %4008 = vmatpush1.bf16.msra.mxu1 %v7331_v19  ;;  %4039 = vmatprep.mubr.bf16.mxu1 %v9103_v39  ;;  %v7444_v19 = vcombine.high %v720_v9, %v728_v11  ;;  %v824_v8 = vld [vmem:[#allocation12 + $0x6d8] sm:$0xff]  ;;  %v7523_v11 = vcombine.low %v800_v63, %v808_v1 }
 0x1f7   :  { %3927 = vmatprep.subr.bf16.mxu0 %v7346_v21  ;;  %4009 = vmatprep.subr.bf16.mxu1 %v7348_v22  ;;  %v735_v21 = vld [vmem:[#allocation12 + $0x410] sm:$0xff] }
 0x1f8   :  { %v743_v22 = vld [vmem:[#allocation12 + $0x450] sm:$0xff] }
 0x1f9   :  { %3928 = vmatpush1.bf16.msra.mxu0 %v7345_v28  ;;  %v7458_v28 = vcombine.high %v735_v21, %v743_v22  ;;  %v7457_v38 = vcombine.low %v735_v21, %v743_v22  ;;  %v832_v21 = vld [vmem:[#allocation12 + $0x718] sm:$0xff] }
 0x1fa   :  { %4010 = vmatpush1.bf16.msra.mxu1 %v7347_v29  ;;  %3929 = vmatprep.subr.bf16.mxu0 %v7362_v33  ;;  %v7460_v29 = vcombine.high %v736_v23, %v744_v25  ;;  %v751_v33 = vld [vmem:[#allocation12 + $0x490] sm:$0xff]  ;;  %v840_v22 = vld [vmem:[#allocation12 + $0x758] sm:$0xff]  ;;  %v7539_v25 = vcombine.low %v816_v31, %v824_v8 }
 0x1fb   :  { %4011 = vmatprep.subr.bf16.mxu1 %v7364_v34  ;;  %v759_v34 = vld [vmem:[#allocation12 + $0x4d0] sm:$0xff] }
 0x1fc   :  { %v7473_v50 = vcombine.low %v751_v33, %v759_v34 }
 0x1fd   :  { %3930 = vmatpush1.bf16.msra.mxu0 %v7361_v43  ;;  %v7474_v43 = vcombine.high %v751_v33, %v759_v34  ;;  %v848_v33 = vld [vmem:[#allocation12 + $0x798] sm:$0xff] }
 0x1fe   :  { %4012 = vmatpush1.bf16.msra.mxu1 %v7363_v44  ;;  %3931 = vmatprep.subr.bf16.mxu0 %v7378_v45  ;;  %v7476_v44 = vcombine.high %v752_v35, %v760_v36  ;;  %v767_v45 = vld [vmem:[#allocation12 + $0x510] sm:$0xff]  ;;  %v856_v34 = vld [vmem:[#allocation12 + $0x7d8] sm:$0xff]  ;;  %v7555_v36 = vcombine.low %v832_v21, %v840_v22 }
 0x1ff   :  { %4013 = vmatprep.subr.bf16.mxu1 %v7380_v46  ;;  %v775_v46 = vld [vmem:[#allocation12 + $0x550] sm:$0xff] }
 0x200   :  { %v7489_v58 = vcombine.low %v767_v45, %v775_v46 }
 0x201   :  { %3932 = vmatpush1.bf16.msra.mxu0 %v7377_v52  ;;  %v7490_v52 = vcombine.high %v767_v45, %v775_v46  ;;  %v864_v45 = vld [vmem:[#allocation12 + $0x818] sm:$0xff] }
 0x202   :  { %4014 = vmatpush1.bf16.msra.mxu1 %v7379_v53  ;;  %3933 = vmatprep.subr.bf16.mxu0 %v7394_v54  ;;  %v7492_v53 = vcombine.high %v768_v47, %v776_v48  ;;  %v783_v54 = vld [vmem:[#allocation12 + $0x590] sm:$0xff]  ;;  %v872_v46 = vld [vmem:[#allocation12 + $0x858] sm:$0xff]  ;;  %v7571_v48 = vcombine.low %v848_v33, %v856_v34 }
 0x203   :  { %4015 = vmatprep.subr.bf16.mxu1 %v7396_v55  ;;  %v791_v55 = vld [vmem:[#allocation12 + $0x5d0] sm:$0xff] }
 0x204   :  { %v7505_v2 = vcombine.low %v783_v54, %v791_v55 }
 0x205   :  { %3934 = vmatpush1.bf16.msra.mxu0 %v7393_v60  ;;  %v7506_v60 = vcombine.high %v783_v54, %v791_v55  ;;  %v880_v55 = vld [vmem:[#allocation12 + $0x898] sm:$0xff] }
 0x206   :  { %4016 = vmatpush1.bf16.msra.mxu1 %v7395_v61  ;;  %3935 = vmatprep.subr.bf16.mxu0 %v7410_v62  ;;  %v7508_v61 = vcombine.high %v784_v56, %v792_v57  ;;  %v799_v62 = vld [vmem:[#allocation12 + $0x610] sm:$0xff]  ;;  %v888_v56 = vld [vmem:[#allocation12 + $0x8d8] sm:$0xff]  ;;  %v7587_v57 = vcombine.low %v864_v45, %v872_v46 }
 0x207   :  { %4017 = vmatprep.subr.bf16.mxu1 %v7412_v17  ;;  %v807_v17 = vld [vmem:[#allocation12 + $0x650] sm:$0xff] }
 0x208   :  { %v7521_v9 = vcombine.low %v799_v62, %v807_v17 }
 0x209   :  { %3936 = vmatpush1.bf16.msra.mxu0 %v7409_v4  ;;  %v7522_v4 = vcombine.high %v799_v62, %v807_v17  ;;  %v896_v62 = vld [vmem:[#allocation12 + $0x918] sm:$0xff] }
 0x20a   :  { %4018 = vmatpush1.bf16.msra.mxu1 %v7411_v5  ;;  %3937 = vmatprep.subr.bf16.mxu0 %v7426_v6  ;;  %v7524_v5 = vcombine.high %v800_v63, %v808_v1  ;;  %v815_v6 = vld [vmem:[#allocation12 + $0x690] sm:$0xff]  ;;  %v904_v17 = vld [vmem:[#allocation12 + $0x958] sm:$0xff]  ;;  %v7603_v1 = vcombine.low %v880_v55, %v888_v56 }
 0x20b   :  { %4019 = vmatprep.subr.bf16.mxu1 %v7428_v7  ;;  %v823_v7 = vld [vmem:[#allocation12 + $0x6d0] sm:$0xff] }
 0x20c   :  { %v7537_v23 = vcombine.low %v815_v6, %v823_v7 }
 0x20d   :  { %3938 = vmatpush1.bf16.msra.mxu0 %v7425_v12  ;;  %v7538_v12 = vcombine.high %v815_v6, %v823_v7  ;;  %v912_v6 = vld [vmem:[#allocation12 + $0x998] sm:$0xff] }
 0x20e   :  { %4020 = vmatpush1.bf16.msra.mxu1 %v7427_v13  ;;  %3939 = vmatprep.subr.bf16.mxu0 %v7442_v14  ;;  %v7540_v13 = vcombine.high %v816_v31, %v824_v8  ;;  %v831_v14 = vld [vmem:[#allocation12 + $0x710] sm:$0xff]  ;;  %v920_v7 = vld [vmem:[#allocation12 + $0x9d8] sm:$0xff]  ;;  %v7619_v8 = vcombine.low %v896_v62, %v904_v17 }
 0x20f   :  { %4021 = vmatprep.subr.bf16.mxu1 %v7444_v19  ;;  %v839_v19 = vld [vmem:[#allocation12 + $0x750] sm:$0xff] }
 0x210   :  { %v7553_v35 = vcombine.low %v831_v14, %v839_v19 }
 0x211   :  { %3940 = vmatpush1.bf16.msra.mxu0 %v7441_v26  ;;  %v7554_v26 = vcombine.high %v831_v14, %v839_v19  ;;  %v928_v14 = vld [vmem:[#allocation12 + $0xa18] sm:$0xff] }
 0x212   :  { %4022 = vmatpush1.bf16.msra.mxu1 %v7443_v27  ;;  %3941 = vmatprep.subr.bf16.mxu0 %v7458_v28  ;;  %v7556_v27 = vcombine.high %v832_v21, %v840_v22  ;;  %v847_v28 = vld [vmem:[#allocation12 + $0x790] sm:$0xff]  ;;  %v936_v19 = vld [vmem:[#allocation12 + $0xa58] sm:$0xff]  ;;  %v7635_v22 = vcombine.low %v912_v6, %v920_v7 }
 0x213   :  { %4023 = vmatprep.subr.bf16.mxu1 %v7460_v29  ;;  %v855_v29 = vld [vmem:[#allocation12 + $0x7d0] sm:$0xff] }
 0x214   :  { %v7569_v47 = vcombine.low %v847_v28, %v855_v29 }
 0x215   :  { %3942 = vmatpush1.bf16.msra.mxu0 %v7457_v38  ;;  %v7570_v38 = vcombine.high %v847_v28, %v855_v29  ;;  %v944_v28 = vld [vmem:[#allocation12 + $0xa98] sm:$0xff] }
 0x216   :  { %4024 = vmatpush1.bf16.msra.mxu1 %v7459_v42  ;;  %3943 = vmatprep.subr.bf16.mxu0 %v7474_v43  ;;  %v7572_v42 = vcombine.high %v848_v33, %v856_v34  ;;  %v863_v43 = vld [vmem:[#allocation12 + $0x810] sm:$0xff]  ;;  %v952_v29 = vld [vmem:[#allocation12 + $0xad8] sm:$0xff]  ;;  %v7651_v34 = vcombine.low %v928_v14, %v936_v19 }
 0x217   :  { %4025 = vmatprep.subr.bf16.mxu1 %v7476_v44  ;;  %v871_v44 = vld [vmem:[#allocation12 + $0x850] sm:$0xff] }
 0x218   :  { %v7585_v54 = vcombine.low %v863_v43, %v871_v44 }
 0x219   :  { %3944 = vmatpush1.bf16.msra.mxu0 %v7473_v50  ;;  %v7586_v50 = vcombine.high %v863_v43, %v871_v44  ;;  %v960_v43 = vld [vmem:[#allocation12 + $0xb18] sm:$0xff] }
 0x21a   :  { %4026 = vmatpush1.bf16.msra.mxu1 %v7475_v51  ;;  %3945 = vmatprep.subr.bf16.mxu0 %v7490_v52  ;;  %v7588_v51 = vcombine.high %v864_v45, %v872_v46  ;;  %v879_v52 = vld [vmem:[#allocation12 + $0x890] sm:$0xff]  ;;  %v968_v44 = vld [vmem:[#allocation12 + $0xb58] sm:$0xff]  ;;  %v7667_v46 = vcombine.low %v944_v28, %v952_v29 }
 0x21b   :  { %4027 = vmatprep.subr.bf16.mxu1 %v7492_v53  ;;  %v887_v53 = vld [vmem:[#allocation12 + $0x8d0] sm:$0xff] }
 0x21c   :  { %v7601_v63 = vcombine.low %v879_v52, %v887_v53 }
 0x21d   :  { %3946 = vmatpush1.bf16.msra.mxu0 %v7489_v58  ;;  %v7602_v58 = vcombine.high %v879_v52, %v887_v53  ;;  %v976_v52 = vld [vmem:[#allocation12 + $0xb98] sm:$0xff] }
 0x21e   :  { %4028 = vmatpush1.bf16.msra.mxu1 %v7491_v59  ;;  %3947 = vmatprep.subr.bf16.mxu0 %v7506_v60  ;;  %v895_v59 = vld [vmem:[#allocation12 + $0x910] sm:$0xff]  ;;  %v984_v53 = vld [vmem:[#allocation12 + $0xbd8] sm:$0xff] }
 0x21f   :  { %4029 = vmatprep.subr.bf16.mxu1 %v7508_v61  ;;  %v903_v60 = vld [vmem:[#allocation12 + $0x950] sm:$0xff]  ;;  %v7604_v61 = vcombine.high %v880_v55, %v888_v56  ;;  %v7683_v55 = vcombine.low %v960_v43, %v968_v44 }
 0x220   :  { %v7617_v31 = vcombine.low %v895_v59, %v903_v60 }
 0x221   :  { %3948 = vmatpush1.bf16.msra.mxu0 %v7505_v2  ;;  %v7618_v2 = vcombine.high %v895_v59, %v903_v60  ;;  %v999_v59 = vld [vmem:[#allocation12 + $0xc50] sm:$0xff]  ;;  %v992_v60 = vld [vmem:[#allocation12 + $0xc18] sm:$0xff] }
 0x222   :  { %4030 = vmatpush1.bf16.msra.mxu1 %v7507_v3  ;;  %3949 = vmatprep.subr.bf16.mxu0 %v7522_v4  ;;  %v7620_v3 = vcombine.high %v896_v62, %v904_v17  ;;  %v911_v4 = vld [vmem:[#allocation12 + $0x990] sm:$0xff]  ;;  %v7699_v17 = vcombine.low %v976_v52, %v984_v53 }
 0x223   :  { %4031 = vmatprep.subr.bf16.mxu1 %v7524_v5  ;;  %v919_v5 = vld [vmem:[#allocation12 + $0x9d0] sm:$0xff] }
 0x224   :  { %v7633_v21 = vcombine.low %v911_v4, %v919_v5 }
 0x225   :  { %3950 = vmatpush1.bf16.msra.mxu0 %v7521_v9  ;;  %v7634_v9 = vcombine.high %v911_v4, %v919_v5  ;;  %v1008_v4 = vld [vmem:[#allocation12 + $0xc98] sm:$0xff] }
 0x226   :  { %4032 = vmatpush1.bf16.msra.mxu1 %v7523_v11  ;;  %3951 = vmatprep.subr.bf16.mxu0 %v7538_v12  ;;  %v7636_v11 = vcombine.high %v912_v6, %v920_v7  ;;  %v927_v12 = vld [vmem:[#allocation12 + $0xa10] sm:$0xff]  ;;  %v1016_v5 = vld [vmem:[#allocation12 + $0xcd8] sm:$0xff] }
 0x227   :  { %4033 = vmatprep.subr.bf16.mxu1 %v7540_v13  ;;  %v935_v13 = vld [vmem:[#allocation12 + $0xa50] sm:$0xff] }
 0x228   :  { %v7649_v33 = vcombine.low %v927_v12, %v935_v13 }
 0x229   :  { %3952 = vmatpush1.bf16.msra.mxu0 %v7537_v23  ;;  %v7650_v23 = vcombine.high %v927_v12, %v935_v13  ;;  %v1024_v12 = vld [vmem:[#allocation12 + $0xd18] sm:$0xff] }
 0x22a   :  { %4034 = vmatpush1.bf16.msra.mxu1 %v7539_v25  ;;  %3953 = vmatprep.subr.bf16.mxu0 %v7554_v26  ;;  %v7652_v25 = vcombine.high %v928_v14, %v936_v19  ;;  %v943_v26 = vld [vmem:[#allocation12 + $0xa90] sm:$0xff]  ;;  %v1032_v13 = vld [vmem:[#allocation12 + $0xd58] sm:$0xff]  ;;  %v7731_v19 = vcombine.low %v1008_v4, %v1016_v5 }
 0x22b   :  { %4035 = vmatprep.subr.bf16.mxu1 %v7556_v27  ;;  %v951_v27 = vld [vmem:[#allocation12 + $0xad0] sm:$0xff] }
 0x22c   :  { %v7665_v45 = vcombine.low %v943_v26, %v951_v27 }
 0x22d   :  { %3954 = vmatpush1.bf16.msra.mxu0 %v7553_v35  ;;  %v7666_v35 = vcombine.high %v943_v26, %v951_v27  ;;  %v1040_v26 = vld [vmem:[#allocation12 + $0xd98] sm:$0xff] }
 0x22e   :  { %4036 = vmatpush1.bf16.msra.mxu1 %v7555_v36  ;;  %3955 = vmatprep.subr.bf16.mxu0 %v7570_v38  ;;  %v7668_v36 = vcombine.high %v944_v28, %v952_v29  ;;  %v959_v38 = vld [vmem:[#allocation12 + $0xb10] sm:$0xff]  ;;  %v1048_v27 = vld [vmem:[#allocation12 + $0xdd8] sm:$0xff]  ;;  %v7747_v29 = vcombine.low %v1024_v12, %v1032_v13 }
 0x22f   :  { %4037 = vmatprep.subr.bf16.mxu1 %v7572_v42  ;;  %v967_v42 = vld [vmem:[#allocation12 + $0xb50] sm:$0xff] }
 0x231   :  { %3956 = vmatpush1.bf16.msra.mxu0 %v7569_v47  ;;  %v7682_v47 = vcombine.high %v959_v38, %v967_v42 }
 0x232   :  { %4038 = vmatpush1.bf16.msra.mxu1 %v7571_v48  ;;  %3966 = vmatprep.subr.bf16.mxu0 %v7586_v50  ;;  %v7684_v48 = vcombine.high %v960_v43, %v968_v44  ;;  %v975_v50 = vld [vmem:[#allocation12 + $0xb90] sm:$0xff]  ;;  %v7763_v44 = vcombine.low %v1040_v26, %v1048_v27 }
 0x233   :  { %4048 = vmatprep.subr.bf16.mxu1 %v7588_v51  ;;  %v983_v51 = vld [vmem:[#allocation12 + $0xbd0] sm:$0xff] }
 0x234   :  { %3958 = vmatmul.mubr.bf16.vlgmr.msra.gmra.mrb[12].mxu0 %v9105_v41  ;;  %v7698_v56 = vcombine.high %v975_v50, %v983_v51  ;;  %v7697_v62 = vcombine.low %v975_v50, %v983_v51  ;;  %v1072_v50 = vld [vmem:[#allocation12 + $0xe98] sm:$0xff] }
 0x235   :  { %4040 = vmatmul.mubr.bf16.vlgmr.msra.gmra.mrb[12].mxu1 %v9105_v41  ;;  %3967 = vmatpush1.bf16.msra.mxu0 %v7585_v54  ;;  %v7681_v54 = vcombine.low %v959_v38, %v967_v42  ;;  %v1056_v38 = vld [vmem:[#allocation12 + $0xe18] sm:$0xff] }
 0x236   :  { %3998 = vmatprep.mubr.bf16.mxu0 %v9111_v49  ;;  %4049 = vmatpush1.bf16.msra.mxu1 %v7587_v57  ;;  %v7700_v57 = vcombine.high %v976_v52, %v984_v53  ;;  %v1064_v42 = vld [vmem:[#allocation12 + $0xe58] sm:$0xff] }
 0x237   :  { %4080 = vmatprep.mubr.bf16.mxu1 %v9111_v49  ;;  %3968 = vmatprep.subr.bf16.mxu0 %v7602_v58  ;;  %v991_v58 = vld [vmem:[#allocation12 + $0xc10] sm:$0xff]  ;;  %v1080_v51 = vld [vmem:[#allocation12 + $0xed8] sm:$0xff]  ;;  %v7779_v53 = vcombine.low %v1056_v38, %v1064_v42 }
 0x238   :  { %4050 = vmatprep.subr.bf16.mxu1 %v7604_v61  ;;  %v1000_v61 = vld [vmem:[#allocation12 + $0xc58] sm:$0xff]  ;;  %v7713_v6 = vcombine.low %v991_v58, %v999_v59 }
 0x239   :  { %3969 = vmatpush1.bf16.msra.mxu0 %v7601_v63  ;;  %v7714_v63 = vcombine.high %v991_v58, %v999_v59  ;;  %v7715_v7 = vcombine.low %v992_v60, %v1000_v61  ;;  %v1088_v58 = vld [vmem:[#allocation12 + $0xf18] sm:$0xff] }
 0x23a   :  { %4051 = vmatpush1.bf16.msra.mxu1 %v7603_v1  ;;  %3970 = vmatprep.subr.bf16.mxu0 %v7618_v2  ;;  %v7716_v1 = vcombine.high %v992_v60, %v1000_v61  ;;  %v1007_v2 = vld [vmem:[#allocation12 + $0xc90] sm:$0xff]  ;;  %v1096_v59 = vld [vmem:[#allocation12 + $0xf58] sm:$0xff]  ;;  %v7795_v61 = vcombine.low %v1072_v50, %v1080_v51 }
 0x23b   :  { %4052 = vmatprep.subr.bf16.mxu1 %v7620_v3  ;;  %v1015_v3 = vld [vmem:[#allocation12 + $0xcd0] sm:$0xff] }
 0x23c   :  { %v7729_v14 = vcombine.low %v1007_v2, %v1015_v3 }
 0x23d   :  { %3971 = vmatpush1.bf16.msra.mxu0 %v7617_v31  ;;  %v7730_v31 = vcombine.high %v1007_v2, %v1015_v3  ;;  %v1104_v2 = vld [vmem:[#allocation12 + $0xf98] sm:$0xff] }
 0x23e   :  { %4053 = vmatpush1.bf16.msra.mxu1 %v7619_v8  ;;  %3972 = vmatprep.subr.bf16.mxu0 %v7634_v9  ;;  %v7732_v8 = vcombine.high %v1008_v4, %v1016_v5  ;;  %v1023_v9 = vld [vmem:[#allocation12 + $0xd10] sm:$0xff]  ;;  %v1112_v3 = vld [vmem:[#allocation12 + $0xfd8] sm:$0xff]  ;;  %v7811_v5 = vcombine.low %v1088_v58, %v1096_v59 }
 0x23f   :  { %4054 = vmatprep.subr.bf16.mxu1 %v7636_v11  ;;  %v1031_v11 = vld [vmem:[#allocation12 + $0xd50] sm:$0xff] }
 0x240   :  { %v7745_v28 = vcombine.low %v1023_v9, %v1031_v11 }
 0x241   :  { %3973 = vmatpush1.bf16.msra.mxu0 %v7633_v21  ;;  %v7746_v21 = vcombine.high %v1023_v9, %v1031_v11  ;;  %v610_v9 = vld [vmem:[#allocation12 + $0x28] sm:$0xff] }
 0x242   :  { %4055 = vmatpush1.bf16.msra.mxu1 %v7635_v22  ;;  %3974 = vmatprep.subr.bf16.mxu0 %v7650_v23  ;;  %v7748_v22 = vcombine.high %v1024_v12, %v1032_v13  ;;  %v1039_v23 = vld [vmem:[#allocation12 + $0xd90] sm:$0xff]  ;;  %v618_v11 = vld [vmem:[#allocation12 + $0x68] sm:$0xff]  ;;  %v7827_v13 = vcombine.low %v1104_v2, %v1112_v3 }
 0x243   :  { %4056 = vmatprep.subr.bf16.mxu1 %v7652_v25  ;;  %v1047_v25 = vld [vmem:[#allocation12 + $0xdd0] sm:$0xff] }
 0x244   :  { %v7761_v43 = vcombine.low %v1039_v23, %v1047_v25 }
 0x245   :  { %3975 = vmatpush1.bf16.msra.mxu0 %v7649_v33  ;;  %v7762_v33 = vcombine.high %v1039_v23, %v1047_v25  ;;  %v626_v25 = vld [vmem:[#allocation12 + $0xa8] sm:$0xff] }
 0x246   :  { %4057 = vmatpush1.bf16.msra.mxu1 %v7651_v34  ;;  %3976 = vmatprep.subr.bf16.mxu0 %v7666_v35  ;;  %v7764_v34 = vcombine.high %v1040_v26, %v1048_v27  ;;  %v1055_v35 = vld [vmem:[#allocation12 + $0xe10] sm:$0xff]  ;;  %v634_v26 = vld [vmem:[#allocation12 + $0xe8] sm:$0xff]  ;;  %v7335_v27 = vcombine.low %v610_v9, %v618_v11 }
 0x247   :  { %4058 = vmatprep.subr.bf16.mxu1 %v7668_v36  ;;  %v1063_v36 = vld [vmem:[#allocation12 + $0xe50] sm:$0xff] }
 0x248   :  { %v7777_v52 = vcombine.low %v1055_v35, %v1063_v36 }
 0x249   :  { %3977 = vmatpush1.bf16.msra.mxu0 %v7665_v45  ;;  %v7778_v45 = vcombine.high %v1055_v35, %v1063_v36  ;;  %v642_v35 = vld [vmem:[#allocation12 + $0x128] sm:$0xff] }
 0x24a   :  { %4059 = vmatpush1.bf16.msra.mxu1 %v7667_v46  ;;  %3978 = vmatprep.subr.bf16.mxu0 %v7682_v47  ;;  %v7780_v46 = vcombine.high %v1056_v38, %v1064_v42  ;;  %v1071_v47 = vld [vmem:[#allocation12 + $0xe90] sm:$0xff]  ;;  %v650_v36 = vld [vmem:[#allocation12 + $0x168] sm:$0xff]  ;;  %v7351_v42 = vcombine.low %v626_v25, %v634_v26 }
 0x24b   :  { %4060 = vmatprep.subr.bf16.mxu1 %v7684_v48  ;;  %v1079_v48 = vld [vmem:[#allocation12 + $0xed0] sm:$0xff] }
 0x24c   :  { %v7793_v60 = vcombine.low %v1071_v47, %v1079_v48 }
 0x24d   :  { %3979 = vmatpush1.bf16.msra.mxu0 %v7681_v54  ;;  %v7794_v54 = vcombine.high %v1071_v47, %v1079_v48  ;;  %v658_v47 = vld [vmem:[#allocation12 + $0x1a8] sm:$0xff] }
 0x24e   :  { %4061 = vmatpush1.bf16.msra.mxu1 %v7683_v55  ;;  %3980 = vmatprep.subr.bf16.mxu0 %v7698_v56  ;;  %v7796_v55 = vcombine.high %v1072_v50, %v1080_v51  ;;  %v1087_v56 = vld [vmem:[#allocation12 + $0xf10] sm:$0xff]  ;;  %v666_v48 = vld [vmem:[#allocation12 + $0x1e8] sm:$0xff]  ;;  %v7367_v51 = vcombine.low %v642_v35, %v650_v36 }
 0x24f   :  { %4062 = vmatprep.subr.bf16.mxu1 %v7700_v57  ;;  %v1095_v57 = vld [vmem:[#allocation12 + $0xf50] sm:$0xff] }
 0x250   :  { %v7809_v4 = vcombine.low %v1087_v56, %v1095_v57 }
 0x251   :  { %3981 = vmatpush1.bf16.msra.mxu0 %v7697_v62  ;;  %v7810_v62 = vcombine.high %v1087_v56, %v1095_v57  ;;  %v674_v56 = vld [vmem:[#allocation12 + $0x228] sm:$0xff] }
 0x252   :  { %4063 = vmatpush1.bf16.msra.mxu1 %v7699_v17  ;;  %3982 = vmatprep.subr.bf16.mxu0 %v7714_v63  ;;  %v7812_v17 = vcombine.high %v1088_v58, %v1096_v59  ;;  %v1103_v63 = vld [vmem:[#allocation12 + $0xf90] sm:$0xff]  ;;  %v682_v57 = vld [vmem:[#allocation12 + $0x268] sm:$0xff]  ;;  %v7383_v59 = vcombine.low %v658_v47, %v666_v48 }
 0x253   :  { %4064 = vmatprep.subr.bf16.mxu1 %v7716_v1  ;;  %v1111_v1 = vld [vmem:[#allocation12 + $0xfd0] sm:$0xff] }
 0x254   :  { %v7825_v12 = vcombine.low %v1103_v63, %v1111_v1 }
 0x255   :  { %3983 = vmatpush1.bf16.msra.mxu0 %v7713_v6  ;;  %v7826_v6 = vcombine.high %v1103_v63, %v1111_v1  ;;  %v690_v63 = vld [vmem:[#allocation12 + $0x2a8] sm:$0xff] }
 0x256   :  { %4065 = vmatpush1.bf16.msra.mxu1 %v7715_v7  ;;  %3984 = vmatprep.subr.bf16.mxu0 %v7730_v31  ;;  %v7828_v7 = vcombine.high %v1104_v2, %v1112_v3  ;;  %v609_v31 = vld [vmem:[#allocation12 + $0x20] sm:$0xff]  ;;  %v698_v1 = vld [vmem:[#allocation12 + $0x2e8] sm:$0xff]  ;;  %v7399_v3 = vcombine.low %v674_v56, %v682_v57 }
 0x257   :  { %4066 = vmatprep.subr.bf16.mxu1 %v7732_v8  ;;  %v617_v8 = vld [vmem:[#allocation12 + $0x60] sm:$0xff] }
 0x258   :  { %v7333_v23 = vcombine.low %v609_v31, %v617_v8 }
 0x259   :  { %3985 = vmatpush1.bf16.msra.mxu0 %v7729_v14  ;;  %v7334_v14 = vcombine.high %v609_v31, %v617_v8  ;;  %v706_v31 = vld [vmem:[#allocation12 + $0x328] sm:$0xff] }
 0x25a   :  { %4067 = vmatpush1.bf16.msra.mxu1 %v7731_v19  ;;  %3986 = vmatprep.subr.bf16.mxu0 %v7746_v21  ;;  %v7336_v19 = vcombine.high %v610_v9, %v618_v11  ;;  %v625_v21 = vld [vmem:[#allocation12 + $0xa0] sm:$0xff]  ;;  %v714_v8 = vld [vmem:[#allocation12 + $0x368] sm:$0xff]  ;;  %v7415_v11 = vcombine.low %v690_v63, %v698_v1 }
 0x25b   :  { %4068 = vmatprep.subr.bf16.mxu1 %v7748_v22  ;;  %v633_v22 = vld [vmem:[#allocation12 + $0xe0] sm:$0xff] }
 0x25c   :  { %v7349_v38 = vcombine.low %v625_v21, %v633_v22 }
 0x25d   :  { %3987 = vmatpush1.bf16.msra.mxu0 %v7745_v28  ;;  %v7350_v28 = vcombine.high %v625_v21, %v633_v22  ;;  %v722_v21 = vld [vmem:[#allocation12 + $0x3a8] sm:$0xff] }
 0x25e   :  { %4069 = vmatpush1.bf16.msra.mxu1 %v7747_v29  ;;  %3988 = vmatprep.subr.bf16.mxu0 %v7762_v33  ;;  %v641_v29 = vld [vmem:[#allocation12 + $0x120] sm:$0xff]  ;;  %v730_v22 = vld [vmem:[#allocation12 + $0x3e8] sm:$0xff] }
 0x25f   :  { %4070 = vmatprep.subr.bf16.mxu1 %v7764_v34  ;;  %v649_v33 = vld [vmem:[#allocation12 + $0x160] sm:$0xff]  ;;  %v7352_v34 = vcombine.high %v626_v25, %v634_v26  ;;  %v7431_v25 = vcombine.low %v706_v31, %v714_v8 }
 0x260   :  { %v7365_v50 = vcombine.low %v641_v29, %v649_v33 }
 0x261   :  { %3989 = vmatpush1.bf16.msra.mxu0 %v7761_v43  ;;  %v7366_v43 = vcombine.high %v641_v29, %v649_v33  ;;  %v745_v29 = vld [vmem:[#allocation12 + $0x460] sm:$0xff]  ;;  %v738_v33 = vld [vmem:[#allocation12 + $0x428] sm:$0xff] }
 0x262   :  { %4071 = vmatpush1.bf16.msra.mxu1 %v7763_v44  ;;  %3990 = vmatprep.subr.bf16.mxu0 %v7778_v45  ;;  %v7368_v44 = vcombine.high %v642_v35, %v650_v36  ;;  %v657_v45 = vld [vmem:[#allocation12 + $0x1a0] sm:$0xff]  ;;  %v7447_v36 = vcombine.low %v722_v21, %v730_v22 }
 0x263   :  { %4072 = vmatprep.subr.bf16.mxu1 %v7780_v46  ;;  %v665_v46 = vld [vmem:[#allocation12 + $0x1e0] sm:$0xff] }
 0x264   :  { %v7381_v58 = vcombine.low %v657_v45, %v665_v46 }
 0x265   :  { %3991 = vmatpush1.bf16.msra.mxu0 %v7777_v52  ;;  %v7382_v52 = vcombine.high %v657_v45, %v665_v46  ;;  %v754_v45 = vld [vmem:[#allocation12 + $0x4a8] sm:$0xff] }
 0x266   :  { %4073 = vmatpush1.bf16.msra.mxu1 %v7779_v53  ;;  %3992 = vmatprep.subr.bf16.mxu0 %v7794_v54  ;;  %v7384_v53 = vcombine.high %v658_v47, %v666_v48  ;;  %v673_v54 = vld [vmem:[#allocation12 + $0x220] sm:$0xff]  ;;  %v762_v46 = vld [vmem:[#allocation12 + $0x4e8] sm:$0xff] }
 0x267   :  { %4074 = vmatprep.subr.bf16.mxu1 %v7796_v55  ;;  %v681_v55 = vld [vmem:[#allocation12 + $0x260] sm:$0xff] }
 0x268   :  { %v7397_v2 = vcombine.low %v673_v54, %v681_v55 }
 0x269   :  { %3993 = vmatpush1.bf16.msra.mxu0 %v7793_v60  ;;  %v7398_v60 = vcombine.high %v673_v54, %v681_v55  ;;  %v770_v54 = vld [vmem:[#allocation12 + $0x528] sm:$0xff] }
 0x26a   :  { %4075 = vmatpush1.bf16.msra.mxu1 %v7795_v61  ;;  %3994 = vmatprep.subr.bf16.mxu0 %v7810_v62  ;;  %v7400_v61 = vcombine.high %v674_v56, %v682_v57  ;;  %v689_v62 = vld [vmem:[#allocation12 + $0x2a0] sm:$0xff]  ;;  %v778_v55 = vld [vmem:[#allocation12 + $0x568] sm:$0xff]  ;;  %v7479_v57 = vcombine.low %v754_v45, %v762_v46 }
 0x26b   :  { %4076 = vmatprep.subr.bf16.mxu1 %v7812_v17  ;;  %v697_v17 = vld [vmem:[#allocation12 + $0x2e0] sm:$0xff] }
 0x26c   :  { %v7413_v9 = vcombine.low %v689_v62, %v697_v17 }
 0x26d   :  { %3995 = vmatpush1.bf16.msra.mxu0 %v7809_v4  ;;  %v7414_v4 = vcombine.high %v689_v62, %v697_v17  ;;  %v786_v62 = vld [vmem:[#allocation12 + $0x5a8] sm:$0xff] }
 0x26e   :  { %4077 = vmatpush1.bf16.msra.mxu1 %v7811_v5  ;;  %3996 = vmatprep.subr.bf16.mxu0 %v7826_v6  ;;  %v7416_v5 = vcombine.high %v690_v63, %v698_v1  ;;  %v705_v6 = vld [vmem:[#allocation12 + $0x320] sm:$0xff]  ;;  %v794_v17 = vld [vmem:[#allocation12 + $0x5e8] sm:$0xff]  ;;  %v7495_v1 = vcombine.low %v770_v54, %v778_v55 }
 0x26f   :  { %4078 = vmatprep.subr.bf16.mxu1 %v7828_v7  ;;  %v713_v7 = vld [vmem:[#allocation12 + $0x360] sm:$0xff] }
 0x271   :  { %3997 = vmatpush1.bf16.msra.mxu0 %v7825_v12  ;;  %v7430_v12 = vcombine.high %v705_v6, %v713_v7 }
 0x272   :  { %4079 = vmatpush1.bf16.msra.mxu1 %v7827_v13  ;;  %4089 = vmatprep.subr.bf16.mxu0 %v7334_v14  ;;  %v7432_v13 = vcombine.high %v706_v31, %v714_v8  ;;  %v721_v14 = vld [vmem:[#allocation12 + $0x3a0] sm:$0xff]  ;;  %v7511_v8 = vcombine.low %v786_v62, %v794_v17 }
 0x273   :  { %4171 = vmatprep.subr.bf16.mxu1 %v7336_v19  ;;  %v729_v19 = vld [vmem:[#allocation12 + $0x3e0] sm:$0xff] }
 0x274   :  { %3999 = vmatmul.mubr.bf16.vlgmr.msra.gmra.mrb[12].mxu0 %v9129_v10  ;;  %v7446_v26 = vcombine.high %v721_v14, %v729_v19  ;;  %v7445_v35 = vcombine.low %v721_v14, %v729_v19  ;;  %v818_v14 = vld [vmem:[#allocation12 + $0x6a8] sm:$0xff] }
 0x275   :  { %4081 = vmatmul.mubr.bf16.vlgmr.msra.gmra.mrb[12].mxu1 %v9129_v10  ;;  %4090 = vmatpush1.bf16.msra.mxu0 %v7333_v23  ;;  %v7429_v23 = vcombine.low %v705_v6, %v713_v7  ;;  %v802_v6 = vld [vmem:[#allocation12 + $0x628] sm:$0xff] }
 0x276   :  { %4121 = vmatprep.mubr.bf16.mxu0 %v9103_v39  ;;  %4172 = vmatpush1.bf16.msra.mxu1 %v7335_v27  ;;  %v7448_v27 = vcombine.high %v722_v21, %v730_v22  ;;  %v810_v7 = vld [vmem:[#allocation12 + $0x668] sm:$0xff] }
 0x277   :  { %4203 = vmatprep.mubr.bf16.mxu1 %v9103_v39  ;;  %4091 = vmatprep.subr.bf16.mxu0 %v7350_v28  ;;  %v737_v28 = vld [vmem:[#allocation12 + $0x420] sm:$0xff]  ;;  %v826_v19 = vld [vmem:[#allocation12 + $0x6e8] sm:$0xff]  ;;  %v7527_v22 = vcombine.low %v802_v6, %v810_v7 }
 0x278   :  { %4173 = vmatprep.subr.bf16.mxu1 %v7352_v34  ;;  %v746_v34 = vld [vmem:[#allocation12 + $0x468] sm:$0xff]  ;;  %v7461_v47 = vcombine.low %v737_v28, %v745_v29 }
 0x279   :  { %4092 = vmatpush1.bf16.msra.mxu0 %v7349_v38  ;;  %v7462_v38 = vcombine.high %v737_v28, %v745_v29  ;;  %v7463_v48 = vcombine.low %v738_v33, %v746_v34  ;;  %v834_v28 = vld [vmem:[#allocation12 + $0x728] sm:$0xff] }
 0x27a   :  { %4174 = vmatpush1.bf16.msra.mxu1 %v7351_v42  ;;  %4093 = vmatprep.subr.bf16.mxu0 %v7366_v43  ;;  %v7464_v42 = vcombine.high %v738_v33, %v746_v34  ;;  %v753_v43 = vld [vmem:[#allocation12 + $0x4a0] sm:$0xff]  ;;  %v842_v29 = vld [vmem:[#allocation12 + $0x768] sm:$0xff]  ;;  %v7543_v34 = vcombine.low %v818_v14, %v826_v19 }
 0x27b   :  { %4175 = vmatprep.subr.bf16.mxu1 %v7368_v44  ;;  %v761_v44 = vld [vmem:[#allocation12 + $0x4e0] sm:$0xff] }
 0x27c   :  { %v7477_v56 = vcombine.low %v753_v43, %v761_v44 }
 0x27d   :  { %4094 = vmatpush1.bf16.msra.mxu0 %v7365_v50  ;;  %v7478_v50 = vcombine.high %v753_v43, %v761_v44  ;;  %v850_v43 = vld [vmem:[#allocation12 + $0x7a8] sm:$0xff] }
 0x27e   :  { %4176 = vmatpush1.bf16.msra.mxu1 %v7367_v51  ;;  %4095 = vmatprep.subr.bf16.mxu0 %v7382_v52  ;;  %v7480_v51 = vcombine.high %v754_v45, %v762_v46  ;;  %v769_v52 = vld [vmem:[#allocation12 + $0x520] sm:$0xff]  ;;  %v858_v44 = vld [vmem:[#allocation12 + $0x7e8] sm:$0xff]  ;;  %v7559_v46 = vcombine.low %v834_v28, %v842_v29 }
 0x27f   :  { %4177 = vmatprep.subr.bf16.mxu1 %v7384_v53  ;;  %v777_v53 = vld [vmem:[#allocation12 + $0x560] sm:$0xff] }
 0x280   :  { %v7493_v63 = vcombine.low %v769_v52, %v777_v53 }
 0x281   :  { %4096 = vmatpush1.bf16.msra.mxu0 %v7381_v58  ;;  %v7494_v58 = vcombine.high %v769_v52, %v777_v53  ;;  %v866_v52 = vld [vmem:[#allocation12 + $0x828] sm:$0xff] }
 0x282   :  { %4178 = vmatpush1.bf16.msra.mxu1 %v7383_v59  ;;  %4097 = vmatprep.subr.bf16.mxu0 %v7398_v60  ;;  %v7496_v59 = vcombine.high %v770_v54, %v778_v55  ;;  %v785_v60 = vld [vmem:[#allocation12 + $0x5a0] sm:$0xff]  ;;  %v874_v53 = vld [vmem:[#allocation12 + $0x868] sm:$0xff]  ;;  %v7575_v55 = vcombine.low %v850_v43, %v858_v44 }
 0x283   :  { %4179 = vmatprep.subr.bf16.mxu1 %v7400_v61  ;;  %v793_v61 = vld [vmem:[#allocation12 + $0x5e0] sm:$0xff] }
 0x284   :  { %v7509_v31 = vcombine.low %v785_v60, %v793_v61 }
 0x285   :  { %4098 = vmatpush1.bf16.msra.mxu0 %v7397_v2  ;;  %v7510_v2 = vcombine.high %v785_v60, %v793_v61  ;;  %v882_v61 = vld [vmem:[#allocation12 + $0x8a8] sm:$0xff] }
 0x286   :  { %4180 = vmatpush1.bf16.msra.mxu1 %v7399_v3  ;;  %4099 = vmatprep.subr.bf16.mxu0 %v7414_v4  ;;  %v7512_v3 = vcombine.high %v786_v62, %v794_v17  ;;  %v801_v4 = vld [vmem:[#allocation12 + $0x620] sm:$0xff]  ;;  %v890_v62 = vld [vmem:[#allocation12 + $0x8e8] sm:$0xff]  ;;  %v7591_v17 = vcombine.low %v866_v52, %v874_v53 }
 0x287   :  { %4181 = vmatprep.subr.bf16.mxu1 %v7416_v5  ;;  %v809_v5 = vld [vmem:[#allocation12 + $0x660] sm:$0xff] }
 0x288   :  { %v7525_v21 = vcombine.low %v801_v4, %v809_v5 }
 0x289   :  { %4100 = vmatpush1.bf16.msra.mxu0 %v7413_v9  ;;  %v7526_v9 = vcombine.high %v801_v4, %v809_v5  ;;  %v898_v4 = vld [vmem:[#allocation12 + $0x928] sm:$0xff] }
 0x28a   :  { %4182 = vmatpush1.bf16.msra.mxu1 %v7415_v11  ;;  %4101 = vmatprep.subr.bf16.mxu0 %v7430_v12  ;;  %v7528_v11 = vcombine.high %v802_v6, %v810_v7  ;;  %v817_v12 = vld [vmem:[#allocation12 + $0x6a0] sm:$0xff]  ;;  %v906_v5 = vld [vmem:[#allocation12 + $0x968] sm:$0xff]  ;;  %v7607_v7 = vcombine.low %v882_v61, %v890_v62 }
 0x28b   :  { %4183 = vmatprep.subr.bf16.mxu1 %v7432_v13  ;;  %v825_v13 = vld [vmem:[#allocation12 + $0x6e0] sm:$0xff] }
 0x28c   :  { %v7541_v33 = vcombine.low %v817_v12, %v825_v13 }
 0x28d   :  { %4102 = vmatpush1.bf16.msra.mxu0 %v7429_v23  ;;  %v7542_v23 = vcombine.high %v817_v12, %v825_v13  ;;  %v914_v12 = vld [vmem:[#allocation12 + $0x9a8] sm:$0xff] }
 0x28e   :  { %4184 = vmatpush1.bf16.msra.mxu1 %v7431_v25  ;;  %4103 = vmatprep.subr.bf16.mxu0 %v7446_v26  ;;  %v7544_v25 = vcombine.high %v818_v14, %v826_v19  ;;  %v833_v26 = vld [vmem:[#allocation12 + $0x720] sm:$0xff]  ;;  %v922_v13 = vld [vmem:[#allocation12 + $0x9e8] sm:$0xff]  ;;  %v7623_v19 = vcombine.low %v898_v4, %v906_v5 }
 0x28f   :  { %4185 = vmatprep.subr.bf16.mxu1 %v7448_v27  ;;  %v841_v27 = vld [vmem:[#allocation12 + $0x760] sm:$0xff] }
 0x290   :  { %v7557_v45 = vcombine.low %v833_v26, %v841_v27 }
 0x291   :  { %4104 = vmatpush1.bf16.msra.mxu0 %v7445_v35  ;;  %v7558_v35 = vcombine.high %v833_v26, %v841_v27  ;;  %v930_v26 = vld [vmem:[#allocation12 + $0xa28] sm:$0xff] }
 0x292   :  { %4186 = vmatpush1.bf16.msra.mxu1 %v7447_v36  ;;  %4105 = vmatprep.subr.bf16.mxu0 %v7462_v38  ;;  %v7560_v36 = vcombine.high %v834_v28, %v842_v29  ;;  %v849_v38 = vld [vmem:[#allocation12 + $0x7a0] sm:$0xff]  ;;  %v938_v27 = vld [vmem:[#allocation12 + $0xa68] sm:$0xff]  ;;  %v7639_v29 = vcombine.low %v914_v12, %v922_v13 }
 0x293   :  { %4187 = vmatprep.subr.bf16.mxu1 %v7464_v42  ;;  %v857_v42 = vld [vmem:[#allocation12 + $0x7e0] sm:$0xff] }
 0x294   :  { %v7573_v54 = vcombine.low %v849_v38, %v857_v42 }
 0x295   :  { %4106 = vmatpush1.bf16.msra.mxu0 %v7461_v47  ;;  %v7574_v47 = vcombine.high %v849_v38, %v857_v42  ;;  %v946_v38 = vld [vmem:[#allocation12 + $0xaa8] sm:$0xff] }
 0x296   :  { %4188 = vmatpush1.bf16.msra.mxu1 %v7463_v48  ;;  %4107 = vmatprep.subr.bf16.mxu0 %v7478_v50  ;;  %v7576_v48 = vcombine.high %v850_v43, %v858_v44  ;;  %v865_v50 = vld [vmem:[#allocation12 + $0x820] sm:$0xff]  ;;  %v954_v42 = vld [vmem:[#allocation12 + $0xae8] sm:$0xff]  ;;  %v7655_v44 = vcombine.low %v930_v26, %v938_v27 }
 0x297   :  { %4189 = vmatprep.subr.bf16.mxu1 %v7480_v51  ;;  %v873_v51 = vld [vmem:[#allocation12 + $0x860] sm:$0xff] }
 0x298   :  { %v7589_v60 = vcombine.low %v865_v50, %v873_v51 }
 0x299   :  { %4108 = vmatpush1.bf16.msra.mxu0 %v7477_v56  ;;  %v7590_v56 = vcombine.high %v865_v50, %v873_v51  ;;  %v962_v50 = vld [vmem:[#allocation12 + $0xb28] sm:$0xff] }
 0x29a   :  { %4190 = vmatpush1.bf16.msra.mxu1 %v7479_v57  ;;  %4109 = vmatprep.subr.bf16.mxu0 %v7494_v58  ;;  %v7592_v57 = vcombine.high %v866_v52, %v874_v53  ;;  %v881_v58 = vld [vmem:[#allocation12 + $0x8a0] sm:$0xff]  ;;  %v970_v51 = vld [vmem:[#allocation12 + $0xb68] sm:$0xff]  ;;  %v7671_v53 = vcombine.low %v946_v38, %v954_v42 }
 0x29b   :  { %4191 = vmatprep.subr.bf16.mxu1 %v7496_v59  ;;  %v889_v59 = vld [vmem:[#allocation12 + $0x8e0] sm:$0xff] }
 0x29c   :  { %v7605_v6 = vcombine.low %v881_v58, %v889_v59 }
 0x29d   :  { %4110 = vmatpush1.bf16.msra.mxu0 %v7493_v63  ;;  %v7606_v63 = vcombine.high %v881_v58, %v889_v59  ;;  %v977_v58 = vld [vmem:[#allocation12 + $0xba0] sm:$0xff] }
 0x29e   :  { %4192 = vmatpush1.bf16.msra.mxu1 %v7495_v1  ;;  %4111 = vmatprep.subr.bf16.mxu0 %v7510_v2  ;;  %v897_v1 = vld [vmem:[#allocation12 + $0x920] sm:$0xff] }
 0x29f   :  { %4193 = vmatprep.subr.bf16.mxu1 %v7512_v3  ;;  %v905_v2 = vld [vmem:[#allocation12 + $0x960] sm:$0xff]  ;;  %v7608_v3 = vcombine.high %v882_v61, %v890_v62  ;;  %v978_v62 = vld [vmem:[#allocation12 + $0xba8] sm:$0xff] }
 0x2a0   :  { %v7621_v14 = vcombine.low %v897_v1, %v905_v2  ;;  %v985_v59 = vld [vmem:[#allocation12 + $0xbe0] sm:$0xff] }
 0x2a1   :  { %4112 = vmatpush1.bf16.msra.mxu0 %v7509_v31  ;;  %v7622_v31 = vcombine.high %v897_v1, %v905_v2 }
 0x2a2   :  { %4194 = vmatpush1.bf16.msra.mxu1 %v7511_v8  ;;  %4113 = vmatprep.subr.bf16.mxu0 %v7526_v9  ;;  %v7624_v8 = vcombine.high %v898_v4, %v906_v5  ;;  %v913_v9 = vld [vmem:[#allocation12 + $0x9a0] sm:$0xff]  ;;  %v7687_v5 = vcombine.low %v962_v50, %v970_v51 }
 0x2a3   :  { %4195 = vmatprep.subr.bf16.mxu1 %v7528_v11  ;;  %v921_v11 = vld [vmem:[#allocation12 + $0x9e0] sm:$0xff] }
 0x2a4   :  { %v7637_v28 = vcombine.low %v913_v9, %v921_v11 }
 0x2a5   :  { %4114 = vmatpush1.bf16.msra.mxu0 %v7525_v21  ;;  %v7638_v21 = vcombine.high %v913_v9, %v921_v11  ;;  %v994_v9 = vld [vmem:[#allocation12 + $0xc28] sm:$0xff] }
 0x2a6   :  { %4196 = vmatpush1.bf16.msra.mxu1 %v7527_v22  ;;  %4115 = vmatprep.subr.bf16.mxu0 %v7542_v23  ;;  %v7640_v22 = vcombine.high %v914_v12, %v922_v13  ;;  %v929_v23 = vld [vmem:[#allocation12 + $0xa20] sm:$0xff]  ;;  %v1002_v11 = vld [vmem:[#allocation12 + $0xc68] sm:$0xff]  ;;  %v7701_v12 = vcombine.low %v977_v58, %v985_v59 }
 0x2a7   :  { %4197 = vmatprep.subr.bf16.mxu1 %v7544_v25  ;;  %v937_v25 = vld [vmem:[#allocation12 + $0xa60] sm:$0xff] }
 0x2a8   :  { %v7653_v43 = vcombine.low %v929_v23, %v937_v25 }
 0x2a9   :  { %4116 = vmatpush1.bf16.msra.mxu0 %v7541_v33  ;;  %v7654_v33 = vcombine.high %v929_v23, %v937_v25  ;;  %v1010_v23 = vld [vmem:[#allocation12 + $0xca8] sm:$0xff] }
 0x2aa   :  { %4198 = vmatpush1.bf16.msra.mxu1 %v7543_v34  ;;  %4117 = vmatprep.subr.bf16.mxu0 %v7558_v35  ;;  %v7656_v34 = vcombine.high %v930_v26, %v938_v27  ;;  %v945_v35 = vld [vmem:[#allocation12 + $0xaa0] sm:$0xff]  ;;  %v1018_v25 = vld [vmem:[#allocation12 + $0xce8] sm:$0xff]  ;;  %v7719_v27 = vcombine.low %v994_v9, %v1002_v11 }
 0x2ab   :  { %4199 = vmatprep.subr.bf16.mxu1 %v7560_v36  ;;  %v953_v36 = vld [vmem:[#allocation12 + $0xae0] sm:$0xff] }
 0x2ac   :  { %v7669_v52 = vcombine.low %v945_v35, %v953_v36 }
 0x2ad   :  { %4118 = vmatpush1.bf16.msra.mxu0 %v7557_v45  ;;  %v7670_v45 = vcombine.high %v945_v35, %v953_v36  ;;  %v1026_v35 = vld [vmem:[#allocation12 + $0xd28] sm:$0xff] }
 0x2ae   :  { %4200 = vmatpush1.bf16.msra.mxu1 %v7559_v46  ;;  %4119 = vmatprep.subr.bf16.mxu0 %v7574_v47  ;;  %v7672_v46 = vcombine.high %v946_v38, %v954_v42  ;;  %v961_v47 = vld [vmem:[#allocation12 + $0xb20] sm:$0xff]  ;;  %v1034_v36 = vld [vmem:[#allocation12 + $0xd68] sm:$0xff]  ;;  %v7735_v42 = vcombine.low %v1010_v23, %v1018_v25 }
 0x2af   :  { %4201 = vmatprep.subr.bf16.mxu1 %v7576_v48  ;;  %v969_v48 = vld [vmem:[#allocation12 + $0xb60] sm:$0xff] }
 0x2b0   :  { %v7685_v2 = vcombine.low %v961_v47, %v969_v48 }
 0x2b1   :  { %4120 = vmatpush1.bf16.msra.mxu0 %v7573_v54  ;;  %v7686_v54 = vcombine.high %v961_v47, %v969_v48  ;;  %v1042_v47 = vld [vmem:[#allocation12 + $0xda8] sm:$0xff] }
 0x2b2   :  { %4202 = vmatpush1.bf16.msra.mxu1 %v7575_v55  ;;  %4130 = vmatprep.subr.bf16.mxu0 %v7590_v56  ;;  %v1050_v48 = vld [vmem:[#allocation12 + $0xde8] sm:$0xff] }
 0x2b3   :  { %4212 = vmatprep.subr.bf16.mxu1 %v7592_v57  ;;  %v7688_v57 = vcombine.high %v962_v50, %v970_v51  ;;  %v7751_v51 = vcombine.low %v1026_v35, %v1034_v36 }
 0x2b4   :  { %4122 = vmatmul.mubr.bf16.vlgmr.msra.gmra.mrb[16].mxu0 %v9105_v41 }
 0x2b5   :  { %4204 = vmatmul.mubr.bf16.vlgmr.msra.gmra.mrb[16].mxu1 %v9105_v41  ;;  %4131 = vmatpush1.bf16.msra.mxu0 %v7589_v60 }
 0x2b6   :  { %4162 = vmatprep.mubr.bf16.mxu0 %v9111_v49  ;;  %4213 = vmatpush1.bf16.msra.mxu1 %v7591_v17  ;;  %v986_v17 = vld [vmem:[#allocation12 + $0xbe8] sm:$0xff] }
 0x2b7   :  { %4244 = vmatprep.mubr.bf16.mxu1 %v9111_v49  ;;  %4132 = vmatprep.subr.bf16.mxu0 %v7606_v63  ;;  %v7703_v13 = vcombine.low %v978_v62, %v986_v17 }
 0x2b8   :  { %4214 = vmatprep.subr.bf16.mxu1 %v7608_v3 }
 0x2b9   :  { %4133 = vmatpush1.bf16.msra.mxu0 %v7605_v6  ;;  %v7702_v6 = vcombine.high %v977_v58, %v985_v59  ;;  %v1058_v58 = vld [vmem:[#allocation12 + $0xe28] sm:$0xff] }
 0x2ba   :  { %4215 = vmatpush1.bf16.msra.mxu1 %v7607_v7  ;;  %4134 = vmatprep.subr.bf16.mxu0 %v7622_v31  ;;  %v7704_v7 = vcombine.high %v978_v62, %v986_v17  ;;  %v993_v31 = vld [vmem:[#allocation12 + $0xc20] sm:$0xff]  ;;  %v1066_v59 = vld [vmem:[#allocation12 + $0xe68] sm:$0xff]  ;;  %v7767_v17 = vcombine.low %v1042_v47, %v1050_v48 }
 0x2bb   :  { %4216 = vmatprep.subr.bf16.mxu1 %v7624_v8  ;;  %v1001_v8 = vld [vmem:[#allocation12 + $0xc60] sm:$0xff] }
 0x2bc   :  { %v7717_v26 = vcombine.low %v993_v31, %v1001_v8 }
 0x2bd   :  { %4135 = vmatpush1.bf16.msra.mxu0 %v7621_v14  ;;  %v7718_v14 = vcombine.high %v993_v31, %v1001_v8 }
 0x2be   :  { %4217 = vmatpush1.bf16.msra.mxu1 %v7623_v19  ;;  %4136 = vmatprep.subr.bf16.mxu0 %v7638_v21  ;;  %v7720_v19 = vcombine.high %v994_v9, %v1002_v11  ;;  %v1009_v21 = vld [vmem:[#allocation12 + $0xca0] sm:$0xff] }
 0x2bf   :  { %4218 = vmatprep.subr.bf16.mxu1 %v7640_v22  ;;  %v1017_v22 = vld [vmem:[#allocation12 + $0xce0] sm:$0xff] }
 0x2c0   :  { %v7733_v38 = vcombine.low %v1009_v21, %v1017_v22  ;;  %v1089_v9 = vld [vmem:[#allocation12 + $0xf20] sm:$0xff] }
 0x2c1   :  { %4137 = vmatpush1.bf16.msra.mxu0 %v7637_v28  ;;  %v7734_v28 = vcombine.high %v1009_v21, %v1017_v22  ;;  %v1097_v11 = vld [vmem:[#allocation12 + $0xf60] sm:$0xff] }
 0x2c2   :  { %4219 = vmatpush1.bf16.msra.mxu1 %v7639_v29  ;;  %4138 = vmatprep.subr.bf16.mxu0 %v7654_v33  ;;  %v7736_v29 = vcombine.high %v1010_v23, %v1018_v25  ;;  %v1025_v33 = vld [vmem:[#allocation12 + $0xd20] sm:$0xff]  ;;  %v7814_v21 = vcombine.high %v1089_v9, %v1097_v11 }
 0x2c3   :  { %4220 = vmatprep.subr.bf16.mxu1 %v7656_v34  ;;  %v1033_v34 = vld [vmem:[#allocation12 + $0xd60] sm:$0xff] }
 0x2c4   :  { %v7749_v50 = vcombine.low %v1025_v33, %v1033_v34  ;;  %v1105_v23 = vld [vmem:[#allocation12 + $0xfa0] sm:$0xff] }
 0x2c5   :  { %4139 = vmatpush1.bf16.msra.mxu0 %v7653_v43  ;;  %v7750_v43 = vcombine.high %v1025_v33, %v1033_v34  ;;  %v1113_v25 = vld [vmem:[#allocation12 + $0xfe0] sm:$0xff] }
 0x2c6   :  { %4221 = vmatpush1.bf16.msra.mxu1 %v7655_v44  ;;  %4140 = vmatprep.subr.bf16.mxu0 %v7670_v45  ;;  %v7752_v44 = vcombine.high %v1026_v35, %v1034_v36  ;;  %v1041_v45 = vld [vmem:[#allocation12 + $0xda0] sm:$0xff]  ;;  %v7830_v33 = vcombine.high %v1105_v23, %v1113_v25  ;;  %v611_v35 = vld [vmem:[#allocation12 + $0x30] sm:$0xff] }
 0x2c7   :  { %v9147_v55 = vpop.f32.mrb[8].mxu0  ;;  %v9149_v56 = vpop.f32.mrb[8].mxu1  ;;  %4222 = vmatprep.subr.bf16.mxu1 %v7672_v46  ;;  %v1049_v46 = vld [vmem:[#allocation12 + $0xde0] sm:$0xff]  ;;  %v619_v36 = vld [vmem:[#allocation12 + $0x70] sm:$0xff] }
 0x2c8   :  { %v9151_v60 = vpop.f32.mrb[9].mxu0  ;;  %v9153_v61 = vpop.f32.mrb[9].mxu1  ;;  %v7765_v62 = vcombine.low %v1041_v45, %v1049_v46 }
 0x2c9   :  { %v3840_v63 = vpop.f32.mrb[10].mxu0  ;;  %v3922_v1 = vpop.f32.mrb[10].mxu1  ;;  %4141 = vmatpush1.bf16.msra.mxu0 %v7669_v52  ;;  %v7766_v52 = vcombine.high %v1041_v45, %v1049_v46  ;;  %v7338_v45 = vcombine.high %v611_v35, %v619_v36 }
 0x2ca   :  { %4223 = vmatpush1.bf16.msra.mxu1 %v7671_v53  ;;  %v3841_v3 = vpop.f32.mrb[11].mxu0  ;;  %v3923_v4 = vpop.f32.mrb[11].mxu1  ;;  %4142 = vmatprep.subr.bf16.mxu0 %v7686_v54  ;;  %v7768_v53 = vcombine.high %v1042_v47, %v1050_v48  ;;  %v1057_v54 = vld [vmem:[#allocation12 + $0xe20] sm:$0xff]  ;;  %v7784_v1 = vcombine.high %v1058_v58, %v1066_v59  ;;  %v627_v47 = vld [vmem:[#allocation12 + $0xb0] sm:$0xff] }
 0x2cb   :  { %4224 = vmatprep.subr.bf16.mxu1 %v7688_v57  ;;  %v1065_v57 = vld [vmem:[#allocation12 + $0xe60] sm:$0xff]  ;;  %v1074_v4 = vld [vmem:[#allocation12 + $0xea8] sm:$0xff]  ;;  %v635_v48 = vld [vmem:[#allocation12 + $0xf0] sm:$0xff] }
 0x2cc   :  { %v7782_v63 = vcombine.high %v1057_v54, %v1065_v57  ;;  %v1081_v3 = vld [vmem:[#allocation12 + $0xee0] sm:$0xff] }
 0x2cd   :  { %4143 = vmatpush1.bf16.msra.mxu0 %v7685_v2  ;;  %v1073_v2 = vld [vmem:[#allocation12 + $0xea0] sm:$0xff] }
 0x2ce   :  { %4225 = vmatpush1.bf16.msra.mxu1 %v7687_v5  ;;  %4144 = vmatprep.subr.bf16.mxu0 %v7702_v6  ;;  %v1082_v5 = vld [vmem:[#allocation12 + $0xee8] sm:$0xff]  ;;  %v7781_v6 = vcombine.low %v1057_v54, %v1065_v57  ;;  %v7798_v31 = vcombine.high %v1073_v2, %v1081_v3  ;;  %v7354_v54 = vcombine.high %v627_v47, %v635_v48  ;;  %v643_v57 = vld [vmem:[#allocation12 + $0x130] sm:$0xff] }
 0x2cf   :  { %4226 = vmatprep.subr.bf16.mxu1 %v7704_v7  ;;  %v7783_v7 = vcombine.low %v1058_v58, %v1066_v59  ;;  %v7800_v8 = vcombine.high %v1074_v4, %v1082_v5  ;;  %v651_v58 = vld [vmem:[#allocation12 + $0x170] sm:$0xff] }
 0x2d1   :  { %4145 = vmatpush1.bf16.msra.mxu0 %v7701_v12  ;;  %v1090_v12 = vld [vmem:[#allocation12 + $0xf28] sm:$0xff] }
 0x2d2   :  { %4227 = vmatpush1.bf16.msra.mxu1 %v7703_v13  ;;  %4146 = vmatprep.subr.bf16.mxu0 %v7718_v14  ;;  %v1098_v13 = vld [vmem:[#allocation12 + $0xf68] sm:$0xff]  ;;  %v7797_v14 = vcombine.low %v1073_v2, %v1081_v3  ;;  %v7370_v2 = vcombine.high %v643_v57, %v651_v58 }
 0x2d3   :  { %4228 = vmatprep.subr.bf16.mxu1 %v7720_v19  ;;  %v7799_v19 = vcombine.low %v1074_v4, %v1082_v5  ;;  %v7816_v22 = vcombine.high %v1090_v12, %v1098_v13  ;;  %v659_v4 = vld [vmem:[#allocation12 + $0x1b0] sm:$0xff] }
 0x2d4   :  { %v667_v5 = vld [vmem:[#allocation12 + $0x1f0] sm:$0xff] }
 0x2d5   :  { %4147 = vmatpush1.bf16.msra.mxu0 %v7717_v26  ;;  %v1106_v26 = vld [vmem:[#allocation12 + $0xfa8] sm:$0xff] }
 0x2d6   :  { %4229 = vmatpush1.bf16.msra.mxu1 %v7719_v27  ;;  %4148 = vmatprep.subr.bf16.mxu0 %v7734_v28  ;;  %v1114_v27 = vld [vmem:[#allocation12 + $0xfe8] sm:$0xff]  ;;  %v7813_v28 = vcombine.low %v1089_v9, %v1097_v11  ;;  %v7386_v9 = vcombine.high %v659_v4, %v667_v5 }
 0x2d7   :  { %4230 = vmatprep.subr.bf16.mxu1 %v7736_v29  ;;  %v7815_v29 = vcombine.low %v1090_v12, %v1098_v13  ;;  %v7832_v34 = vcombine.high %v1106_v26, %v1114_v27  ;;  %v675_v12 = vld [vmem:[#allocation12 + $0x230] sm:$0xff] }
 0x2d8   :  { %v683_v13 = vld [vmem:[#allocation12 + $0x270] sm:$0xff] }
 0x2d9   :  { %4149 = vmatpush1.bf16.msra.mxu0 %v7733_v38  ;;  %v612_v38 = vld [vmem:[#allocation12 + $0x38] sm:$0xff] }
 0x2da   :  { %4231 = vmatpush1.bf16.msra.mxu1 %v7735_v42  ;;  %4150 = vmatprep.subr.bf16.mxu0 %v7750_v43  ;;  %v620_v42 = vld [vmem:[#allocation12 + $0x78] sm:$0xff]  ;;  %v7829_v43 = vcombine.low %v1105_v23, %v1113_v25  ;;  %v691_v25 = vld [vmem:[#allocation12 + $0x2b0] sm:$0xff] }
 0x2db   :  { %4232 = vmatprep.subr.bf16.mxu1 %v7752_v44  ;;  %v7831_v44 = vcombine.low %v1106_v26, %v1114_v27  ;;  %v7340_v46 = vcombine.high %v612_v38, %v620_v42  ;;  %v699_v26 = vld [vmem:[#allocation12 + $0x2f0] sm:$0xff]  ;;  %v692_v27 = vld [vmem:[#allocation12 + $0x2b8] sm:$0xff] }
 0x2dd   :  { %4151 = vmatpush1.bf16.msra.mxu0 %v7749_v50  ;;  %v7337_v50 = vcombine.low %v611_v35, %v619_v36  ;;  %v707_v36 = vld [vmem:[#allocation12 + $0x330] sm:$0xff] }
 0x2de   :  { %4233 = vmatpush1.bf16.msra.mxu1 %v7751_v51  ;;  %4152 = vmatprep.subr.bf16.mxu0 %v7766_v52  ;;  %v628_v51 = vld [vmem:[#allocation12 + $0xb8] sm:$0xff] }
 0x2df   :  { %4234 = vmatprep.subr.bf16.mxu1 %v7768_v53  ;;  %v636_v52 = vld [vmem:[#allocation12 + $0xf8] sm:$0xff]  ;;  %v7339_v53 = vcombine.low %v612_v38, %v620_v42  ;;  %v715_v38 = vld [vmem:[#allocation12 + $0x370] sm:$0xff] }
 0x2e0   :  { %v7356_v59 = vcombine.high %v628_v51, %v636_v52  ;;  %v708_v42 = vld [vmem:[#allocation12 + $0x338] sm:$0xff] }
 0x2e1   :  { %4153 = vmatpush1.bf16.msra.mxu0 %v7765_v62  ;;  %v644_v62 = vld [vmem:[#allocation12 + $0x138] sm:$0xff] }
 0x2e2   :  { %4235 = vmatpush1.bf16.msra.mxu1 %v7767_v17  ;;  %4154 = vmatprep.subr.bf16.mxu0 %v7782_v63  ;;  %v652_v17 = vld [vmem:[#allocation12 + $0x178] sm:$0xff]  ;;  %v7353_v63 = vcombine.low %v627_v47, %v635_v48  ;;  %v723_v48 = vld [vmem:[#allocation12 + $0x3b0] sm:$0xff] }
 0x2e3   :  { %4236 = vmatprep.subr.bf16.mxu1 %v7784_v1  ;;  %v7355_v1 = vcombine.low %v628_v51, %v636_v52  ;;  %v7372_v3 = vcombine.high %v644_v62, %v652_v17  ;;  %v724_v51 = vld [vmem:[#allocation12 + $0x3b8] sm:$0xff] }
 0x2e4   :  { %v732_v52 = vld [vmem:[#allocation12 + $0x3f8] sm:$0xff] }
 0x2e5   :  { %4155 = vmatpush1.bf16.msra.mxu0 %v7781_v6  ;;  %v660_v6 = vld [vmem:[#allocation12 + $0x1b8] sm:$0xff] }
 0x2e6   :  { %4237 = vmatpush1.bf16.msra.mxu1 %v7783_v7  ;;  %4156 = vmatprep.subr.bf16.mxu0 %v7798_v31  ;;  %v668_v7 = vld [vmem:[#allocation12 + $0x1f8] sm:$0xff]  ;;  %v7369_v31 = vcombine.low %v643_v57, %v651_v58  ;;  %v7452_v58 = vcombine.high %v724_v51, %v732_v52 }
 0x2e7   :  { %4238 = vmatprep.subr.bf16.mxu1 %v7800_v8  ;;  %v7371_v8 = vcombine.low %v644_v62, %v652_v17  ;;  %v7388_v11 = vcombine.high %v660_v6, %v668_v7  ;;  %v747_v62 = vld [vmem:[#allocation12 + $0x470] sm:$0xff]  ;;  %v740_v17 = vld [vmem:[#allocation12 + $0x438] sm:$0xff] }
 0x2e9   :  { %4157 = vmatpush1.bf16.msra.mxu0 %v7797_v14  ;;  %v676_v14 = vld [vmem:[#allocation12 + $0x238] sm:$0xff] }
 0x2ea   :  { %4239 = vmatpush1.bf16.msra.mxu1 %v7799_v19  ;;  %4158 = vmatprep.subr.bf16.mxu0 %v7814_v21  ;;  %v684_v19 = vld [vmem:[#allocation12 + $0x278] sm:$0xff]  ;;  %v7387_v21 = vcombine.low %v660_v6, %v668_v7  ;;  %v763_v6 = vld [vmem:[#allocation12 + $0x4f0] sm:$0xff] }
 0x2eb   :  { %4240 = vmatprep.subr.bf16.mxu1 %v7816_v22  ;;  %v7402_v22 = vcombine.high %v675_v12, %v683_v13  ;;  %v7404_v23 = vcombine.high %v676_v14, %v684_v19  ;;  %v756_v7 = vld [vmem:[#allocation12 + $0x4b8] sm:$0xff] }
 0x2ed   :  { %4159 = vmatpush1.bf16.msra.mxu0 %v7813_v28  ;;  %v700_v28 = vld [vmem:[#allocation12 + $0x2f8] sm:$0xff] }
 0x2ee   :  { %4241 = vmatpush1.bf16.msra.mxu1 %v7815_v29  ;;  %4160 = vmatprep.subr.bf16.mxu0 %v7830_v33  ;;  %v7401_v29 = vcombine.low %v675_v12, %v683_v13  ;;  %v7403_v33 = vcombine.low %v676_v14, %v684_v19  ;;  %v7420_v35 = vcombine.high %v692_v27, %v700_v28  ;;  %v771_v13 = vld [vmem:[#allocation12 + $0x530] sm:$0xff]  ;;  %v772_v19 = vld [vmem:[#allocation12 + $0x538] sm:$0xff] }
 0x2ef   :  { %4242 = vmatprep.subr.bf16.mxu1 %v7832_v34  ;;  %v7418_v34 = vcombine.high %v691_v25, %v699_v26  ;;  %v779_v14 = vld [vmem:[#allocation12 + $0x570] sm:$0xff] }
 0x2f1   :  { %4161 = vmatpush1.bf16.msra.mxu0 %v7829_v43  ;;  %v716_v43 = vld [vmem:[#allocation12 + $0x378] sm:$0xff] }
 0x2f2   :  { %4243 = vmatpush1.bf16.msra.mxu1 %v7831_v44  ;;  %4253 = vmatprep.subr.bf16.mxu0 %v7338_v45  ;;  %v7417_v44 = vcombine.low %v691_v25, %v699_v26  ;;  %v7419_v45 = vcombine.low %v692_v27, %v700_v28  ;;  %v7436_v47 = vcombine.high %v708_v42, %v716_v43  ;;  %v787_v26 = vld [vmem:[#allocation12 + $0x5b0] sm:$0xff]  ;;  %v788_v28 = vld [vmem:[#allocation12 + $0x5b8] sm:$0xff] }
 0x2f3   :  { %4335 = vmatprep.subr.bf16.mxu1 %v7340_v46  ;;  %v7434_v46 = vcombine.high %v707_v36, %v715_v38  ;;  %v795_v27 = vld [vmem:[#allocation12 + $0x5f0] sm:$0xff] }
 0x2f4   :  { %4163 = vmatmul.mubr.bf16.vlgmr.msra.gmra.mrb[16].mxu0 %v9129_v10 }
 0x2f5   :  { %4245 = vmatmul.mubr.bf16.vlgmr.msra.gmra.mrb[16].mxu1 %v9129_v10  ;;  %4254 = vmatpush1.bf16.msra.mxu0 %v7337_v50  ;;  %v731_v50 = vld [vmem:[#allocation12 + $0x3f0] sm:$0xff] }
 0x2f6   :  { %4285 = vmatprep.mubr.bf16.mxu0 %v9103_v39  ;;  %4336 = vmatpush1.bf16.msra.mxu1 %v7339_v53  ;;  %v7433_v53 = vcombine.low %v707_v36, %v715_v38  ;;  %v7450_v57 = vcombine.high %v723_v48, %v731_v50  ;;  %v803_v38 = vld [vmem:[#allocation12 + $0x630] sm:$0xff] }
 0x2f7   :  { %4367 = vmatprep.mubr.bf16.mxu1 %v9103_v39  ;;  %4255 = vmatprep.subr.bf16.mxu0 %v7354_v54  ;;  %v7385_v39 = vcombine.low %v659_v4, %v667_v5  ;;  %v7435_v54 = vcombine.low %v708_v42, %v716_v43  ;;  %v755_v5 = vld [vmem:[#allocation12 + $0x4b0] sm:$0xff]  ;;  %v804_v43 = vld [vmem:[#allocation12 + $0x638] sm:$0xff] }
 0x2f8   :  { %4337 = vmatprep.subr.bf16.mxu1 %v7356_v59  ;;  %v739_v59 = vld [vmem:[#allocation12 + $0x430] sm:$0xff] }
 0x2f9   :  { %4256 = vmatpush1.bf16.msra.mxu0 %v7353_v63  ;;  %v748_v63 = vld [vmem:[#allocation12 + $0x478] sm:$0xff]  ;;  %v811_v42 = vld [vmem:[#allocation12 + $0x670] sm:$0xff] }
 0x2fa   :  { %4338 = vmatpush1.bf16.msra.mxu1 %v7355_v1  ;;  %4257 = vmatprep.subr.bf16.mxu0 %v7370_v2  ;;  %v7449_v1 = vcombine.low %v723_v48, %v731_v50  ;;  %v7451_v2 = vcombine.low %v724_v51, %v732_v52  ;;  %v7468_v4 = vcombine.high %v740_v17, %v748_v63  ;;  %v819_v50 = vld [vmem:[#allocation12 + $0x6b0] sm:$0xff]  ;;  %v820_v52 = vld [vmem:[#allocation12 + $0x6b8] sm:$0xff] }
 0x2fb   :  { %4339 = vmatprep.subr.bf16.mxu1 %v7372_v3  ;;  %v7466_v3 = vcombine.high %v739_v59, %v747_v62  ;;  %v827_v51 = vld [vmem:[#allocation12 + $0x6f0] sm:$0xff] }
 0x2fd   :  { %4258 = vmatpush1.bf16.msra.mxu0 %v7369_v31  ;;  %v764_v31 = vld [vmem:[#allocation12 + $0x4f8] sm:$0xff] }
 0x2fe   :  { %4340 = vmatpush1.bf16.msra.mxu1 %v7371_v8  ;;  %4259 = vmatprep.subr.bf16.mxu0 %v7386_v9  ;;  %v7465_v8 = vcombine.low %v739_v59, %v747_v62  ;;  %v7467_v9 = vcombine.low %v740_v17, %v748_v63  ;;  %v7484_v12 = vcombine.high %v756_v7, %v764_v31  ;;  %v835_v62 = vld [vmem:[#allocation12 + $0x730] sm:$0xff]  ;;  %v836_v63 = vld [vmem:[#allocation12 + $0x738] sm:$0xff] }
 0x2ff   :  { %4341 = vmatprep.subr.bf16.mxu1 %v7388_v11  ;;  %v7482_v11 = vcombine.high %v755_v5, %v763_v6  ;;  %v843_v17 = vld [vmem:[#allocation12 + $0x770] sm:$0xff] }
 0x301   :  { %4260 = vmatpush1.bf16.msra.mxu0 %v7385_v39  ;;  %v780_v39 = vld [vmem:[#allocation12 + $0x578] sm:$0xff] }
 0x302   :  { %4342 = vmatpush1.bf16.msra.mxu1 %v7387_v21  ;;  %4261 = vmatprep.subr.bf16.mxu0 %v7402_v22  ;;  %v7481_v21 = vcombine.low %v755_v5, %v763_v6  ;;  %v7483_v22 = vcombine.low %v756_v7, %v764_v31  ;;  %v7500_v25 = vcombine.high %v772_v19, %v780_v39  ;;  %v851_v6 = vld [vmem:[#allocation12 + $0x7b0] sm:$0xff]  ;;  %v852_v31 = vld [vmem:[#allocation12 + $0x7b8] sm:$0xff] }
 0x303   :  { %4343 = vmatprep.subr.bf16.mxu1 %v7404_v23  ;;  %v7498_v23 = vcombine.high %v771_v13, %v779_v14  ;;  %v859_v7 = vld [vmem:[#allocation12 + $0x7f0] sm:$0xff] }
 0x305   :  { %4262 = vmatpush1.bf16.msra.mxu0 %v7401_v29  ;;  %v796_v29 = vld [vmem:[#allocation12 + $0x5f8] sm:$0xff] }
 0x306   :  { %4344 = vmatpush1.bf16.msra.mxu1 %v7403_v33  ;;  %4263 = vmatprep.subr.bf16.mxu0 %v7418_v34  ;;  %v7497_v33 = vcombine.low %v771_v13, %v779_v14  ;;  %v7499_v34 = vcombine.low %v772_v19, %v780_v39  ;;  %v7516_v36 = vcombine.high %v788_v28, %v796_v29  ;;  %v867_v14 = vld [vmem:[#allocation12 + $0x830] sm:$0xff]  ;;  %v868_v39 = vld [vmem:[#allocation12 + $0x838] sm:$0xff] }
 0x307   :  { %4345 = vmatprep.subr.bf16.mxu1 %v7420_v35  ;;  %v7514_v35 = vcombine.high %v787_v26, %v795_v27  ;;  %v875_v19 = vld [vmem:[#allocation12 + $0x870] sm:$0xff] }
 0x309   :  { %4264 = vmatpush1.bf16.msra.mxu0 %v7417_v44  ;;  %v812_v44 = vld [vmem:[#allocation12 + $0x678] sm:$0xff] }
 0x30a   :  { %4346 = vmatpush1.bf16.msra.mxu1 %v7419_v45  ;;  %4265 = vmatprep.subr.bf16.mxu0 %v7434_v46  ;;  %v7513_v45 = vcombine.low %v787_v26, %v795_v27  ;;  %v7515_v46 = vcombine.low %v788_v28, %v796_v29  ;;  %v7532_v48 = vcombine.high %v804_v43, %v812_v44  ;;  %v883_v27 = vld [vmem:[#allocation12 + $0x8b0] sm:$0xff] }
 0x30b   :  { %4347 = vmatprep.subr.bf16.mxu1 %v7436_v47  ;;  %v7530_v47 = vcombine.high %v803_v38, %v811_v42  ;;  %v891_v28 = vld [vmem:[#allocation12 + $0x8f0] sm:$0xff]  ;;  %v7593_v29 = vcombine.low %v867_v14, %v875_v19 }
 0x30d   :  { %4266 = vmatpush1.bf16.msra.mxu0 %v7433_v53  ;;  %v828_v53 = vld [vmem:[#allocation12 + $0x6f8] sm:$0xff] }
 0x30e   :  { %4348 = vmatpush1.bf16.msra.mxu1 %v7435_v54  ;;  %4267 = vmatprep.subr.bf16.mxu0 %v7450_v57  ;;  %v7529_v54 = vcombine.low %v803_v38, %v811_v42  ;;  %v7531_v57 = vcombine.low %v804_v43, %v812_v44  ;;  %v7548_v59 = vcombine.high %v820_v52, %v828_v53  ;;  %v899_v38 = vld [vmem:[#allocation12 + $0x930] sm:$0xff]  ;;  %v900_v44 = vld [vmem:[#allocation12 + $0x938] sm:$0xff] }
 0x30f   :  { %4349 = vmatprep.subr.bf16.mxu1 %v7452_v58  ;;  %v7546_v58 = vcombine.high %v819_v50, %v827_v51  ;;  %v907_v42 = vld [vmem:[#allocation12 + $0x970] sm:$0xff] }
 0x311   :  { %4268 = vmatpush1.bf16.msra.mxu0 %v7449_v1  ;;  %v844_v1 = vld [vmem:[#allocation12 + $0x778] sm:$0xff] }
 0x312   :  { %4350 = vmatpush1.bf16.msra.mxu1 %v7451_v2  ;;  %4269 = vmatprep.subr.bf16.mxu0 %v7466_v3  ;;  %v7545_v2 = vcombine.low %v819_v50, %v827_v51  ;;  %v7547_v3 = vcombine.low %v820_v52, %v828_v53  ;;  %v7564_v5 = vcombine.high %v836_v63, %v844_v1  ;;  %v915_v51 = vld [vmem:[#allocation12 + $0x9b0] sm:$0xff]  ;;  %v916_v53 = vld [vmem:[#allocation12 + $0x9b8] sm:$0xff] }
 0x313   :  { %4351 = vmatprep.subr.bf16.mxu1 %v7468_v4  ;;  %v7562_v4 = vcombine.high %v835_v62, %v843_v17  ;;  %v923_v52 = vld [vmem:[#allocation12 + $0x9f0] sm:$0xff] }
 0x315   :  { %4270 = vmatpush1.bf16.msra.mxu0 %v7465_v8  ;;  %v860_v8 = vld [vmem:[#allocation12 + $0x7f8] sm:$0xff] }
 0x316   :  { %4352 = vmatpush1.bf16.msra.mxu1 %v7467_v9  ;;  %4271 = vmatprep.subr.bf16.mxu0 %v7482_v11  ;;  %v7561_v9 = vcombine.low %v835_v62, %v843_v17  ;;  %v7563_v11 = vcombine.low %v836_v63, %v844_v1  ;;  %v7580_v13 = vcombine.high %v852_v31, %v860_v8  ;;  %v931_v62 = vld [vmem:[#allocation12 + $0xa30] sm:$0xff]  ;;  %v932_v63 = vld [vmem:[#allocation12 + $0xa38] sm:$0xff] }
 0x317   :  { %4353 = vmatprep.subr.bf16.mxu1 %v7484_v12  ;;  %v7578_v12 = vcombine.high %v851_v6, %v859_v7  ;;  %v939_v17 = vld [vmem:[#allocation12 + $0xa70] sm:$0xff]  ;;  %v940_v1 = vld [vmem:[#allocation12 + $0xa78] sm:$0xff] }
 0x319   :  { %4272 = vmatpush1.bf16.msra.mxu0 %v7481_v21  ;;  %v876_v21 = vld [vmem:[#allocation12 + $0x878] sm:$0xff] }
 0x31a   :  { %4354 = vmatpush1.bf16.msra.mxu1 %v7483_v22  ;;  %4273 = vmatprep.subr.bf16.mxu0 %v7498_v23  ;;  %v7577_v22 = vcombine.low %v851_v6, %v859_v7  ;;  %v7579_v23 = vcombine.low %v852_v31, %v860_v8  ;;  %v7596_v26 = vcombine.high %v868_v39, %v876_v21  ;;  %v955_v6 = vld [vmem:[#allocation12 + $0xaf0] sm:$0xff]  ;;  %v948_v7 = vld [vmem:[#allocation12 + $0xab8] sm:$0xff] }
 0x31b   :  { %4355 = vmatprep.subr.bf16.mxu1 %v7500_v25  ;;  %v7594_v25 = vcombine.high %v867_v14, %v875_v19  ;;  %v956_v31 = vld [vmem:[#allocation12 + $0xaf8] sm:$0xff]  ;;  %v7657_v8 = vcombine.low %v931_v62, %v939_v17  ;;  %v971_v14 = vld [vmem:[#allocation12 + $0xb70] sm:$0xff] }
 0x31c   :  { %v964_v19 = vld [vmem:[#allocation12 + $0xb38] sm:$0xff] }
 0x31d   :  { %4274 = vmatpush1.bf16.msra.mxu0 %v7497_v33  ;;  %v884_v33 = vld [vmem:[#allocation12 + $0x8b8] sm:$0xff] }
 0x31e   :  { %4356 = vmatpush1.bf16.msra.mxu1 %v7499_v34  ;;  %4275 = vmatprep.subr.bf16.mxu0 %v7514_v35  ;;  %v892_v34 = vld [vmem:[#allocation12 + $0x8f8] sm:$0xff]  ;;  %v7595_v35 = vcombine.low %v868_v39, %v876_v21 }
 0x31f   :  { %4357 = vmatprep.subr.bf16.mxu1 %v7516_v36  ;;  %v7610_v36 = vcombine.high %v883_v27, %v891_v28  ;;  %v7612_v43 = vcombine.high %v884_v33, %v892_v34  ;;  %v972_v39 = vld [vmem:[#allocation12 + $0xb78] sm:$0xff] }
 0x321   :  { %4276 = vmatpush1.bf16.msra.mxu0 %v7513_v45  ;;  %v908_v45 = vld [vmem:[#allocation12 + $0x978] sm:$0xff] }
 0x322   :  { %4358 = vmatpush1.bf16.msra.mxu1 %v7515_v46  ;;  %4277 = vmatprep.subr.bf16.mxu0 %v7530_v47  ;;  %v7609_v46 = vcombine.low %v883_v27, %v891_v28  ;;  %v7611_v47 = vcombine.low %v884_v33, %v892_v34  ;;  %v7628_v50 = vcombine.high %v900_v44, %v908_v45  ;;  %v979_v27 = vld [vmem:[#allocation12 + $0xbb0] sm:$0xff]  ;;  %v980_v34 = vld [vmem:[#allocation12 + $0xbb8] sm:$0xff] }
 0x323   :  { %4359 = vmatprep.subr.bf16.mxu1 %v7532_v48  ;;  %v7626_v48 = vcombine.high %v899_v38, %v907_v42  ;;  %v987_v28 = vld [vmem:[#allocation12 + $0xbf0] sm:$0xff] }
 0x325   :  { %4278 = vmatpush1.bf16.msra.mxu0 %v7529_v54  ;;  %v924_v54 = vld [vmem:[#allocation12 + $0x9f8] sm:$0xff] }
 0x326   :  { %4360 = vmatpush1.bf16.msra.mxu1 %v7531_v57  ;;  %4279 = vmatprep.subr.bf16.mxu0 %v7546_v58  ;;  %v7625_v57 = vcombine.low %v899_v38, %v907_v42  ;;  %v7642_v58 = vcombine.high %v915_v51, %v923_v52 }
 0x327   :  { %4361 = vmatprep.subr.bf16.mxu1 %v7548_v59  ;;  %v7644_v59 = vcombine.high %v916_v53, %v924_v54 }
 0x329   :  { %4280 = vmatpush1.bf16.msra.mxu0 %v7545_v2  ;;  %v7643_v2 = vcombine.low %v916_v53, %v924_v54  ;;  %v1004_v53 = vld [vmem:[#allocation12 + $0xc78] sm:$0xff]  ;;  %v7705_v54 = vcombine.low %v979_v27, %v987_v28 }
 0x32a   :  { %4362 = vmatpush1.bf16.msra.mxu1 %v7547_v3  ;;  %4281 = vmatprep.subr.bf16.mxu0 %v7562_v4  ;;  %v7658_v3 = vcombine.high %v931_v62, %v939_v17  ;;  %v7660_v4 = vcombine.high %v932_v63, %v940_v1  ;;  %v1019_v62 = vld [vmem:[#allocation12 + $0xcf0] sm:$0xff]  ;;  %v1012_v17 = vld [vmem:[#allocation12 + $0xcb8] sm:$0xff] }
 0x32b   :  { %4363 = vmatprep.subr.bf16.mxu1 %v7564_v5  ;;  %v947_v5 = vld [vmem:[#allocation12 + $0xab0] sm:$0xff] }
 0x32c   :  { %v7673_v21 = vcombine.low %v947_v5, %v955_v6 }
 0x32d   :  { %4282 = vmatpush1.bf16.msra.mxu0 %v7561_v9  ;;  %v7659_v9 = vcombine.low %v932_v63, %v940_v1  ;;  %v1020_v63 = vld [vmem:[#allocation12 + $0xcf8] sm:$0xff] }
 0x32e   :  { %4364 = vmatpush1.bf16.msra.mxu1 %v7563_v11  ;;  %4283 = vmatprep.subr.bf16.mxu0 %v7578_v12  ;;  %v7674_v11 = vcombine.high %v947_v5, %v955_v6  ;;  %v7676_v12 = vcombine.high %v948_v7, %v956_v31  ;;  %v1035_v5 = vld [vmem:[#allocation12 + $0xd70] sm:$0xff]  ;;  %v1028_v6 = vld [vmem:[#allocation12 + $0xd38] sm:$0xff] }
 0x32f   :  { %4365 = vmatprep.subr.bf16.mxu1 %v7580_v13  ;;  %v963_v13 = vld [vmem:[#allocation12 + $0xb30] sm:$0xff] }
 0x330   :  { %v7689_v42 = vcombine.low %v963_v13, %v971_v14 }
 0x331   :  { %4284 = vmatpush1.bf16.msra.mxu0 %v7577_v22  ;;  %v7675_v22 = vcombine.low %v948_v7, %v956_v31  ;;  %v1036_v7 = vld [vmem:[#allocation12 + $0xd78] sm:$0xff] }
 0x332   :  { %4366 = vmatpush1.bf16.msra.mxu1 %v7579_v23  ;;  %4294 = vmatprep.subr.bf16.mxu0 %v7594_v25  ;;  %v7690_v23 = vcombine.high %v963_v13, %v971_v14  ;;  %v1051_v13 = vld [vmem:[#allocation12 + $0xdf0] sm:$0xff]  ;;  %v1044_v14 = vld [vmem:[#allocation12 + $0xdb8] sm:$0xff] }
 0x333   :  { %4376 = vmatprep.subr.bf16.mxu1 %v7596_v26  ;;  %v7692_v26 = vcombine.high %v964_v19, %v972_v39 }
 0x334   :  { %4286 = vmatmul.mubr.bf16.vlgmr.msra.gmra.mrb[20].mxu0 %v9105_v41 }
 0x335   :  { %4368 = vmatmul.mubr.bf16.vlgmr.msra.gmra.mrb[20].mxu1 %v9105_v41  ;;  %4295 = vmatpush1.bf16.msra.mxu0 %v7593_v29  ;;  %v7627_v41 = vcombine.low %v900_v44, %v908_v45  ;;  %v7691_v45 = vcombine.low %v964_v19, %v972_v39  ;;  %v1052_v19 = vld [vmem:[#allocation12 + $0xdf8] sm:$0xff] }
 0x336   :  { %4326 = vmatprep.mubr.bf16.mxu0 %v9111_v49  ;;  %4377 = vmatpush1.bf16.msra.mxu1 %v7595_v35  ;;  %v988_v35 = vld [vmem:[#allocation12 + $0xbf8] sm:$0xff] }
 0x337   :  { %4408 = vmatprep.mubr.bf16.mxu1 %v9111_v49  ;;  %4296 = vmatprep.subr.bf16.mxu0 %v7610_v36  ;;  %v7641_v49 = vcombine.low %v915_v51, %v923_v52  ;;  %v1003_v51 = vld [vmem:[#allocation12 + $0xc70] sm:$0xff]  ;;  %v996_v52 = vld [vmem:[#allocation12 + $0xc38] sm:$0xff] }
 0x338   :  { %4378 = vmatprep.subr.bf16.mxu1 %v7612_v43 }
 0x339   :  { %4297 = vmatpush1.bf16.msra.mxu0 %v7609_v46  ;;  %v7706_v46 = vcombine.high %v979_v27, %v987_v28  ;;  %v1067_v27 = vld [vmem:[#allocation12 + $0xe70] sm:$0xff]  ;;  %v1060_v28 = vld [vmem:[#allocation12 + $0xe38] sm:$0xff] }
 0x33a   :  { %4379 = vmatpush1.bf16.msra.mxu1 %v7611_v47  ;;  %4298 = vmatprep.subr.bf16.mxu0 %v7626_v48  ;;  %v7708_v48 = vcombine.high %v980_v34, %v988_v35 }
 0x33b   :  { %4380 = vmatprep.subr.bf16.mxu1 %v7628_v50  ;;  %v995_v50 = vld [vmem:[#allocation12 + $0xc30] sm:$0xff] }
 0x33c   :  { %v7721_v1 = vcombine.low %v995_v50, %v1003_v51 }
 0x33d   :  { %4299 = vmatpush1.bf16.msra.mxu0 %v7625_v57  ;;  %v7707_v57 = vcombine.low %v980_v34, %v988_v35  ;;  %v1068_v34 = vld [vmem:[#allocation12 + $0xe78] sm:$0xff] }
 0x33e   :  { %4381 = vmatpush1.bf16.msra.mxu1 %v7627_v41  ;;  %4300 = vmatprep.subr.bf16.mxu0 %v7642_v58  ;;  %v7722_v41 = vcombine.high %v995_v50, %v1003_v51  ;;  %v7724_v58 = vcombine.high %v996_v52, %v1004_v53  ;;  %v7787_v50 = vcombine.low %v1060_v28, %v1068_v34 }
 0x33f   :  { %4382 = vmatprep.subr.bf16.mxu1 %v7644_v59  ;;  %v1011_v59 = vld [vmem:[#allocation12 + $0xcb0] sm:$0xff] }
 0x340   :  { %v7737_v31 = vcombine.low %v1011_v59, %v1019_v62 }
 0x341   :  { %4301 = vmatpush1.bf16.msra.mxu0 %v7641_v49  ;;  %v7723_v49 = vcombine.low %v996_v52, %v1004_v53  ;;  %v1091_v53 = vld [vmem:[#allocation12 + $0xf30] sm:$0xff] }
 0x342   :  { %4383 = vmatpush1.bf16.msra.mxu1 %v7643_v2  ;;  %4302 = vmatprep.subr.bf16.mxu0 %v7658_v3  ;;  %v7738_v2 = vcombine.high %v1011_v59, %v1019_v62  ;;  %v7740_v3 = vcombine.high %v1012_v17, %v1020_v63 }
 0x343   :  { %4384 = vmatprep.subr.bf16.mxu1 %v7660_v4  ;;  %v1027_v4 = vld [vmem:[#allocation12 + $0xd30] sm:$0xff] }
 0x344   :  { %v7753_v39 = vcombine.low %v1027_v4, %v1035_v5 }
 0x345   :  { %4303 = vmatpush1.bf16.msra.mxu0 %v7657_v8  ;;  %v7739_v8 = vcombine.low %v1012_v17, %v1020_v63  ;;  %v1107_v63 = vld [vmem:[#allocation12 + $0xfb0] sm:$0xff] }
 0x346   :  { %4385 = vmatpush1.bf16.msra.mxu1 %v7659_v9  ;;  %4304 = vmatprep.subr.bf16.mxu0 %v7674_v11  ;;  %v7754_v9 = vcombine.high %v1027_v4, %v1035_v5  ;;  %v7756_v11 = vcombine.high %v1028_v6, %v1036_v7 }
 0x347   :  { %v9163_v25 = vpop.f32.mrb[12].mxu0  ;;  %4386 = vmatprep.subr.bf16.mxu1 %v7676_v12  ;;  %v1043_v12 = vld [vmem:[#allocation12 + $0xdb0] sm:$0xff] }
 0x348   :  { %v9165_v29 = vpop.f32.mrb[12].mxu1  ;;  %v9167_v33 = vpop.f32.mrb[13].mxu0  ;;  %v7769_v35 = vcombine.low %v1043_v12, %v1051_v13 }
 0x349   :  { %v9169_v36 = vpop.f32.mrb[13].mxu1  ;;  %v4004_v38 = vpop.f32.mrb[14].mxu0  ;;  %4305 = vmatpush1.bf16.msra.mxu0 %v7673_v21  ;;  %v7755_v21 = vcombine.low %v1028_v6, %v1036_v7  ;;  %v4449_v7 = vld [vmem:[#allocation16] sm:$0xff] }
 0x34a   :  { %v4086_v43 = vpop.f32.mrb[14].mxu1  ;;  %4387 = vmatpush1.bf16.msra.mxu1 %v7675_v22  ;;  %v4005_v44 = vpop.f32.mrb[15].mxu0  ;;  %4306 = vmatprep.subr.bf16.mxu0 %v7690_v23  ;;  %v7770_v22 = vcombine.high %v1043_v12, %v1051_v13  ;;  %v7772_v23 = vcombine.high %v1044_v14, %v1052_v19  ;;  %v7771_v38 = vcombine.low %v1044_v14, %v1052_v19  ;;  %v4465_v19 = vld [vmem:[#allocation16 + $0x80] sm:$0xff] }
 0x34b   :  { %v4087_v47 = vpop.f32.mrb[15].mxu1  ;;  %4388 = vmatprep.subr.bf16.mxu1 %v7692_v26  ;;  %v1059_v26 = vld [vmem:[#allocation12 + $0xe30] sm:$0xff]  ;;  %v7788_v43 = vcombine.high %v1060_v28, %v1068_v34 }
 0x34c   :  { %v1075_v44 = vld [vmem:[#allocation12 + $0xeb0] sm:$0xff]  ;;  %v1084_v47 = vld [vmem:[#allocation12 + $0xef8] sm:$0xff] }
 0x34d   :  { %4307 = vmatpush1.bf16.msra.mxu0 %v7689_v42  ;;  %v7786_v42 = vcombine.high %v1059_v26, %v1067_v27  ;;  %v4481_v34 = vld [vmem:[#allocation16 + $0x100] sm:$0xff] }
 0x34e   :  { %4389 = vmatpush1.bf16.msra.mxu1 %v7691_v45  ;;  %4308 = vmatprep.subr.bf16.mxu0 %v7706_v46  ;;  %v1083_v45 = vld [vmem:[#allocation12 + $0xef0] sm:$0xff]  ;;  %v1076_v46 = vld [vmem:[#allocation12 + $0xeb8] sm:$0xff] }
 0x34f   :  { %4390 = vmatprep.subr.bf16.mxu1 %v7708_v48  ;;  %v7785_v48 = vcombine.low %v1059_v26, %v1067_v27  ;;  %v7802_v51 = vcombine.high %v1075_v44, %v1083_v45  ;;  %v7804_v52 = vcombine.high %v1076_v46, %v1084_v47  ;;  %v7803_v59 = vcombine.low %v1076_v46, %v1084_v47  ;;  %v4497_v47 = vld [vmem:[#allocation16 + $0x180] sm:$0xff] }
 0x351   :  { %4309 = vmatpush1.bf16.msra.mxu0 %v7705_v54  ;;  %v1099_v54 = vld [vmem:[#allocation12 + $0xf70] sm:$0xff] }
 0x352   :  { %4391 = vmatpush1.bf16.msra.mxu1 %v7707_v57  ;;  %4310 = vmatprep.subr.bf16.mxu0 %v7722_v41  ;;  %v1092_v57 = vld [vmem:[#allocation12 + $0xf38] sm:$0xff]  ;;  %v7818_v62 = vcombine.high %v1091_v53, %v1099_v54 }
 0x353   :  { %4392 = vmatprep.subr.bf16.mxu1 %v7724_v58  ;;  %v1100_v41 = vld [vmem:[#allocation12 + $0xf78] sm:$0xff]  ;;  %v7801_v58 = vcombine.low %v1075_v44, %v1083_v45 }
 0x354   :  { %v7820_v17 = vcombine.high %v1092_v57, %v1100_v41  ;;  %v7819_v4 = vcombine.low %v1092_v57, %v1100_v41  ;;  %v4451_v57 = vld [vmem:[#allocation16 + $0x10] sm:$0xff] }
 0x355   :  { %4311 = vmatpush1.bf16.msra.mxu0 %v7721_v1  ;;  %v1115_v1 = vld [vmem:[#allocation12 + $0xff0] sm:$0xff]  ;;  %v4459_v41 = vld [vmem:[#allocation16 + $0x50] sm:$0xff] }
 0x356   :  { %4393 = vmatpush1.bf16.msra.mxu1 %v7723_v49  ;;  %4312 = vmatprep.subr.bf16.mxu0 %v7738_v2  ;;  %v1108_v49 = vld [vmem:[#allocation12 + $0xfb8] sm:$0xff]  ;;  %v7834_v5 = vcombine.high %v1107_v63, %v1115_v1 }
 0x357   :  { %4394 = vmatprep.subr.bf16.mxu1 %v7740_v3  ;;  %v1116_v2 = vld [vmem:[#allocation12 + $0xff8] sm:$0xff]  ;;  %v7817_v3 = vcombine.low %v1091_v53, %v1099_v54 }
 0x358   :  { %v7836_v6 = vcombine.high %v1108_v49, %v1116_v2  ;;  %v7835_v12 = vcombine.low %v1108_v49, %v1116_v2  ;;  %v4467_v2 = vld [vmem:[#allocation16 + $0x90] sm:$0xff] }
 0x359   :  { %4313 = vmatpush1.bf16.msra.mxu0 %v7737_v31  ;;  %v4457_v31 = vld [vmem:[#allocation16 + $0x40] sm:$0xff] }
 0x35a   :  { %4395 = vmatpush1.bf16.msra.mxu1 %v7739_v8  ;;  %4314 = vmatprep.subr.bf16.mxu0 %v7754_v9  ;;  %v4450_v8 = vld [vmem:[#allocation16 + $0x8] sm:$0xff]  ;;  %v7838_v13 = vcombine.high %v4449_v7, %v4457_v31 }
 0x35b   :  { %4396 = vmatprep.subr.bf16.mxu1 %v7756_v11  ;;  %v4458_v9 = vld [vmem:[#allocation16 + $0x48] sm:$0xff]  ;;  %v7833_v11 = vcombine.low %v1107_v63, %v1115_v1  ;;  %v7842_v1 = vcombine.high %v4451_v57, %v4459_v41 }
 0x35c   :  { %v7840_v14 = vcombine.high %v4450_v8, %v4458_v9  ;;  %v7839_v26 = vcombine.low %v4450_v8, %v4458_v9 }
 0x35d   :  { %4315 = vmatpush1.bf16.msra.mxu0 %v7753_v39  ;;  %v4473_v39 = vld [vmem:[#allocation16 + $0xc0] sm:$0xff] }
 0x35e   :  { %4397 = vmatpush1.bf16.msra.mxu1 %v7755_v21  ;;  %4316 = vmatprep.subr.bf16.mxu0 %v7770_v22  ;;  %v4466_v21 = vld [vmem:[#allocation16 + $0x88] sm:$0xff]  ;;  %v7854_v27 = vcombine.high %v4465_v19, %v4473_v39 }
 0x35f   :  { %4398 = vmatprep.subr.bf16.mxu1 %v7772_v23  ;;  %v4474_v22 = vld [vmem:[#allocation16 + $0xc8] sm:$0xff]  ;;  %v7837_v23 = vcombine.low %v4449_v7, %v4457_v31  ;;  %v7841_v7 = vcombine.low %v4451_v57, %v4459_v41 }
 0x360   :  { %v7856_v28 = vcombine.high %v4466_v21, %v4474_v22  ;;  %v7855_v44 = vcombine.low %v4466_v21, %v4474_v22 }
 0x361   :  { %4317 = vmatpush1.bf16.msra.mxu0 %v7769_v35  ;;  %v4489_v35 = vld [vmem:[#allocation16 + $0x140] sm:$0xff] }
 0x362   :  { %4399 = vmatpush1.bf16.msra.mxu1 %v7771_v38  ;;  %4318 = vmatprep.subr.bf16.mxu0 %v7786_v42  ;;  %v4482_v38 = vld [vmem:[#allocation16 + $0x108] sm:$0xff]  ;;  %v7870_v45 = vcombine.high %v4481_v34, %v4489_v35 }
 0x363   :  { %4400 = vmatprep.subr.bf16.mxu1 %v7788_v43  ;;  %v4490_v42 = vld [vmem:[#allocation16 + $0x148] sm:$0xff]  ;;  %v7853_v43 = vcombine.low %v4465_v19, %v4473_v39 }
 0x364   :  { %v7872_v46 = vcombine.high %v4482_v38, %v4490_v42 }
 0x365   :  { %4319 = vmatpush1.bf16.msra.mxu0 %v7785_v48  ;;  %v4505_v48 = vld [vmem:[#allocation16 + $0x1c0] sm:$0xff] }
 0x366   :  { %4401 = vmatpush1.bf16.msra.mxu1 %v7787_v50  ;;  %4320 = vmatprep.subr.bf16.mxu0 %v7802_v51  ;;  %v4498_v50 = vld [vmem:[#allocation16 + $0x188] sm:$0xff]  ;;  %v7886_v53 = vcombine.high %v4497_v47, %v4505_v48 }
 0x367   :  { %4402 = vmatprep.subr.bf16.mxu1 %v7804_v52  ;;  %v4506_v51 = vld [vmem:[#allocation16 + $0x1c8] sm:$0xff]  ;;  %v7869_v52 = vcombine.low %v4481_v34, %v4489_v35 }
 0x368   :  { %v7888_v54 = vcombine.high %v4498_v50, %v4506_v51  ;;  %v7887_v63 = vcombine.low %v4498_v50, %v4506_v51 }
 0x369   :  { %4321 = vmatpush1.bf16.msra.mxu0 %v7801_v58  ;;  %v4452_v58 = vld [vmem:[#allocation16 + $0x18] sm:$0xff] }
 0x36a   :  { %4403 = vmatpush1.bf16.msra.mxu1 %v7803_v59  ;;  %4322 = vmatprep.subr.bf16.mxu0 %v7818_v62  ;;  %v4460_v59 = vld [vmem:[#allocation16 + $0x58] sm:$0xff]  ;;  %v7885_v62 = vcombine.low %v4497_v47, %v4505_v48 }
 0x36b   :  { %4404 = vmatprep.subr.bf16.mxu1 %v7820_v17  ;;  %v183_v17 = vld [vmem:[#allocation2] sm:$0xff]  ;;  %v7844_v49 = vcombine.high %v4452_v58, %v4460_v59  ;;  %v7843_v31 = vcombine.low %v4452_v58, %v4460_v59 }
 0x36d   :  { %4323 = vmatpush1.bf16.msra.mxu0 %v7817_v3  ;;  %v4475_v3 = vld [vmem:[#allocation16 + $0xd0] sm:$0xff] }
 0x36e   :  { %4405 = vmatpush1.bf16.msra.mxu1 %v7819_v4  ;;  %4324 = vmatprep.subr.bf16.mxu0 %v7834_v5  ;;  %v9175_v4 = vpack.c.bf16 %v183_v17, %v183_v17  ;;  %v4468_v5 = vld [vmem:[#allocation16 + $0x98] sm:$0xff]  ;;  %v7858_v8 = vcombine.high %v4467_v2, %v4475_v3  ;;  %v7857_v19 = vcombine.low %v4467_v2, %v4475_v3  ;;  %v4493_v17 = vld [vmem:[#allocation16 + $0x160] sm:$0xff] }
 0x36f   :  { %4406 = vmatprep.subr.bf16.mxu1 %v7836_v6  ;;  %v4476_v6 = vld [vmem:[#allocation16 + $0xd8] sm:$0xff] }
 0x370   :  { %v7860_v9 = vcombine.high %v4468_v5, %v4476_v6  ;;  %v7859_v39 = vcombine.low %v4468_v5, %v4476_v6  ;;  %v4501_v6 = vld [vmem:[#allocation16 + $0x1a0] sm:$0xff] }
 0x371   :  { %4325 = vmatpush1.bf16.msra.mxu0 %v7833_v11  ;;  %v4483_v11 = vld [vmem:[#allocation16 + $0x110] sm:$0xff] }
 0x372   :  { %4407 = vmatpush1.bf16.msra.mxu1 %v7835_v12  ;;  %4836 = vmatprep.subr.bf16.mxu0 %v7838_v13  ;;  %v4491_v12 = vld [vmem:[#allocation16 + $0x150] sm:$0xff]  ;;  %v4484_v13 = vld [vmem:[#allocation16 + $0x118] sm:$0xff] }
 0x373   :  { %4877 = vmatprep.subr.bf16.mxu1 %v7840_v14  ;;  %v4492_v14 = vld [vmem:[#allocation16 + $0x158] sm:$0xff]  ;;  %v7874_v21 = vcombine.high %v4483_v11, %v4491_v12  ;;  %v7873_v34 = vcombine.low %v4483_v11, %v4491_v12 }
 0x374   :  { %4327 = vmatmul.mubr.bf16.vlgmr.msra.gmra.mrb[20].mxu0 %v9129_v10  ;;  %v7876_v22 = vcombine.high %v4484_v13, %v4492_v14  ;;  %v7875_v35 = vcombine.low %v4484_v13, %v4492_v14  ;;  %v4455_v14 = vld [vmem:[#allocation16 + $0x30] sm:$0xff] }
 0x375   :  { %4409 = vmatmul.mubr.bf16.vlgmr.msra.gmra.mrb[20].mxu1 %v9129_v10  ;;  %4837 = vmatpush1.bf16.msra.mxu0 %v7837_v23  ;;  %v7871_v10 = vcombine.low %v4482_v38, %v4490_v42  ;;  %v4499_v23 = vld [vmem:[#allocation16 + $0x190] sm:$0xff] }
 0x376   :  { %4878 = vmatpush1.bf16.msra.mxu1 %v7839_v26  ;;  %4838 = vmatprep.subr.bf16.mxu0 %v7854_v27  ;;  %v4507_v26 = vld [vmem:[#allocation16 + $0x1d0] sm:$0xff]  ;;  %v4500_v27 = vld [vmem:[#allocation16 + $0x198] sm:$0xff] }
 0x377   :  { %4879 = vmatprep.subr.bf16.mxu1 %v7856_v28  ;;  %4868 = vmatprep.mubr.bf16.mxu0 %v8844_v0  ;;  %v4508_v28 = vld [vmem:[#allocation16 + $0x1d8] sm:$0xff]  ;;  %v7890_v38 = vcombine.high %v4499_v23, %v4507_v26  ;;  %v7889_v47 = vcombine.low %v4499_v23, %v4507_v26 }
 0x378   :  { %4909 = vmatprep.mubr.bf16.mxu1 %v8844_v0  ;;  %v7892_v42 = vcombine.high %v4500_v27, %v4508_v28  ;;  %v7891_v48 = vcombine.low %v4500_v27, %v4508_v28  ;;  %v4471_v28 = vld [vmem:[#allocation16 + $0xb0] sm:$0xff] }
 0x379   :  { %4839 = vmatpush1.bf16.msra.mxu0 %v7853_v43  ;;  %v4453_v43 = vld [vmem:[#allocation16 + $0x20] sm:$0xff] }
 0x37a   :  { %4880 = vmatpush1.bf16.msra.mxu1 %v7855_v44  ;;  %4840 = vmatprep.subr.bf16.mxu0 %v7870_v45  ;;  %v4461_v44 = vld [vmem:[#allocation16 + $0x60] sm:$0xff]  ;;  %v4454_v45 = vld [vmem:[#allocation16 + $0x28] sm:$0xff] }
 0x37b   :  { %4881 = vmatprep.subr.bf16.mxu1 %v7872_v46  ;;  %v4462_v46 = vld [vmem:[#allocation16 + $0x68] sm:$0xff]  ;;  %v7846_v50 = vcombine.high %v4453_v43, %v4461_v44  ;;  %v7845_v57 = vcombine.low %v4453_v43, %v4461_v44 }
 0x37c   :  { %v7848_v51 = vcombine.high %v4454_v45, %v4462_v46  ;;  %v7847_v41 = vcombine.low %v4454_v45, %v4462_v46  ;;  %v4487_v46 = vld [vmem:[#allocation16 + $0x130] sm:$0xff] }
 0x37d   :  { %4841 = vmatpush1.bf16.msra.mxu0 %v7869_v52  ;;  %v4469_v52 = vld [vmem:[#allocation16 + $0xa0] sm:$0xff] }
 0x37e   :  { %4882 = vmatpush1.bf16.msra.mxu1 %v7871_v10  ;;  %4842 = vmatprep.subr.bf16.mxu0 %v7886_v53  ;;  %v4477_v10 = vld [vmem:[#allocation16 + $0xe0] sm:$0xff]  ;;  %v4470_v53 = vld [vmem:[#allocation16 + $0xa8] sm:$0xff] }
 0x37f   :  { %4883 = vmatprep.subr.bf16.mxu1 %v7888_v54  ;;  %v4478_v54 = vld [vmem:[#allocation16 + $0xe8] sm:$0xff]  ;;  %v7862_v58 = vcombine.high %v4469_v52, %v4477_v10 }
 0x380   :  { %v7864_v59 = vcombine.high %v4470_v53, %v4478_v54  ;;  %v7863_v2 = vcombine.low %v4470_v53, %v4478_v54  ;;  %v4503_v54 = vld [vmem:[#allocation16 + $0x1b0] sm:$0xff] }
 0x381   :  { %4843 = vmatpush1.bf16.msra.mxu0 %v7885_v62  ;;  %v4485_v62 = vld [vmem:[#allocation16 + $0x120] sm:$0xff] }
 0x382   :  { %4884 = vmatpush1.bf16.msra.mxu1 %v7887_v63  ;;  %4918 = vmatprep.subr.bf16.mxu0 %v7842_v1  ;;  %v4486_v63 = vld [vmem:[#allocation16 + $0x128] sm:$0xff]  ;;  %v7878_v3 = vcombine.high %v4485_v62, %v4493_v17 }
 0x383   :  { %4959 = vmatprep.subr.bf16.mxu1 %v7844_v49  ;;  %v4494_v1 = vld [vmem:[#allocation16 + $0x168] sm:$0xff]  ;;  %v7861_v49 = vcombine.low %v4469_v52, %v4477_v10 }
 0x384   :  { %7901 = vmatmul.mubr.msk.bf16.vlgmr.msra.gmra.mrb[24].mxu0 %vm421_vm0, %v9175_v4  ;;  %v7880_v5 = vcombine.high %v4486_v63, %v4494_v1  ;;  %v7879_v11 = vcombine.low %v4486_v63, %v4494_v1 }
 0x385   :  { %7902 = vmatmul.mubr.msk.bf16.vlgmr.msra.gmra.mrb[24].mxu1 %vm421_vm0, %v9175_v4  ;;  %4919 = vmatpush1.bf16.msra.mxu0 %v7841_v7  ;;  %v4509_v7 = vld [vmem:[#allocation16 + $0x1e0] sm:$0xff] }
 0x386   :  { %4960 = vmatpush1.bf16.msra.mxu1 %v7843_v31  ;;  %4920 = vmatprep.subr.bf16.mxu0 %v7858_v8  ;;  %v4502_v31 = vld [vmem:[#allocation16 + $0x1a8] sm:$0xff]  ;;  %v7894_v12 = vcombine.high %v4501_v6, %v4509_v7 }
 0x387   :  { %4961 = vmatprep.subr.bf16.mxu1 %v7860_v9  ;;  %4950 = vmatprep.mubr.bf16.mxu0 %v8844_v0  ;;  %v4510_v8 = vld [vmem:[#allocation16 + $0x1e8] sm:$0xff]  ;;  %v7877_v9 = vcombine.low %v4485_v62, %v4493_v17 }
 0x388   :  { %4991 = vmatprep.mubr.bf16.mxu1 %v8844_v0  ;;  %v7896_v13 = vcombine.high %v4502_v31, %v4510_v8  ;;  %v7895_v23 = vcombine.low %v4502_v31, %v4510_v8  ;;  %v8387_v31 = vld [vmem:[%s9863_s11 + $0xc8] sm:$0xff]  }
 0x389   :  { %4921 = vmatpush1.bf16.msra.mxu0 %v7857_v19  ;;  %v4463_v19 = vld [vmem:[#allocation16 + $0x70] sm:$0xff]  ;;  %v8388_v8 = vld [vmem:[%s9863_s11 + $0x8] sm:$0xff]  }
 0x38a   :  { %4962 = vmatpush1.bf16.msra.mxu1 %v7859_v39  ;;  %4922 = vmatprep.subr.bf16.mxu0 %v7874_v21  ;;  %v4456_v39 = vld [vmem:[#allocation16 + $0x38] sm:$0xff]  ;;  %v7850_v26 = vcombine.high %v4455_v14, %v4463_v19 }
 0x38b   :  { %4963 = vmatprep.subr.bf16.mxu1 %v7876_v22  ;;  %v4464_v21 = vld [vmem:[#allocation16 + $0x78] sm:$0xff]  ;;  %v7893_v22 = vcombine.low %v4501_v6, %v4509_v7 }
 0x38c   :  { %v7852_v27 = vcombine.high %v4456_v39, %v4464_v21  ;;  %v7851_v43 = vcombine.low %v4456_v39, %v4464_v21  ;;  %v8385_v6 = vld [vmem:[%s9863_s11 + $0x80] sm:$0xff]   ;;  %v8386_v7 = vld [vmem:[%s9863_s11 + $0x48] sm:$0xff]  }
 0x38d   :  { %4923 = vmatpush1.bf16.msra.mxu0 %v7873_v34  ;;  %v4479_v34 = vld [vmem:[#allocation16 + $0xf0] sm:$0xff] }
 0x38e   :  { %4964 = vmatpush1.bf16.msra.mxu1 %v7875_v35  ;;  %4924 = vmatprep.subr.bf16.mxu0 %v7890_v38  ;;  %v4472_v35 = vld [vmem:[#allocation16 + $0xb8] sm:$0xff]  ;;  %v7866_v44 = vcombine.high %v4471_v28, %v4479_v34 }
 0x38f   :  { %4965 = vmatprep.subr.bf16.mxu1 %v7892_v42  ;;  %v4480_v38 = vld [vmem:[#allocation16 + $0xf8] sm:$0xff]  ;;  %v7849_v42 = vcombine.low %v4455_v14, %v4463_v19 }
 0x390   :  { %v7868_v45 = vcombine.high %v4472_v35, %v4480_v38  ;;  %v7867_v52 = vcombine.low %v4472_v35, %v4480_v38  ;;  %v8397_v35 = vld [vmem:[%s9863_s11 + $0x98] sm:$0xff]  }
 0x391   :  { %4925 = vmatpush1.bf16.msra.mxu0 %v7889_v47  ;;  %v4495_v47 = vld [vmem:[#allocation16 + $0x170] sm:$0xff] }
 0x392   :  { %4966 = vmatpush1.bf16.msra.mxu1 %v7891_v48  ;;  %5000 = vmatprep.subr.bf16.mxu0 %v7846_v50  ;;  %v4488_v48 = vld [vmem:[#allocation16 + $0x138] sm:$0xff]  ;;  %v7882_v10 = vcombine.high %v4487_v46, %v4495_v47 }
 0x393   :  { %5041 = vmatprep.subr.bf16.mxu1 %v7848_v51  ;;  %v4496_v50 = vld [vmem:[#allocation16 + $0x178] sm:$0xff]  ;;  %v7865_v51 = vcombine.low %v4471_v28, %v4479_v34  ;;  %v8396_v34 = vld [vmem:[%s9863_s11 + $0x18] sm:$0xff]  }
 0x394   :  { %7903 = vmatmul.mubr.msk.bf16.vlgmr.msra.gmra.mrb[28].mxu0 %vm421_vm0, %v9175_v4  ;;  %v7884_v53 = vcombine.high %v4488_v48, %v4496_v50  ;;  %v7883_v62 = vcombine.low %v4488_v48, %v4496_v50  ;;  %v8404_v48 = vld [vmem:[%s9863_s11 + $0x28] sm:$0xff]  }
 0x395   :  { %7904 = vmatmul.mubr.msk.bf16.vlgmr.msra.gmra.mrb[28].mxu1 %vm421_vm0, %v9175_v4  ;;  %5001 = vmatpush1.bf16.msra.mxu0 %v7845_v57  ;;  %v4511_v57 = vld [vmem:[#allocation16 + $0x1f0] sm:$0xff]  ;;  %v8405_v50 = vld [vmem:[%s9863_s11 + $0xa8] sm:$0xff]  }
 0x396   :  { %5042 = vmatpush1.bf16.msra.mxu1 %v7847_v41  ;;  %5002 = vmatprep.subr.bf16.mxu0 %v7862_v58  ;;  %v4504_v41 = vld [vmem:[#allocation16 + $0x1b8] sm:$0xff]  ;;  %v7898_v17 = vcombine.high %v4503_v54, %v4511_v57  ;;  %v7897_v1 = vcombine.low %v4503_v54, %v4511_v57  ;;  %v8410_v54 = vld [vmem:[%s9863_s11 + $0x78] sm:$0xff]  }
 0x397   :  { %5043 = vmatprep.subr.bf16.mxu1 %v7864_v59  ;;  %5032 = vmatprep.mubr.bf16.mxu0 %v8844_v0  ;;  %v4512_v58 = vld [vmem:[#allocation16 + $0x1f8] sm:$0xff]  ;;  %v7881_v59 = vcombine.low %v4487_v46, %v4495_v47  ;;  %v8411_v57 = vld [vmem:[%s9863_s11 + $0xf8] sm:$0xff]  }
 0x398   :  { %5073 = vmatprep.mubr.bf16.mxu1 %v8844_v0  ;;  %v7900_v63 = vcombine.high %v4504_v41, %v4512_v58  ;;  %v8402_v46 = vld [vmem:[%s9863_s11 + $0x68] sm:$0xff]  }
 0x399   :  { %5003 = vmatpush1.bf16.msra.mxu0 %v7861_v49  ;;  %v7899_v49 = vcombine.low %v4504_v41, %v4512_v58  ;;  %v8403_v47 = vld [vmem:[%s9863_s11 + $0xe8] sm:$0xff]   ;;  %v8412_v41 = vld [vmem:[%s9863_s11 + $0x38] sm:$0xff]  }
 0x39a   :  { %5044 = vmatpush1.bf16.msra.mxu1 %v7863_v2  ;;  %5004 = vmatprep.subr.bf16.mxu0 %v7878_v3  ;;  %v8382_v2 = vld [vmem:[%s9863_s11 + $0x40] sm:$0xff]   ;;  %v8413_v58 = vld [vmem:[%s9863_s11 + $0xb8] sm:$0xff]  }
 0x39b   :  { %5045 = vmatprep.subr.bf16.mxu1 %v7880_v5  ;;  %v8383_v3 = vld [vmem:[%s9863_s11 + $0xc0] sm:$0xff]  }
 0x39c   :  { %v8384_v5 = vld [vmem:[%s9863_s11] sm:$0xff]  }
 0x39d   :  { %5005 = vmatpush1.bf16.msra.mxu0 %v7877_v9  ;;  %v8389_v9 = vld [vmem:[%s9863_s11 + $0x88] sm:$0xff]  }
 0x39e   :  { %5046 = vmatpush1.bf16.msra.mxu1 %v7879_v11  ;;  %5006 = vmatprep.subr.bf16.mxu0 %v7894_v12  ;;  %v8390_v11 = vld [vmem:[%s9863_s11 + $0x50] sm:$0xff]  }
 0x39f   :  { %5047 = vmatprep.subr.bf16.mxu1 %v7896_v13  ;;  %v8392_v12 = vld [vmem:[%s9863_s11 + $0x10] sm:$0xff]  }
 0x3a0   :  { %v8393_v13 = vld [vmem:[%s9863_s11 + $0x90] sm:$0xff]  }
 0x3a1   :  { %5007 = vmatpush1.bf16.msra.mxu0 %v7893_v22 }
 0x3a2   :  { %5048 = vmatpush1.bf16.msra.mxu1 %v7895_v23  ;;  %5082 = vmatprep.subr.bf16.mxu0 %v7850_v26  ;;  %v8394_v23 = vld [vmem:[%s9863_s11 + $0x58] sm:$0xff]  }
 0x3a3   :  { %5123 = vmatprep.subr.bf16.mxu1 %v7852_v27  ;;  %v8395_v26 = vld [vmem:[%s9863_s11 + $0xd8] sm:$0xff]  }
 0x3a4   :  { %7905 = vmatmul.mubr.msk.bf16.vlgmr.msra.gmra.mrb[32].mxu0 %vm421_vm0, %v9175_v4 }
 0x3a5   :  { %7906 = vmatmul.mubr.msk.bf16.vlgmr.msra.gmra.mrb[32].mxu1 %vm421_vm0, %v9175_v4  ;;  %5083 = vmatpush1.bf16.msra.mxu0 %v7849_v42  ;;  %v8398_v42 = vld [vmem:[%s9863_s11 + $0x60] sm:$0xff]  }
 0x3a6   :  { %5124 = vmatpush1.bf16.msra.mxu1 %v7851_v43  ;;  %5084 = vmatprep.subr.bf16.mxu0 %v7866_v44  ;;  %v8399_v43 = vld [vmem:[%s9863_s11 + $0xe0] sm:$0xff]  }
 0x3a7   :  { %5125 = vmatprep.subr.bf16.mxu1 %v7868_v45  ;;  %5114 = vmatprep.mubr.bf16.mxu0 %v8844_v0  ;;  %v8400_v44 = vld [vmem:[%s9863_s11 + $0x20] sm:$0xff]  }
 0x3a8   :  { %5155 = vmatprep.mubr.bf16.mxu1 %v8844_v0  ;;  %v8401_v45 = vld [vmem:[%s9863_s11 + $0xa0] sm:$0xff]  }
 0x3a9   :  { %5085 = vmatpush1.bf16.msra.mxu0 %v7865_v51  ;;  %v8406_v51 = vld [vmem:[%s9863_s11 + $0x70] sm:$0xff]  }
 0x3aa   :  { %5126 = vmatpush1.bf16.msra.mxu1 %v7867_v52  ;;  %5086 = vmatprep.subr.bf16.mxu0 %v7882_v10  ;;  %v8407_v52 = vld [vmem:[%s9863_s11 + $0xf0] sm:$0xff]  }
 0x3ab   :  { %5127 = vmatprep.subr.bf16.mxu1 %v7884_v53  ;;  %v8408_v10 = vld [vmem:[%s9863_s11 + $0x30] sm:$0xff]  }
 0x3ac   :  { %v8409_v53 = vld [vmem:[%s9863_s11 + $0xb0] sm:$0xff]  }
 0x3ad   :  { %5087 = vmatpush1.bf16.msra.mxu0 %v7881_v59  ;;  %v8414_v59 = vld [vmem:[%s9863_s11 + $0x140] sm:$0xff]  }
 0x3ae   :  { %5128 = vmatpush1.bf16.msra.mxu1 %v7883_v62  ;;  %5088 = vmatprep.subr.bf16.mxu0 %v7898_v17  ;;  %v8415_v62 = vld [vmem:[%s9863_s11 + $0x1c0] sm:$0xff]   ;;  %v1117_v17 = vld [vmem:[#allocation13] sm:$0xff] }
 0x3af   :  { %5129 = vmatprep.subr.bf16.mxu1 %v7900_v63  ;;  %v1124_v63 = vrot.slane %v1117_v17, %v9085_v16 }
 0x3b1   :  { %5089 = vmatpush1.bf16.msra.mxu0 %v7897_v1  ;;  %v1132_v1 = vrot.slane %v1117_v17, %v9124_v40 }
 0x3b2   :  { %5130 = vmatpush1.bf16.msra.mxu1 %v7899_v49  ;;  %8093 = vmatprep.subr.bf16.mxu0 %v8382_v2  ;;  %v1128_v49 = vrot.slane %v1117_v17, %v9090_v18 }
 0x3b3   :  { %8115 = vmatprep.subr.bf16.mxu1 %v8383_v3  ;;  %v1136_v3 = vrot.slane %v1117_v17, %v9095_v20 }
 0x3b4   :  { %7907 = vmatmul.mubr.msk.bf16.vlgmr.msra.gmra.mrb[36].mxu0 %vm421_vm0, %v9175_v4 }
 0x3b5   :  { %7908 = vmatmul.mubr.msk.bf16.vlgmr.msra.gmra.mrb[36].mxu1 %vm421_vm0, %v9175_v4  ;;  %8094 = vmatpush3.bf16.msra.mxu0 %v8384_v5  ;;  %v8391_v4 = vld [vmem:[%s9863_s11 + $0xd0] sm:$0xff]  }
 0x3b6   :  { %8116 = vmatpush3.bf16.msra.mxu1 %v8385_v6  ;;  %8095 = vmatprep.subr.bf16.mxu0 %v8386_v7 }
 0x3b7   :  { %8117 = vmatprep.subr.bf16.mxu1 %v8387_v31 }
 0x3b9   :  { %8096 = vmatpush3.bf16.msra.mxu0 %v8388_v8  ;;  %v8313_v8 = vadd.f32 %v9147_v55, %v1124_v63 }
 0x3ba   :  { %8118 = vmatpush3.bf16.msra.mxu1 %v8389_v9  ;;  %8097 = vmatprep.subr.bf16.mxu0 %v8390_v11 }
 0x3bb   :  { %8119 = vmatprep.subr.bf16.mxu1 %v8391_v4  ;;  %v8315_v4 = vadd.f32 %v9149_v56, %v1132_v1  ;;  %v9332_v56 = vsub.s32 6, %v9082_v15 }
 0x3bd   :  { %8098 = vmatpush3.bf16.msra.mxu0 %v8392_v12  ;;  %v8314_v12 = vadd.f32 %v9151_v60, %v1128_v49  ;;  %v9335_v60 = vsub.s32 7, %v9082_v15 }
 0x3be   :  { %8120 = vmatpush3.bf16.msra.mxu1 %v8393_v13  ;;  %8099 = vmatprep.subr.bf16.mxu0 %v8394_v23  ;;  %v4417_v23 = vmax.f32 %v8313_v8, 0.0 }
 0x3bf   :  { %8121 = vmatprep.subr.bf16.mxu1 %v8395_v26  ;;  %v4419_v26 = vmax.f32 %v8315_v4, 0.0 }
 0x3c1   :  { %8100 = vmatpush3.bf16.msra.mxu0 %v8396_v34  ;;  %v4433_v34 = vpack.c.bf16 %v4417_v23, %v4417_v23  ;;  %v8420_v23 = vld [vmem:[%s9863_s11 + $0x108] sm:$0xff]  }
 0x3c2   :  { %8122 = vmatpush3.bf16.msra.mxu1 %v8397_v35  ;;  %8101 = vmatprep.subr.bf16.mxu0 %v8398_v42  ;;  %v4435_v35 = vpack.c.bf16 %v4419_v26, %v4419_v26  ;;  %v9326_v42 = vsub.s32 4, %v9082_v15 }
 0x3c3   :  { %8123 = vmatprep.subr.bf16.mxu1 %v8399_v43  ;;  %v9329_v43 = vsub.s32 5, %v9082_v15 }
 0x3c5   :  { %8102 = vmatpush3.bf16.msra.mxu0 %v8400_v44  ;;  %v1140_v44 = vrot.slane %v1117_v17, %v9326_v42 }
 0x3c6   :  { %8124 = vmatpush3.bf16.msra.mxu1 %v8401_v45  ;;  %8103 = vmatprep.subr.bf16.mxu0 %v8402_v46  ;;  %v5166_v45 = vunpack.c.l.bf16 %v4435_v35 }
 0x3c7   :  { %v9235_v14 = vpop.f32.mrb[16].mxu0  ;;  %8125 = vmatprep.subr.bf16.mxu1 %v8403_v47  ;;  %v1148_v47 = vrot.slane %v1117_v17, %v9332_v56 }
 0x3c8   :  { %v9237_v19 = vpop.f32.mrb[16].mxu1  ;;  %v9239_v39 = vpop.f32.mrb[17].mxu0 }
 0x3c9   :  { %v9241_v21 = vpop.f32.mrb[17].mxu1  ;;  %v4168_v22 = vpop.f32.mrb[18].mxu0  ;;  %8104 = vmatpush3.bf16.msra.mxu0 %v8404_v48  ;;  %v1144_v48 = vrot.slane %v1117_v17, %v9329_v43  ;;  %v8319_v49 = vadd.f32 %v9165_v29, %v1148_v47  ;;  %v8418_v29 = vld [vmem:[%s9863_s11 + $0x148] sm:$0xff]   ;;  %v8426_v47 = vld [vmem:[%s9863_s11 + $0x158] sm:$0xff]  }
 0x3ca   :  { %v4250_v27 = vpop.f32.mrb[18].mxu1  ;;  %v4169_v28 = vpop.f32.mrb[19].mxu0  ;;  %8126 = vmatpush3.bf16.msra.mxu1 %v8405_v50  ;;  %8105 = vmatprep.subr.bf16.mxu0 %v8406_v51  ;;  %v8316_v22 = vadd.f32 %v9153_v61, %v1136_v3  ;;  %v5164_v61 = vunpack.c.l.bf16 %v4433_v34  ;;  %v8423_v34 = vld [vmem:[%s9863_s11 + $0x1d0] sm:$0xff]  }
 0x3cb   :  { %v4251_v38 = vpop.f32.mrb[19].mxu1  ;;  %8127 = vmatprep.subr.bf16.mxu1 %v8407_v52  ;;  %v4418_v27 = vmax.f32 %v8314_v12, 0.0  ;;  %v1152_v52 = vrot.slane %v1117_v17, %v9335_v60  ;;  %v8318_v3 = vadd.f32 %v9167_v33, %v1144_v48  ;;  %v8416_v17 = vld [vmem:[%s9863_s11 + $0x100] sm:$0xff]   ;;  %v8419_v33 = vld [vmem:[%s9863_s11 + $0x1c8] sm:$0xff]   ;;  %v8427_v48 = vld [vmem:[%s9863_s11 + $0x1d8] sm:$0xff]  }
 0x3cc   :  { %v4420_v28 = vmax.f32 %v8316_v22, 0.0 }
 0x3cd   :  { %8106 = vmatpush3.bf16.msra.mxu0 %v8408_v10  ;;  %v4434_v38 = vpack.c.bf16 %v4418_v27, %v4418_v27  ;;  %v4422_v22 = vmax.f32 %v8318_v3, 0.0  ;;  %v8421_v27 = vld [vmem:[%s9863_s11 + $0x188] sm:$0xff]  }
 0x3ce   :  { %8128 = vmatpush3.bf16.msra.mxu1 %v8409_v53  ;;  %8107 = vmatprep.subr.bf16.mxu0 %v8410_v54  ;;  %v4436_v55 = vpack.c.bf16 %v4420_v28, %v4420_v28  ;;  %v8422_v28 = vld [vmem:[%s9863_s11 + $0x150] sm:$0xff]  }
 0x3cf   :  { %8129 = vmatprep.subr.bf16.mxu1 %v8411_v57  ;;  %v5165_v46 = vunpack.c.l.bf16 %v4434_v38 }
 0x3d0   :  { %v5167_v51 = vunpack.c.l.bf16 %v4436_v55  ;;  %v4438_v55 = vpack.c.bf16 %v4422_v22, %v4422_v22 }
 0x3d1   :  { %8108 = vmatpush3.bf16.msra.mxu0 %v8412_v41 }
 0x3d2   :  { %8130 = vmatpush3.bf16.msra.mxu1 %v8413_v58  ;;  %8137 = vmatprep.subr.bf16.mxu0 %v8414_v59  ;;  %v8317_v59 = vadd.f32 %v9163_v25, %v1140_v44  ;;  %v8417_v25 = vld [vmem:[%s9863_s11 + $0x180] sm:$0xff]   ;;  %v8424_v44 = vld [vmem:[%s9863_s11 + $0x110] sm:$0xff]  }
 0x3d3   :  { %8159 = vmatprep.subr.bf16.mxu1 %v8415_v62 }
 0x447   :  { %v9312_v2 = vpop.f32.mrb[20].mxu0 }
 0x448   :  { %v9315_v5 = vpop.f32.mrb[20].mxu1  ;;  %v9317_v6 = vpop.f32.mrb[21].mxu0 }
 0x449   :  { %v9319_v7 = vpop.f32.mrb[21].mxu1  ;;  %v4332_v31 = vpop.f32.mrb[22].mxu0 }
 0x44a   :  { %v4414_v9 = vpop.f32.mrb[22].mxu1  ;;  %v4333_v11 = vpop.f32.mrb[23].mxu0 }
 0x44b   :  { %v4415_v13 = vpop.f32.mrb[23].mxu1  ;;  %v8320_v9 = vadd.f32 %v9169_v36, %v1152_v52  ;;  %v4423_v36 = vmax.f32 %v8319_v49, 0.0 }
 0x44c   :  { %v4421_v13 = vmax.f32 %v8317_v59, 0.0 }
 0x44d   :  { %v4424_v26 = vmax.f32 %v8320_v9, 0.0  ;;  %v4439_v38 = vpack.c.bf16 %v4423_v36, %v4423_v36 }
 0x44e   :  { %v4437_v35 = vpack.c.bf16 %v4421_v13, %v4421_v13 }
 0x44f   :  { %v5170_v52 = vunpack.c.l.bf16 %v4439_v38 }
 0x457   :  { %v4870_v50 = vpop.f32.mrb[24].mxu0 }
 0x458   :  { %v5180_v10 = vmul.f32 %v5164_v61, %v4870_v50  ;;  %v4911_v53 = vpop.f32.mrb[24].mxu1  ;;  %v4872_v54 = vpop.f32.mrb[25].mxu0  ;;  %v9369_v61 = vld [vmem:[#allocation13 + $0x8] sm:$0xff]  ;;  %v5168_v50 = vunpack.c.l.bf16 %v4437_v35 }
 0x459   :  { %v5182_v57 = vmul.f32 %v5166_v45, %v4911_v53  ;;  %v5181_v41 = vmul.f32 %v5165_v46, %v4872_v54  ;;  %v4913_v15 = vpop.f32.mrb[25].mxu1  ;;  %v4874_v58 = vpop.f32.mrb[26].mxu0  ;;  %v4440_v45 = vpack.c.bf16 %v4424_v26, %v4424_v26  ;;  %v8425_v46 = vld [vmem:[%s9863_s11 + $0x190] sm:$0xff]   ;;  %v1164_v53 = vrot.slane %v9369_v61, %v9124_v40  ;;  %v8430_v40 = vld [vmem:[%s9863_s11 + $0x160] sm:$0xff]  }
 0x45a   :  { %v5183_v62 = vmul.f32 %v5167_v51, %v4913_v15  ;;  %v4915_v63 = vpop.f32.mrb[26].mxu1  ;;  %v4875_v1 = vpop.f32.mrb[27].mxu0  ;;  %v5196_v11 = vpack.c.bf16 %v5180_v10, %v5180_v10  ;;  %v1156_v51 = vrot.slane %v9369_v61, %v9085_v16  ;;  %v5169_v10 = vunpack.c.l.bf16 %v4438_v55 }
 0x45b   :  { %v5197_v31 = vpack.c.bf16 %v5181_v41, %v5181_v41  ;;  %v4916_v8 = vpop.f32.mrb[27].mxu1  ;;  %v5198_v12 = vpack.c.bf16 %v5182_v57, %v5182_v57  ;;  %v1160_v54 = vrot.slane %v9369_v61, %v9090_v18  ;;  %v8428_v41 = vld [vmem:[%s9863_s11 + $0x118] sm:$0xff]   ;;  %v5171_v15 = vunpack.c.l.bf16 %v4440_v45 }
 0x45c   :  { %v5199_v4 = vpack.c.bf16 %v5183_v62, %v5183_v62  ;;  %v1168_v58 = vrot.slane %v9369_v61, %v9095_v20  ;;  %v8429_v18 = vld [vmem:[%s9863_s11 + $0x198] sm:$0xff]   ;;  %v8431_v20 = vld [vmem:[%s9863_s11 + $0x1e0] sm:$0xff]  }
 0x45d   :  { %6268 = vmatprep.mubr.bf16.mxu0 %v5197_v31  ;;  %v8321_v31 = vadd.f32 %v9235_v14, %v1156_v51  ;;  %v8433_v14 = vld [vmem:[%s9863_s11 + $0x1a0] sm:$0xff]   ;;  %v1172_v51 = vrot.slane %v9369_v61, %v9326_v42 }
 0x45e   :  { %6308 = vmatprep.mubr.bf16.mxu1 %v5199_v4  ;;  %6269 = vmatmul.mubr.bf16.vlgmr.msra.gmra.mrb[40].mxu0 %v5196_v11  ;;  %v8323_v11 = vadd.f32 %v9237_v19, %v1164_v53  ;;  %v8322_v4 = vadd.f32 %v9239_v39, %v1160_v54  ;;  %v8434_v19 = vld [vmem:[%s9863_s11 + $0x168] sm:$0xff]   ;;  %v1180_v53 = vrot.slane %v9369_v61, %v9332_v56 }
 0x45f   :  { %6309 = vmatmul.mubr.bf16.vlgmr.msra.gmra.mrb[40].mxu1 %v5198_v12  ;;  %8138 = vmatpush3.bf16.msra.mxu0 %v8416_v17  ;;  %v8435_v39 = vld [vmem:[%s9863_s11 + $0x1e8] sm:$0xff]   ;;  %v4425_v36 = vmax.f32 %v8321_v31, 0.0  ;;  %v1176_v54 = vrot.slane %v9369_v61, %v9329_v43 }
 0x460   :  { %8160 = vmatpush3.bf16.msra.mxu1 %v8417_v25  ;;  %8139 = vmatprep.subr.bf16.mxu0 %v8418_v29  ;;  %v8432_v29 = vld [vmem:[%s9863_s11 + $0x120] sm:$0xff]   ;;  %v4426_v22 = vmax.f32 %v8322_v4, 0.0  ;;  %v8327_v4 = vadd.f32 %v9315_v5, %v1180_v53 }
 0x461   :  { %8161 = vmatprep.subr.bf16.mxu1 %v8419_v33  ;;  %v8324_v33 = vadd.f32 %v9241_v21, %v1168_v58  ;;  %v4427_v21 = vmax.f32 %v8323_v11, 0.0  ;;  %v4441_v35 = vpack.c.bf16 %v4425_v36, %v4425_v36  ;;  %v1184_v58 = vrot.slane %v9369_v61, %v9335_v60  ;;  %v8447_v61 = vld [vmem:[%s9863_s11 + $0x2c0] sm:$0xff]  }
 0x462   :  { %v4442_v55 = vpack.c.bf16 %v4426_v22, %v4426_v22  ;;  %v8453_v22 = vld [vmem:[%s9863_s11 + $0x288] sm:$0xff]  }
 0x463   :  { %8140 = vmatpush3.bf16.msra.mxu0 %v8420_v23  ;;  %v8436_v23 = vld [vmem:[%s9863_s11 + $0x128] sm:$0xff]   ;;  %v4428_v26 = vmax.f32 %v8324_v33, 0.0  ;;  %v4443_v38 = vpack.c.bf16 %v4427_v21, %v4427_v21  ;;  %v8328_v33 = vadd.f32 %v9319_v7, %v1184_v58 }
 0x464   :  { %8162 = vmatpush3.bf16.msra.mxu1 %v8421_v27  ;;  %8141 = vmatprep.subr.bf16.mxu0 %v8422_v28  ;;  %v8437_v27 = vld [vmem:[%s9863_s11 + $0x1a8] sm:$0xff]   ;;  %v8438_v28 = vld [vmem:[%s9863_s11 + $0x170] sm:$0xff]  }
 0x465   :  { %8163 = vmatprep.subr.bf16.mxu1 %v8423_v34  ;;  %v8439_v34 = vld [vmem:[%s9863_s11 + $0x1f0] sm:$0xff]   ;;  %v4444_v45 = vpack.c.bf16 %v4428_v26, %v4428_v26  ;;  %v4432_v21 = vmax.f32 %v8328_v33, 0.0 }
 0x466   :  { %v8455_v26 = vld [vmem:[%s9863_s11 + $0x2d0] sm:$0xff]  }
 0x467   :  { %8142 = vmatpush3.bf16.msra.mxu0 %v8424_v44  ;;  %v4952_v57 = vpop.f32.mrb[28].mxu0  ;;  %v8440_v44 = vld [vmem:[%s9863_s11 + $0x130] sm:$0xff]  }
 0x468   :  { %8164 = vmatpush3.bf16.msra.mxu1 %v8425_v46  ;;  %v9394_v16 = vmul.f32 %v5168_v50, %v4952_v57  ;;  %v4993_v59 = vpop.f32.mrb[28].mxu1  ;;  %v4954_v62 = vpop.f32.mrb[29].mxu0  ;;  %8143 = vmatprep.subr.bf16.mxu0 %v8426_v47  ;;  %v8441_v46 = vld [vmem:[%s9863_s11 + $0x1b0] sm:$0xff]   ;;  %v8442_v47 = vld [vmem:[%s9863_s11 + $0x178] sm:$0xff]   ;;  %v5172_v50 = vunpack.c.l.bf16 %v4441_v35 }
 0x469   :  { %v9402_v63 = vmul.f32 %v5170_v52, %v4993_v59  ;;  %v5185_v1 = vmul.f32 %v5169_v10, %v4954_v62  ;;  %v4995_v49 = vpop.f32.mrb[29].mxu1  ;;  %8165 = vmatprep.subr.bf16.mxu1 %v8427_v48  ;;  %v4956_v3 = vpop.f32.mrb[30].mxu0  ;;  %v8443_v48 = vld [vmem:[%s9863_s11 + $0x1f8] sm:$0xff]   ;;  %v5174_v52 = vunpack.c.l.bf16 %v4443_v38  ;;  %v5173_v10 = vunpack.c.l.bf16 %v4442_v55  ;;  %v8456_v35 = vld [vmem:[%s9863_s11 + $0x210] sm:$0xff]  }
 0x46a   :  { %v5187_v8 = vmul.f32 %v5171_v15, %v4995_v49  ;;  %v4997_v17 = vpop.f32.mrb[30].mxu1  ;;  %v4957_v9 = vpop.f32.mrb[31].mxu0  ;;  %v5175_v15 = vunpack.c.l.bf16 %v4444_v45  ;;  %v4448_v38 = vpack.c.bf16 %v4432_v21, %v4432_v21  ;;  %v8457_v55 = vld [vmem:[%s9863_s11 + $0x290] sm:$0xff]   ;;  %v8459_v45 = vld [vmem:[%s9863_s11 + $0x2d8] sm:$0xff]  }
 0x46b   :  { %v5201_v25 = vpack.c.bf16 %v5185_v1, %v5185_v1  ;;  %8144 = vmatpush3.bf16.msra.mxu0 %v8428_v41  ;;  %v4998_v12 = vpop.f32.mrb[31].mxu1  ;;  %v8444_v41 = vld [vmem:[%s9863_s11 + $0x138] sm:$0xff]   ;;  %v8446_v1 = vld [vmem:[%s9863_s11 + $0x240] sm:$0xff]   ;;  %v5202_v5 = vpack.c.bf16 %v9402_v63, %v9402_v63  ;;  %v8452_v63 = vld [vmem:[%s9863_s11 + $0x208] sm:$0xff]  }
 0x46c   :  { %v5203_v13 = vpack.c.bf16 %v5187_v8, %v5187_v8  ;;  %8166 = vmatpush3.bf16.msra.mxu1 %v8429_v18  ;;  %8145 = vmatprep.subr.bf16.mxu0 %v8430_v40  ;;  %v8445_v40 = vld [vmem:[%s9863_s11 + $0x1b8] sm:$0xff]   ;;  %v8325_v8 = vadd.f32 %v9312_v2, %v1172_v51  ;;  %v8449_v2 = vld [vmem:[%s9863_s11 + $0x280] sm:$0xff]   ;;  %v8473_v33 = vld [vmem:[%s9863_s11 + $0x2b0] sm:$0xff]  }
 0x46d   :  { %6348 = vmatprep.mubr.bf16.mxu0 %v5201_v25  ;;  %8167 = vmatprep.subr.bf16.mxu1 %v8431_v20  ;;  %v8326_v25 = vadd.f32 %v9317_v6, %v1176_v54  ;;  %v8460_v51 = vld [vmem:[%s9863_s11 + $0x218] sm:$0xff]  }
 0x46e   :  { %6388 = vmatprep.mubr.bf16.mxu1 %v5203_v13  ;;  %v5200_v13 = vpack.c.bf16 %v9394_v16, %v9394_v16  ;;  %v4429_v7 = vmax.f32 %v8325_v8, 0.0  ;;  %v8451_v16 = vld [vmem:[%s9863_s11 + $0x2c8] sm:$0xff]   ;;  %v8465_v8 = vld [vmem:[%s9863_s11 + $0x2a0] sm:$0xff]  }
 0x46f   :  { %8146 = vmatpush3.bf16.msra.mxu0 %v8432_v29  ;;  %v8448_v29 = vld [vmem:[%s9863_s11 + $0x200] sm:$0xff]   ;;  %v4430_v36 = vmax.f32 %v8326_v25, 0.0  ;;  %v8470_v25 = vld [vmem:[%s9863_s11 + $0x270] sm:$0xff]  }
 0x470   :  { %8168 = vmatpush3.bf16.msra.mxu1 %v8433_v14  ;;  %8147 = vmatprep.subr.bf16.mxu0 %v8434_v19  ;;  %v8450_v19 = vld [vmem:[%s9863_s11 + $0x248] sm:$0xff]  }
 0x471   :  { %8169 = vmatprep.subr.bf16.mxu1 %v8435_v39  ;;  %v4431_v39 = vmax.f32 %v8327_v4, 0.0  ;;  %v8469_v4 = vld [vmem:[%s9863_s11 + $0x2a8] sm:$0xff]  }
 0x473   :  { %8148 = vmatpush3.bf16.msra.mxu0 %v8436_v23  ;;  %v8454_v23 = vld [vmem:[%s9863_s11 + $0x250] sm:$0xff]  }
 0x474   :  { %8170 = vmatpush3.bf16.msra.mxu1 %v8437_v27  ;;  %8149 = vmatprep.subr.bf16.mxu0 %v8438_v28  ;;  %v4445_v27 = vpack.c.bf16 %v4429_v7, %v4429_v7  ;;  %v4447_v28 = vpack.c.bf16 %v4431_v39, %v4431_v39  ;;  %v8480_v7 = vld [vmem:[%s9863_s11 + $0x300] sm:$0xff]  }
 0x475   :  { %8171 = vmatprep.subr.bf16.mxu1 %v8439_v34  ;;  %v4446_v34 = vpack.c.bf16 %v4430_v36, %v4430_v36  ;;  %v8481_v39 = vld [vmem:[%s9863_s11 + $0x380] sm:$0xff]  }
 0x477   :  { %8150 = vmatpush3.bf16.msra.mxu0 %v8440_v44  ;;  %v5034_v57 = vpop.f32.mrb[32].mxu0  ;;  %v8458_v44 = vld [vmem:[%s9863_s11 + $0x258] sm:$0xff]  }
 0x478   :  { %8172 = vmatpush3.bf16.msra.mxu1 %v8441_v46  ;;  %v9458_v59 = vmul.f32 %v5172_v50, %v5034_v57  ;;  %v5075_v62 = vpop.f32.mrb[32].mxu1  ;;  %v5036_v18 = vpop.f32.mrb[33].mxu0  ;;  %8151 = vmatprep.subr.bf16.mxu0 %v8442_v47  ;;  %v5176_v46 = vunpack.c.l.bf16 %v4445_v27  ;;  %v5178_v47 = vunpack.c.l.bf16 %v4447_v28  ;;  %v8461_v57 = vld [vmem:[%s9863_s11 + $0x298] sm:$0xff]   ;;  %v8487_v27 = vld [vmem:[%s9863_s11 + $0x3d0] sm:$0xff]  }
 0x479   :  { %v9466_v49 = vmul.f32 %v5174_v52, %v5075_v62  ;;  %v5189_v20 = vmul.f32 %v5173_v10, %v5036_v18  ;;  %v5077_v3 = vpop.f32.mrb[33].mxu1  ;;  %8173 = vmatprep.subr.bf16.mxu1 %v8443_v48  ;;  %v5038_v31 = vpop.f32.mrb[34].mxu0  ;;  %v5177_v48 = vunpack.c.l.bf16 %v4446_v34  ;;  %v5179_v52 = vunpack.c.l.bf16 %v4448_v38  ;;  %v8463_v18 = vld [vmem:[%s9863_s11 + $0x2e0] sm:$0xff]   ;;  %v8488_v28 = vld [vmem:[%s9863_s11 + $0x310] sm:$0xff]   ;;  %v8491_v38 = vld [vmem:[%s9863_s11 + $0x3d8] sm:$0xff]  }
 0x47a   :  { %v5191_v17 = vmul.f32 %v5175_v15, %v5077_v3  ;;  %v5079_v9 = vpop.f32.mrb[34].mxu1  ;;  %v5039_v11 = vpop.f32.mrb[35].mxu0  ;;  %v8489_v34 = vld [vmem:[%s9863_s11 + $0x390] sm:$0xff]  }
 0x47b   :  { %8152 = vmatpush3.bf16.msra.mxu0 %v8444_v41  ;;  %v5080_v12 = vpop.f32.mrb[35].mxu1  ;;  %v5205_v14 = vpack.c.bf16 %v5189_v20, %v5189_v20  ;;  %v8462_v41 = vld [vmem:[%s9863_s11 + $0x260] sm:$0xff]   ;;  %v8467_v9 = vld [vmem:[%s9863_s11 + $0x2e8] sm:$0xff]   ;;  %v5206_v36 = vpack.c.bf16 %v9466_v49, %v9466_v49 }
 0x47c   :  { %8174 = vmatpush3.bf16.msra.mxu1 %v8445_v40  ;;  %8181 = vmatprep.subr.bf16.mxu0 %v8446_v1  ;;  %v5207_v6 = vpack.c.bf16 %v5191_v17, %v5191_v17  ;;  %v8466_v17 = vld [vmem:[%s9863_s11 + $0x268] sm:$0xff]   ;;  %v8472_v12 = vld [vmem:[%s9863_s11 + $0x230] sm:$0xff]  }
 0x47d   :  { %8203 = vmatprep.subr.bf16.mxu1 %v8447_v61  ;;  %v8464_v61 = vld [vmem:[%s9863_s11 + $0x220] sm:$0xff]   ;;  %v8468_v11 = vld [vmem:[%s9863_s11 + $0x228] sm:$0xff]  }
 0x47e   :  { %6349 = vmatmul.mubr.bf16.vlgmr.msra.gmra.mrb[44].mxu0 %v5200_v13  ;;  %v8474_v13 = vld [vmem:[%s9863_s11 + $0x278] sm:$0xff]   ;;  %v8485_v49 = vld [vmem:[%s9863_s11 + $0x388] sm:$0xff]  }
 0x47f   :  { %6389 = vmatmul.mubr.bf16.vlgmr.msra.gmra.mrb[44].mxu1 %v5202_v5  ;;  %8182 = vmatpush3.bf16.msra.mxu0 %v8448_v29  ;;  %v8471_v29 = vld [vmem:[%s9863_s11 + $0x2f0] sm:$0xff]   ;;  %v8477_v5 = vld [vmem:[%s9863_s11 + $0x2b8] sm:$0xff]  }
 0x480   :  { %6428 = vmatprep.mubr.bf16.mxu0 %v5205_v14  ;;  %8204 = vmatpush3.bf16.msra.mxu1 %v8449_v2  ;;  %v8475_v14 = vld [vmem:[%s9863_s11 + $0x2f8] sm:$0xff]  }
 0x481   :  { %6468 = vmatprep.mubr.bf16.mxu1 %v5207_v6  ;;  %8183 = vmatprep.subr.bf16.mxu0 %v8450_v19  ;;  %v8476_v2 = vld [vmem:[%s9863_s11 + $0x238] sm:$0xff]   ;;  %v8478_v6 = vld [vmem:[%s9863_s11 + $0x340] sm:$0xff]  }
 0x482   :  { %8205 = vmatprep.subr.bf16.mxu1 %v8451_v16  ;;  %v8479_v19 = vld [vmem:[%s9863_s11 + $0x3c0] sm:$0xff]   ;;  %v5204_v16 = vpack.c.bf16 %v9458_v59, %v9458_v59  ;;  %v8483_v59 = vld [vmem:[%s9863_s11 + $0x3c8] sm:$0xff]  }
 0x483   :  { %8184 = vmatpush3.bf16.msra.mxu0 %v8452_v63  ;;  %v8482_v63 = vld [vmem:[%s9863_s11 + $0x348] sm:$0xff]  }
 0x484   :  { %8206 = vmatpush3.bf16.msra.mxu1 %v8453_v22  ;;  %8185 = vmatprep.subr.bf16.mxu0 %v8454_v23  ;;  %v8484_v23 = vld [vmem:[%s9863_s11 + $0x308] sm:$0xff]  }
 0x485   :  { %8207 = vmatprep.subr.bf16.mxu1 %v8455_v26  ;;  %v8486_v26 = vld [vmem:[%s9863_s11 + $0x350] sm:$0xff]  }
 0x487   :  { %8186 = vmatpush3.bf16.msra.mxu0 %v8456_v35  ;;  %v5116_v50 = vpop.f32.mrb[36].mxu0  ;;  %v8490_v35 = vld [vmem:[%s9863_s11 + $0x358] sm:$0xff]  }
 0x488   :  { %8208 = vmatpush3.bf16.msra.mxu1 %v8457_v55  ;;  %v9518_v10 = vmul.f32 %v5176_v46, %v5116_v50  ;;  %v5157_v53 = vpop.f32.mrb[36].mxu1  ;;  %v5118_v54 = vpop.f32.mrb[37].mxu0  ;;  %8187 = vmatprep.subr.bf16.mxu0 %v8458_v44  ;;  %v8492_v55 = vld [vmem:[%s9863_s11 + $0x318] sm:$0xff]   ;;  %v8495_v46 = vld [vmem:[%s9863_s11 + $0x3e0] sm:$0xff]   ;;  %v8498_v50 = vld [vmem:[%s9863_s11 + $0x368] sm:$0xff]  }
 0x489   :  { %v9526_v15 = vmul.f32 %v5178_v47, %v5157_v53  ;;  %v5193_v58 = vmul.f32 %v5177_v48, %v5118_v54  ;;  %v5159_v62 = vpop.f32.mrb[37].mxu1  ;;  %8209 = vmatprep.subr.bf16.mxu1 %v8459_v45  ;;  %v5120_v40 = vpop.f32.mrb[38].mxu0  ;;  %v8493_v44 = vld [vmem:[%s9863_s11 + $0x398] sm:$0xff]   ;;  %v8494_v45 = vld [vmem:[%s9863_s11 + $0x360] sm:$0xff]   ;;  %v8501_v53 = vld [vmem:[%s9863_s11 + $0x3a8] sm:$0xff]  }
 0x48a   :  { %v5195_v1 = vmul.f32 %v5179_v52, %v5159_v62  ;;  %v5121_v20 = vpop.f32.mrb[39].mxu0  ;;  %v5161_v3 = vpop.f32.mrb[38].mxu1  ;;  %v8496_v47 = vld [vmem:[%s9863_s11 + $0x320] sm:$0xff]   ;;  %v8500_v52 = vld [vmem:[%s9863_s11 + $0x328] sm:$0xff]   ;;  %v8502_v54 = vld [vmem:[%s9863_s11 + $0x370] sm:$0xff]  }
 0x48b   :  { %8188 = vmatpush3.bf16.msra.mxu0 %v8460_v51  ;;  %v5162_v31 = vpop.f32.mrb[39].mxu1  ;;  %v5209_v21 = vpack.c.bf16 %v5193_v58, %v5193_v58  ;;  %v8497_v48 = vld [vmem:[%s9863_s11 + $0x3a0] sm:$0xff]   ;;  %v8499_v51 = vld [vmem:[%s9863_s11 + $0x3e8] sm:$0xff]   ;;  %v8505_v58 = vld [vmem:[%s9863_s11 + $0x3b0] sm:$0xff]   ;;  %v5208_v20 = vpack.c.bf16 %v9518_v10, %v9518_v10  ;;  %v5210_v3 = vpack.c.bf16 %v9526_v15, %v9526_v15 }
 0x48c   :  { %8210 = vmatpush3.bf16.msra.mxu1 %v8461_v57  ;;  %8189 = vmatprep.subr.bf16.mxu0 %v8462_v41  ;;  %v5211_v22 = vpack.c.bf16 %v5195_v1, %v5195_v1  ;;  %v8503_v57 = vld [vmem:[%s9863_s11 + $0x3f0] sm:$0xff]   ;;  %v8506_v62 = vld [vmem:[%s9863_s11 + $0x378] sm:$0xff]   ;;  %v8522_v15 = vld [vmem:[%s9865_s13 + $0x40] sm:$0xff]  }
 0x48d   :  { %8211 = vmatprep.subr.bf16.mxu1 %v8463_v18  ;;  %v8504_v41 = vld [vmem:[%s9863_s11 + $0x330] sm:$0xff]   ;;  %v8507_v18 = vld [vmem:[%s9863_s11 + $0x3f8] sm:$0xff]  }
 0x48e   :  { %v8508_v40 = vld [vmem:[%s9863_s11 + $0x338] sm:$0xff]  }
 0x48f   :  { %8190 = vmatpush3.bf16.msra.mxu0 %v8464_v61  ;;  %v8509_v1 = vld [vmem:[%s9863_s11 + $0x3b8] sm:$0xff]  }
 0x490   :  { %8212 = vmatpush3.bf16.msra.mxu1 %v8465_v8  ;;  %8191 = vmatprep.subr.bf16.mxu0 %v8466_v17  ;;  %v8512_v61 = vld [vmem:[#allocation18 + $0x4] ss:$16 sps:$4 sm:$0xff]   ;;  %v8515_v31 = vld [vmem:[#allocation18 + $0xc] ss:$16 sps:$4 sm:$0xff]   ;;  %v8510_v8 = vld [vmem:[#allocation18] ss:$16 sps:$4 sm:$0xff]  }
 0x491   :  { %8213 = vmatprep.subr.bf16.mxu1 %v8467_v9  ;;  %v8513_v17 = vld [vmem:[#allocation18 + $0x8] ss:$16 sps:$4 sm:$0xff]   ;;  %v8518_v9 = vld [vmem:[#allocation18 + $0x24] ss:$16 sps:$4 sm:$0xff]   ;;  %v8521_v10 = vld [vmem:[#allocation18 + $0x2c] ss:$16 sps:$4 sm:$0xff]  }
 0x493   :  { %8192 = vmatpush3.bf16.msra.mxu0 %v8468_v11  ;;  %v8516_v11 = vld [vmem:[#allocation18 + $0x20] ss:$16 sps:$4 sm:$0xff]  }
 0x494   :  { %8214 = vmatpush3.bf16.msra.mxu1 %v8469_v4  ;;  %8193 = vmatprep.subr.bf16.mxu0 %v8470_v25  ;;  %v8519_v4 = vld [vmem:[#allocation18 + $0x28] ss:$16 sps:$4 sm:$0xff]  }
 0x495   :  { %8215 = vmatprep.subr.bf16.mxu1 %v8471_v29  ;;  %v8524_v25 = vld [vmem:[%s9865_s13 + $0xc0] sm:$0xff]  }
 0x497   :  { %8194 = vmatpush3.bf16.msra.mxu0 %v8472_v12 }
 0x498   :  { %8216 = vmatpush3.bf16.msra.mxu1 %v8473_v33  ;;  %8195 = vmatprep.subr.bf16.mxu0 %v8474_v13 }
 0x499   :  { %8217 = vmatprep.subr.bf16.mxu1 %v8475_v14 }
 0x49b   :  { %8196 = vmatpush3.bf16.msra.mxu0 %v8476_v2 }
 0x49c   :  { %8218 = vmatpush3.bf16.msra.mxu1 %v8477_v5  ;;  %8225 = vmatprep.subr.bf16.mxu0 %v8478_v6 }
 0x49d   :  { %8247 = vmatprep.subr.bf16.mxu1 %v8479_v19 }
 0x49e   :  { %6429 = vmatmul.mubr.bf16.vlgmr.msra.gmra.mrb[48].mxu0 %v5204_v16 }
 0x49f   :  { %6469 = vmatmul.mubr.bf16.vlgmr.msra.gmra.mrb[48].mxu1 %v5206_v36  ;;  %8226 = vmatpush3.bf16.msra.mxu0 %v8480_v7 }
 0x4a0   :  { %6508 = vmatprep.mubr.bf16.mxu0 %v5209_v21  ;;  %8248 = vmatpush3.bf16.msra.mxu1 %v8481_v39 }
 0x4a1   :  { %6548 = vmatprep.mubr.bf16.mxu1 %v5211_v22  ;;  %8227 = vmatprep.subr.bf16.mxu0 %v8482_v63 }
 0x4a2   :  { %8249 = vmatprep.subr.bf16.mxu1 %v8483_v59 }
 0x4a3   :  { %8228 = vmatpush3.bf16.msra.mxu0 %v8484_v23 }
 0x4a4   :  { %8250 = vmatpush3.bf16.msra.mxu1 %v8485_v49  ;;  %8229 = vmatprep.subr.bf16.mxu0 %v8486_v26 }
 0x4a5   :  { %8251 = vmatprep.subr.bf16.mxu1 %v8487_v27 }
 0x4a7   :  { %8230 = vmatpush3.bf16.msra.mxu0 %v8488_v28 }
 0x4a8   :  { %8252 = vmatpush3.bf16.msra.mxu1 %v8489_v34  ;;  %8231 = vmatprep.subr.bf16.mxu0 %v8490_v35 }
 0x4a9   :  { %8253 = vmatprep.subr.bf16.mxu1 %v8491_v38 }
 0x4ab   :  { %8232 = vmatpush3.bf16.msra.mxu0 %v8492_v55 }
 0x4ac   :  { %8254 = vmatpush3.bf16.msra.mxu1 %v8493_v44  ;;  %8233 = vmatprep.subr.bf16.mxu0 %v8494_v45 }
 0x4ad   :  { %8255 = vmatprep.subr.bf16.mxu1 %v8495_v46 }
 0x4af   :  { %8234 = vmatpush3.bf16.msra.mxu0 %v8496_v47 }
 0x4b0   :  { %8256 = vmatpush3.bf16.msra.mxu1 %v8497_v48  ;;  %8235 = vmatprep.subr.bf16.mxu0 %v8498_v50 }
 0x4b1   :  { %8257 = vmatprep.subr.bf16.mxu1 %v8499_v51 }
 0x4b3   :  { %8236 = vmatpush3.bf16.msra.mxu0 %v8500_v52 }
 0x4b4   :  { %8258 = vmatpush3.bf16.msra.mxu1 %v8501_v53  ;;  %8237 = vmatprep.subr.bf16.mxu0 %v8502_v54 }
 0x4b5   :  { %8259 = vmatprep.subr.bf16.mxu1 %v8503_v57 }
 0x4b7   :  { %8238 = vmatpush3.bf16.msra.mxu0 %v8504_v41 }
 0x4b8   :  { %8260 = vmatpush3.bf16.msra.mxu1 %v8505_v58  ;;  %8239 = vmatprep.subr.bf16.mxu0 %v8506_v62 }
 0x4b9   :  { %8261 = vmatprep.subr.bf16.mxu1 %v8507_v18 }
 0x4bb   :  { %8240 = vmatpush3.bf16.msra.mxu0 %v8508_v40 }
 0x4bc   :  { %8262 = vmatpush3.bf16.msra.mxu1 %v8509_v1  ;;  %6609 = vmatprep.subr.bf16.mxu0 %v8512_v61 }
 0x4bd   :  { %6650 = vmatprep.subr.bf16.mxu1 %v8515_v31 }
 0x4be   :  { %6509 = vmatmul.mubr.bf16.vlgmr.msra.gmra.mrb[52].mxu0 %v5208_v20 }
 0x4bf   :  { %6549 = vmatmul.mubr.bf16.vlgmr.msra.gmra.mrb[52].mxu1 %v5210_v3  ;;  %6641 = vmatprep.mubr.bf16.mxu0 %v8844_v0 }
 0x4c0   :  { %6682 = vmatprep.mubr.bf16.mxu1 %v8844_v0  ;;  %6610 = vmatpush1.bf16.msra.mxu0 %v8510_v8  ;;  %v8523_v8 = vld [vmem:[%s9865_s13] sm:$0xff]  }
 0x4c1   :  { %6651 = vmatpush1.bf16.msra.mxu1 %v8513_v17  ;;  %6611 = vmatprep.subr.bf16.mxu0 %v8518_v9  ;;  %v8525_v17 = vld [vmem:[%s9865_s13 + $0x80] sm:$0xff]  }
 0x4c2   :  { %6652 = vmatprep.subr.bf16.mxu1 %v8521_v10  ;;  %v8526_v10 = vld [vmem:[%s9865_s13 + $0x48] sm:$0xff]  }
 0x4c4   :  { %6612 = vmatpush1.bf16.msra.mxu0 %v8516_v11  ;;  %v8528_v11 = vld [vmem:[%s9865_s13 + $0xc8] sm:$0xff]  }
 0x4c5   :  { %6653 = vmatpush1.bf16.msra.mxu1 %v8519_v4  ;;  %8269 = vmatprep.subr.bf16.mxu0 %v8522_v15  ;;  %v8527_v4 = vld [vmem:[%s9865_s13 + $0x8] sm:$0xff]  }
 0x4c6   :  { %8291 = vmatprep.subr.bf16.mxu1 %v8524_v25  ;;  %v8529_v15 = vld [vmem:[%s9865_s13 + $0x88] sm:$0xff]   ;;  %v8530_v25 = vld [vmem:[%s9865_s13 + $0x50] sm:$0xff]  }
 0x531   :  { %v8109_v29 = vpop.f32.mrb[40].mxu0 }
 0x532   :  { %v8131_v12 = vpop.f32.mrb[40].mxu1  ;;  %v8110_v33 = vpop.f32.mrb[41].mxu0 }
 0x533   :  { %v8111_v13 = vadd.f32 %v8110_v33, %v8109_v29  ;;  %v8132_v14 = vpop.f32.mrb[41].mxu1  ;;  %v8112_v2 = vpop.f32.mrb[42].mxu0  ;;  %v8532_v29 = vld [vmem:[%s9865_s13 + $0xd0] sm:$0xff]  }
 0x534   :  { %v8133_v5 = vadd.f32 %v8132_v14, %v8131_v12  ;;  %v8134_v6 = vpop.f32.mrb[42].mxu1  ;;  %v8113_v19 = vpop.f32.mrb[43].mxu0  ;;  %v8531_v12 = vld [vmem:[%s9865_s13 + $0x10] sm:$0xff]   ;;  %v8536_v14 = vld [vmem:[%s9865_s13 + $0xd8] sm:$0xff]  }
 0x535   :  { %v8135_v7 = vpop.f32.mrb[43].mxu1  ;;  %v8533_v33 = vld [vmem:[%s9865_s13 + $0x90] sm:$0xff]   ;;  %v8535_v2 = vld [vmem:[%s9865_s13 + $0x18] sm:$0xff]   ;;  %v8538_v6 = vld [vmem:[%s9865_s13 + $0x60] sm:$0xff]  }
 0x536   :  { %v6311_v16 = vadd.f32 %v8133_v5, %v8111_v13  ;;  %v8534_v13 = vld [vmem:[%s9865_s13 + $0x58] sm:$0xff]   ;;  %v8540_v19 = vld [vmem:[%s9865_s13 + $0xe0] sm:$0xff]  }
 0x537   :  { %v8537_v5 = vld [vmem:[%s9865_s13 + $0x98] sm:$0xff]   ;;  %v8539_v7 = vld [vmem:[%s9865_s13 + $0x20] sm:$0xff]  }
 0x551   :  { %v8153_v39 = vpop.f32.mrb[44].mxu0 }
 0x552   :  { %v8175_v36 = vpop.f32.mrb[44].mxu1  ;;  %v8154_v63 = vpop.f32.mrb[45].mxu0 }
 0x553   :  { %v8155_v21 = vadd.f32 %v8154_v63, %v8153_v39  ;;  %v8176_v59 = vpop.f32.mrb[45].mxu1  ;;  %v8156_v22 = vpop.f32.mrb[46].mxu0  ;;  %v8542_v39 = vld [vmem:[%s9865_s13 + $0x68] sm:$0xff]  }
 0x554   :  { %v8177_v23 = vadd.f32 %v8176_v59, %v8175_v36  ;;  %v8178_v49 = vpop.f32.mrb[46].mxu1  ;;  %v8157_v26 = vpop.f32.mrb[47].mxu0  ;;  %v8544_v36 = vld [vmem:[%s9865_s13 + $0xe8] sm:$0xff]   ;;  %v8546_v59 = vld [vmem:[%s9865_s13 + $0x70] sm:$0xff]  }
 0x555   :  { %v6351_v27 = vadd.f32 %v8155_v21, %v6311_v16  ;;  %v8179_v28 = vpop.f32.mrb[47].mxu1  ;;  %v8541_v16 = vld [vmem:[%s9865_s13 + $0xa0] sm:$0xff]   ;;  %v8543_v63 = vld [vmem:[%s9865_s13 + $0x28] sm:$0xff]   ;;  %v8548_v22 = vld [vmem:[%s9865_s13 + $0xf0] sm:$0xff]  }
 0x556   :  { %v8545_v21 = vld [vmem:[%s9865_s13 + $0xa8] sm:$0xff]   ;;  %v8549_v49 = vld [vmem:[%s9865_s13 + $0xb0] sm:$0xff]   ;;  %v8550_v26 = vld [vmem:[%s9865_s13 + $0x78] sm:$0xff]  }
 0x557   :  { %v6391_v34 = vadd.f32 %v8177_v23, %v6351_v27  ;;  %v8547_v23 = vld [vmem:[%s9865_s13 + $0x30] sm:$0xff]   ;;  %v8551_v27 = vld [vmem:[%s9865_s13 + $0x38] sm:$0xff]  }
 0x558   :  { %v8552_v28 = vld [vmem:[%s9865_s13 + $0xf8] sm:$0xff]  }
 0x571   :  { %v8197_v35 = vpop.f32.mrb[48].mxu0 }
 0x572   :  { %v8219_v38 = vpop.f32.mrb[48].mxu1  ;;  %v8198_v55 = vpop.f32.mrb[49].mxu0 }
 0x573   :  { %v8199_v44 = vadd.f32 %v8198_v55, %v8197_v35  ;;  %v8220_v45 = vpop.f32.mrb[49].mxu1  ;;  %v8200_v46 = vpop.f32.mrb[50].mxu0  ;;  %v9777_v35 = vld [vmem:[#allocation2] sm:$0xff] }
 0x574   :  { %v8221_v47 = vadd.f32 %v8220_v45, %v8219_v38  ;;  %v8222_v48 = vpop.f32.mrb[50].mxu1  ;;  %v8201_v50 = vpop.f32.mrb[51].mxu0  ;;  %6768 = vrot.lane.b32.xlu0 %v9777_v35, %s8845_s27  ;;  %6776 = vrot.lane.b32.xlu1 %v9777_v35, %s8846_s29  ;;  %v8572_v38 = vld [vmem:[#allocation10] sm:$0xff] }
 0x575   :  { %v6431_v51 = vadd.f32 %v8199_v44, %v6391_v34  ;;  %v8223_v52 = vpop.f32.mrb[51].mxu1  ;;  %v8553_v34 = vld [vmem:[%s9865_s13 + $0xb8] sm:$0xff]   ;;  %v240_v55 = vrot.slane %v8572_v38, %v9326_v42  ;;  %v248_v44 = vrot.slane %v8572_v38, %v9332_v56  ;;  %v244_v45 = vrot.slane %v8572_v38, %v9329_v43 }
 0x576   :  { %v252_v46 = vrot.slane %v8572_v38, %v9335_v60 }
 0x577   :  { %v6471_v53 = vadd.f32 %v8221_v47, %v6431_v51  ;;  %v542_v47 = vadd.f32 %v9115_v24, %v240_v55  ;;  %v583_v48 = vadd.f32 %v9119_v32, %v248_v44  ;;  %v544_v50 = vadd.f32 %v9117_v30, %v244_v45 }
 0x578   :  { %6772 = vrot.lane.b32.xlu0 %v9777_v35, %s8847_s17  ;;  %v585_v51 = vadd.f32 %v9121_v37, %v252_v46 }
 0x579   :  { %v593_v52 = vmax.f32 %v542_v47, 0.0 }
 0x591   :  { %v8241_v54 = vpop.f32.mrb[52].mxu0 }
 0x592   :  { %v8263_v57 = vpop.f32.mrb[52].mxu1  ;;  %v8242_v41 = vpop.f32.mrb[53].mxu0 }
 0x593   :  { %v8243_v58 = vadd.f32 %v8242_v41, %v8241_v54  ;;  %v8264_v62 = vpop.f32.mrb[53].mxu1  ;;  %v8244_v18 = vpop.f32.mrb[54].mxu0  ;;  %v594_v54 = vmax.f32 %v544_v50, 0.0  ;;  %v601_v41 = vpack.c.bf16 %v593_v52, %v593_v52 }
 0x594   :  { %v8265_v40 = vadd.f32 %v8264_v62, %v8263_v57  ;;  %v8266_v1 = vpop.f32.mrb[54].mxu1  ;;  %v8245_v20 = vpop.f32.mrb[55].mxu0  ;;  %v596_v57 = vmax.f32 %v585_v51, 0.0 }
 0x595   :  { %v6511_v3 = vadd.f32 %v8243_v58, %v6471_v53  ;;  %v8267_v61 = vpop.f32.mrb[55].mxu1  ;;  %v595_v53 = vmax.f32 %v583_v48, 0.0  ;;  %v602_v58 = vpack.c.bf16 %v594_v54, %v594_v54  ;;  %v6691_v62 = vunpack.c.l.bf16 %v601_v41  ;;  %v8079_v41 = vld [vmem:[#allocation15] ss:$0 sm:$0xff] }
 0x596   :  { %v604_v56 = vpack.c.bf16 %v596_v57, %v596_v57 }
 0x597   :  { %v6551_v31 = vadd.f32 %v8265_v40, %v6511_v3  ;;  %v603_v42 = vpack.c.bf16 %v595_v53, %v595_v53  ;;  %v6692_v18 = vunpack.c.l.bf16 %v602_v58 }
 0x598   :  { %v6694_v60 = vunpack.c.l.bf16 %v604_v56 }
 0x599   :  { %v6556_v9 = vpack.c.bf16 %v6551_v31, %v6551_v31  ;;  %v6693_v43 = vunpack.c.l.bf16 %v603_v42 }
 0x59b   :  { %8045 = vmatmul.mubr.msk.bf16.vlgmr.msra.gmra.mrb[56].mxu0 %vm6605_vm1, %v6556_v9  ;;  %8046 = vmatmul.mubr.msk.bf16.vlgmr.msra.gmra.mrb[56].mxu1 %vm6605_vm1, %v6556_v9  ;;  %v7062_v9 = vld [vmem:[#allocation6 + $0x8] sm:$0xff] }
 0x59c   :  { %8270 = vmatpush3.bf16.msra.mxu0 %v8523_v8  ;;  %8292 = vmatpush3.bf16.msra.mxu1 %v8525_v17 }
 0x59d   :  { %8271 = vmatprep.subr.bf16.mxu0 %v8526_v10  ;;  %8293 = vmatprep.subr.bf16.mxu1 %v8528_v11  ;;  %v7213_v10 = vld [vmem:[#allocation7 + $0x8] sm:$0xff] }
 0x5a0   :  { %8272 = vmatpush3.bf16.msra.mxu0 %v8527_v4  ;;  %8294 = vmatpush3.bf16.msra.mxu1 %v8529_v15  ;;  %v8554_v15 = vld [vmem:[%s9860_s8] sm:$0xff]  }
 0x5a1   :  { %8273 = vmatprep.subr.bf16.mxu0 %v8530_v25  ;;  %8295 = vmatprep.subr.bf16.mxu1 %v8532_v29 }
 0x5a4   :  { %8274 = vmatpush3.bf16.msra.mxu0 %v8531_v12  ;;  %8296 = vmatpush3.bf16.msra.mxu1 %v8533_v33  ;;  %v7064_v12 = vpack.c.bf16 %v7062_v9, %v7062_v9  ;;  %v7215_v33 = vpack.c.bf16 %v7213_v10, %v7213_v10 }
 0x5a5   :  { %8275 = vmatprep.subr.bf16.mxu0 %v8534_v13  ;;  %8297 = vmatprep.subr.bf16.mxu1 %v8536_v14  ;;  %v8555_v13 = vld [vmem:[%s9860_s8 + $0x8] sm:$0xff]   ;;  %v8556_v14 = vld [vmem:[%s9860_s8 + $0x10] sm:$0xff]  }
 0x5a8   :  { %8276 = vmatpush3.bf16.msra.mxu0 %v8535_v2  ;;  %8298 = vmatpush3.bf16.msra.mxu1 %v8537_v5  ;;  %v8557_v2 = vld [vmem:[%s9860_s8 + $0x18] sm:$0xff]   ;;  %v8558_v5 = vld [vmem:[%s9860_s8 + $0x20] sm:$0xff]  }
 0x5a9   :  { %8277 = vmatprep.subr.bf16.mxu0 %v8538_v6  ;;  %8299 = vmatprep.subr.bf16.mxu1 %v8540_v19  ;;  %v8559_v6 = vld [vmem:[%s9860_s8 + $0x28] sm:$0xff]   ;;  %v8560_v19 = vld [vmem:[%s9860_s8 + $0x30] sm:$0xff]  }
 0x5ac   :  { %8278 = vmatpush3.bf16.msra.mxu0 %v8539_v7  ;;  %8300 = vmatpush3.bf16.msra.mxu1 %v8541_v16  ;;  %v8561_v7 = vld [vmem:[%s9860_s8 + $0x38] sm:$0xff]   ;;  %v8562_v16 = vld [vmem:[%s9860_s8 + $0x40] sm:$0xff]  }
 0x5ad   :  { %8279 = vmatprep.subr.bf16.mxu0 %v8542_v39  ;;  %8301 = vmatprep.subr.bf16.mxu1 %v8544_v36  ;;  %v8563_v39 = vld [vmem:[%s9860_s8 + $0x48] sm:$0xff]   ;;  %v8564_v36 = vld [vmem:[%s9860_s8 + $0x50] sm:$0xff]  }
 0x5b0   :  { %8280 = vmatpush3.bf16.msra.mxu0 %v8543_v63  ;;  %8302 = vmatpush3.bf16.msra.mxu1 %v8545_v21  ;;  %v7061_v63 = vld [vmem:[#allocation6] sm:$0xff]  ;;  %v7212_v21 = vld [vmem:[#allocation7] sm:$0xff] }
 0x5b1   :  { %8281 = vmatprep.subr.bf16.mxu0 %v8546_v59  ;;  %8303 = vmatprep.subr.bf16.mxu1 %v8548_v22  ;;  %v7063_v59 = vpack.c.bf16 %v7061_v63, %v7061_v63  ;;  %v7214_v22 = vpack.c.bf16 %v7212_v21, %v7212_v21 }
 0x5b4   :  { %8282 = vmatpush3.bf16.msra.mxu0 %v8547_v23  ;;  %8304 = vmatpush3.bf16.msra.mxu1 %v8549_v49 }
 0x5b5   :  { %8283 = vmatprep.subr.bf16.mxu0 %v8550_v26  ;;  %8305 = vmatprep.subr.bf16.mxu1 %v8552_v28 }
 0x5b8   :  { %8284 = vmatpush3.bf16.msra.mxu0 %v8551_v27  ;;  %8306 = vmatpush3.bf16.msra.mxu1 %v8553_v34 }
 0x5b9   :  { %7164 = vmatprep.subr.bf16.mxu0 %v8844_v0  ;;  %7219 = vmatprep.subr.bf16.mxu1 %v8844_v0 }
 0x5e6   :  { %v6769_v23 = vpop.permute.xlu0 %6768  ;;  %v6777_v28 = vpop.permute.xlu1 %6776 }
 0x5e7   :  { %v6771_v49 = vadd.f32 %v9777_v35, %v6769_v23 }
 0x5ea   :  { %v6773_v26 = vpop.permute.xlu0 %6772 }
 0x5eb   :  { %v6775_v27 = vadd.f32 %v6773_v26, %v6771_v49 }
 0x5ed   :  { %v6779_v34 = vadd.f32 %v6777_v28, %v6775_v27 }
 0x5ef   :  { %v6780_v38 = vmul.f32 0.25, %v6779_v34 }
 0x66e   :  { %v6643_v40 = vpop.f32.mrb[56].mxu0  ;;  %v6684_v24 = vpop.f32.mrb[56].mxu1 }
 0x66f   :  { %v6695_v1 = vmul.f32 %v6691_v62, %v6643_v40  ;;  %v6697_v32 = vmul.f32 %v6693_v43, %v6684_v24  ;;  %v6645_v20 = vpop.f32.mrb[57].mxu0  ;;  %v6686_v30 = vpop.f32.mrb[57].mxu1 }
 0x670   :  { %v6696_v3 = vmul.f32 %v6692_v18, %v6645_v20  ;;  %v6698_v37 = vmul.f32 %v6694_v60, %v6686_v30  ;;  %v6647_v61 = vpop.f32.mrb[58].mxu0  ;;  %v6688_v31 = vpop.f32.mrb[58].mxu1 }
 0x671   :  { %v6648_v8 = vpop.f32.mrb[59].mxu0  ;;  %v6689_v17 = vpop.f32.mrb[59].mxu1  ;;  %v6699_v25 = vpack.c.bf16 %v6695_v1, %v6695_v1  ;;  %v6701_v29 = vpack.c.bf16 %v6697_v32, %v6697_v32 }
 0x672   :  { %v6700_v11 = vpack.c.bf16 %v6696_v3, %v6696_v3  ;;  %v6702_v4 = vpack.c.bf16 %v6698_v37, %v6698_v37 }
 0x674   :  { %7005 = vmatprep.mubr.bf16.mxu0 %v6700_v11  ;;  %7045 = vmatprep.mubr.bf16.mxu1 %v6702_v4 }
 0x675   :  { %7006 = vmatmul.mubr.bf16.vlgmr.msra.gmra.mrb[60].mxu0 %v6699_v25  ;;  %7046 = vmatmul.mubr.bf16.vlgmr.msra.gmra.mrb[60].mxu1 %v6701_v29 }
 0x676   :  { %7165 = vmatpush1.bf16.msra.mxu0 %v8554_v15  ;;  %7220 = vmatpush1.bf16.msra.mxu1 %v8554_v15 }
 0x677   :  { %7166 = vmatprep.subr.bf16.mxu0 %v8844_v0  ;;  %7221 = vmatprep.subr.bf16.mxu1 %v8844_v0 }
 0x678   :  { %8091 = vmatprep.mubr.msk.bf16.mxu0 %vm7160_vm2, %v7064_v12  ;;  %8092 = vmatprep.mubr.msk.bf16.mxu1 %vm7160_vm2, %v7215_v33 }
 0x67a   :  { %7167 = vmatpush1.bf16.msra.mxu0 %v8555_v13  ;;  %7222 = vmatpush1.bf16.msra.mxu1 %v8555_v13 }
 0x67b   :  { %7168 = vmatprep.subr.bf16.mxu0 %v8844_v0  ;;  %7223 = vmatprep.subr.bf16.mxu1 %v8844_v0 }
 0x67e   :  { %7169 = vmatpush1.bf16.msra.mxu0 %v8556_v14  ;;  %7224 = vmatpush1.bf16.msra.mxu1 %v8556_v14 }
 0x67f   :  { %7170 = vmatprep.subr.bf16.mxu0 %v8844_v0  ;;  %7225 = vmatprep.subr.bf16.mxu1 %v8844_v0 }
 0x682   :  { %7171 = vmatpush1.bf16.msra.mxu0 %v8557_v2  ;;  %7226 = vmatpush1.bf16.msra.mxu1 %v8557_v2 }
 0x683   :  { %7172 = vmatprep.subr.bf16.mxu0 %v8844_v0  ;;  %7227 = vmatprep.subr.bf16.mxu1 %v8844_v0 }
 0x686   :  { %7173 = vmatpush1.bf16.msra.mxu0 %v8558_v5  ;;  %7228 = vmatpush1.bf16.msra.mxu1 %v8558_v5 }
 0x687   :  { %7174 = vmatprep.subr.bf16.mxu0 %v8844_v0  ;;  %7229 = vmatprep.subr.bf16.mxu1 %v8844_v0 }
 0x68a   :  { %7175 = vmatpush1.bf16.msra.mxu0 %v8559_v6  ;;  %7230 = vmatpush1.bf16.msra.mxu1 %v8559_v6 }
 0x68b   :  { %7176 = vmatprep.subr.bf16.mxu0 %v8844_v0  ;;  %7231 = vmatprep.subr.bf16.mxu1 %v8844_v0 }
 0x68e   :  { %7177 = vmatpush1.bf16.msra.mxu0 %v8560_v19  ;;  %7232 = vmatpush1.bf16.msra.mxu1 %v8560_v19 }
 0x68f   :  { %7178 = vmatprep.subr.bf16.mxu0 %v8844_v0  ;;  %7233 = vmatprep.subr.bf16.mxu1 %v8844_v0 }
 0x692   :  { %7179 = vmatpush1.bf16.msra.mxu0 %v8561_v7  ;;  %7234 = vmatpush1.bf16.msra.mxu1 %v8561_v7 }
 0x693   :  { %7180 = vmatprep.subr.bf16.mxu0 %v8844_v0  ;;  %7235 = vmatprep.subr.bf16.mxu1 %v8844_v0 }
 0x696   :  { %7181 = vmatpush1.bf16.msra.mxu0 %v8562_v16  ;;  %7236 = vmatpush1.bf16.msra.mxu1 %v8562_v16 }
 0x697   :  { %7182 = vmatprep.subr.bf16.mxu0 %v8844_v0  ;;  %7237 = vmatprep.subr.bf16.mxu1 %v8844_v0 }
 0x69a   :  { %7183 = vmatpush1.bf16.msra.mxu0 %v8563_v39  ;;  %7238 = vmatpush1.bf16.msra.mxu1 %v8563_v39 }
 0x69b   :  { %7184 = vmatprep.subr.bf16.mxu0 %v8844_v0  ;;  %7239 = vmatprep.subr.bf16.mxu1 %v8844_v0 }
 0x69e   :  { %7185 = vmatpush1.bf16.msra.mxu0 %v8564_v36  ;;  %7240 = vmatpush1.bf16.msra.mxu1 %v8564_v36 }
 0x6a1   :  { %7197 = vmatmul.mubr.bf16.vlgmr.msra.gmra.mrb[64].mxu0 %v7063_v59  ;;  %7252 = vmatmul.mubr.bf16.vlgmr.msra.gmra.mrb[64].mxu1 %v7214_v22 }
 0x748   :  { %v8285_v55 = vpop.f32.mrb[60].mxu0  ;;  %v8307_v44 = vpop.f32.mrb[60].mxu1 }
 0x749   :  { %v8286_v45 = vpop.f32.mrb[61].mxu0  ;;  %v8308_v46 = vpop.f32.mrb[61].mxu1 }
 0x74a   :  { %v8287_v47 = vadd.f32 %v8286_v45, %v8285_v55  ;;  %v8309_v0 = vadd.f32 %v8308_v46, %v8307_v44  ;;  %v8288_v48 = vpop.f32.mrb[62].mxu0  ;;  %v8310_v50 = vpop.f32.mrb[62].mxu1 }
 0x74b   :  { %v8289_v51 = vpop.f32.mrb[63].mxu0  ;;  %v8311_v52 = vpop.f32.mrb[63].mxu1 }
 0x74c   :  { %v7008_v53 = vadd.f32 %v8287_v47, %v6780_v38 }
 0x74e   :  { %v7048_v54 = vadd.f32 %v8309_v0, %v7008_v53 }
 0x750   :  { %v7053_v57 = vmul.f32 %v7048_v54, %v7048_v54 }
 0x752   :  { %v7055_v35 = vsel %vm7054_vm3, %v7053_v57, 0.0 }
 0x753   :  { %7056 = vadd.xlane.f32.xlu1 %v7055_v35 }
 0x774   :  { %v7198_v42 = vpop.f32.mrb[64].mxu0  ;;  %v7253_v58 = vpop.f32.mrb[64].mxu1 }
 0x775   :  { %v7199_v56 = vadd.f32 %v8079_v41, %v7198_v42  ;;  %v7200_v62 = vpop.f32.mrb[65].mxu0  ;;  %v7254_v43 = vadd.f32 %v8079_v41, %v7253_v58  ;;  %v7255_v18 = vpop.f32.mrb[65].mxu1 }
 0x776   :  { %v7201_v60 = vpop.f32.mrb[66].mxu0  ;;  %v7256_v40 = vpop.f32.mrb[66].mxu1 }
 0x777   :  { %v7204_v24 = vmax.f32 %v7199_v56, 0.0  ;;  %v7259_v1 = vmax.f32 %v7254_v43, 0.0  ;;  %v7202_v32 = vpop.f32.mrb[67].mxu0  ;;  %v7257_v20 = vpop.f32.mrb[67].mxu1 }
 0x779   :  { %v7205_v30 = vmul.f32 %v7204_v24, %v7204_v24  ;;  %v7260_v3 = vmul.f32 %v7259_v1, %v7259_v1 }
 0x77b   :  { %v7206_v37 = vsel %vm7054_vm3, %v7205_v30, 0.0  ;;  %v7261_v61 = vsel %vm7054_vm3, %v7260_v3, 0.0 }
 0x77c   :  { %7207 = vadd.xlane.f32.xlu0 %v7206_v37 }
 0x780   :  { %7262 = vadd.xlane.f32.xlu0 %v7261_v61 }
 0x7e0   :  { %v7057_v31 = vpop.xlane.xlu1 %7056 }
 0x7e1   :  { %v7058_v8 = vmax.f32 %v7057_v31, 1e-24 }
 0x7e3   :  { %8565 = vrsqrt.f32 %v7058_v8 }
 0x7ed   :  { %v8566_v4 = vpop.eup %8565 }
 0x7ee   :  { %v7060_v25 = vmul.f32 %v8566_v4, %v7048_v54 }
 0x809   :  { %v7208_v17 = vpop.xlane.xlu0 %7207 }
 0x80a   :  { %v7209_v9 = vmax.f32 %v7208_v17, 1e-24 }
 0x80c   :  { %8567 = vrsqrt.f32 %v7209_v9 }
 0x80d   :  { %v7263_v10 = vpop.xlane.xlu0 %7262 }
 0x80e   :  { %v7264_v11 = vmax.f32 %v7263_v10, 1e-24 }
 0x810   :  { %8569 = vrsqrt.f32 %v7264_v11 }
 0x816   :  { %v8568_v15 = vpop.eup %8567 }
 0x817   :  { %v7211_v29 = vmul.f32 %v8568_v15, %v7204_v24 }
 0x819   :  { %v7267_v12 = vmul.f32 %v7211_v29, %v7060_v25 }
 0x81a   :  { %v8570_v33 = vpop.eup %8569 }
 0x81b   :  { %v7268_v13 = vsel %vm7054_vm3, %v7267_v12, 0.0  ;;  %v7266_v14 = vmul.f32 %v8570_v33, %v7259_v1 }
 0x81c   :  { %7269 = vadd.xlane.f32.xlu1 %v7268_v13 }
 0x81d   :  { %v7271_v2 = vmul.f32 %v7266_v14, %v7060_v25 }
 0x81f   :  { %v7272_v5 = vsel %vm7054_vm3, %v7271_v2, 0.0 }
 0x820   :  { %7273 = vadd.xlane.f32.xlu0 %v7272_v5 }
 0x8a9   :  { %v7270_v6 = vpop.xlane.xlu1 %7269 }
 0x8ad   :  { %v7274_v19 = vpop.xlane.xlu0 %7273 }
 0x8ae   :  { %v7276_v7 = vsel %vm7275_vm4, %v7270_v6, %v7274_v19 }
 0x8af   :  { %7278 = vst.msk [vmem:[%s9866_s14] sm:$0xff] %vm7277_vm5, %v7276_v7 }
 0x8b0   :  { %7283 = vsyncpa [#allocation3], 1 }
 0x8b1   :  { %7284 = vsyncpa [#allocation5], 1 }
 0x8b2   :  { %7285 = vsyncpa [#allocation8], 1 }
 0x8b3   :  { %7286 = vsyncpa [#allocation11], 1 }
 0x8b4   :  { %7287 = vsyncpa [#allocation14], 1 }
 0x8b5   :  { %7288 = vsyncpa [#allocation17], 1 }

</bundles_post_ra>
